<compile_context>
chip_gen: v7x
topology: tpu7x:2x2x1
jax: 0.10.0
libtpu: 0.0.40
codegen_flags: <defaults>
</compile_context>

<pallas_src>
import math

import jax
import jax.numpy as jnp
from jax import lax
from jax.experimental import pallas as pl
from jax.experimental.pallas import tpu as pltpu


# ----------------------------- config (small) -------------------------------
N_EMBD = 32
N_HEAD = 4
BLOCK_EXP = 4
N_LAYER = 2
IMG_VERT, IMG_HORZ = 8, 8
RADAR_VERT, RADAR_HORZ = 4, 4
SEQ_LEN = 1
BZ = 2

GPT_LINEAR_INIT_MEAN = 0.0
GPT_LINEAR_INIT_STD = 0.02
GPT_LN_INIT_WEIGHT = 1.0

IMG_TOK = SEQ_LEN * IMG_VERT * IMG_HORZ        # 64
RAD_TOK = SEQ_LEN * RADAR_VERT * RADAR_HORZ    # 16
T_TOKENS = IMG_TOK + RAD_TOK                   # 80
HEAD_DIM = N_EMBD // N_HEAD                    # 8
HIDDEN = BLOCK_EXP * N_EMBD                    # 128
LN_EPS = 1e-5


# ------------------------------- kernel --------------------------------------
def _ln_normalize(x):
    """LayerNorm without affine (gamma/beta folded into the next matmul)."""
    mu = jnp.mean(x, axis=-1, keepdims=True)
    var = jnp.mean((x - mu) * (x - mu), axis=-1, keepdims=True)
    return (x - mu) * lax.rsqrt(var + LN_EPS)


def gpt_kernel(img_ref, rad_ref, pos_ref,
               wqkv_ref, bqkv_ref,
               wp_ref, bp_ref,
               w1_ref, b1_ref, w2_ref, b2_ref,
               lnfg_ref, lnfb_ref,
               o_img_ref, o_rad_ref):
    """Full GPT (token assembly + all Blocks + final LN) for one batch element.

    img_ref: (1, IMG_TOK, C)   rad_ref: (1, RAD_TOK, C)   pos_ref: (T, C)
    """
    # token assembly: concat(img tokens, radar tokens) + positional embedding
    x = jnp.concatenate([img_ref[0], rad_ref[0]], axis=0) + pos_ref[...]  # (T, C)

    for l in range(N_LAYER):           # static unroll: full LLO visibility
        # ---- attention branch: x = x + proj(attn(ln1(x))) ----
        h = _ln_normalize(x)
        # fused QKV projection: one (T,C)x(C,3C) MXU matmul.
        # ln1 gamma/beta and the 1/sqrt(head_dim) scale are pre-folded into
        # wqkv / bqkv at parameter-prep time.
        qkv = jnp.dot(h, wqkv_ref[l],
                      preferred_element_type=jnp.float32) + bqkv_ref[l]

        wp_l = wp_ref[l]               # (N_HEAD, HEAD_DIM, C) per-head proj
        acc = x + bp_ref[l]            # residual + proj bias

        for hh in range(N_HEAD):
            q_h = qkv[:, hh * HEAD_DIM:(hh + 1) * HEAD_DIM]
            k_h = qkv[:, N_EMBD + hh * HEAD_DIM:N_EMBD + (hh + 1) * HEAD_DIM]
            v_h = qkv[:, 2 * N_EMBD + hh * HEAD_DIM:2 * N_EMBD + (hh + 1) * HEAD_DIM]

            # q @ k^T without materializing a transpose
            att = lax.dot_general(q_h, k_h, (((1,), (1,)), ((), ())),
                                  preferred_element_type=jnp.float32)  # (T, T)
            att = jnp.exp(att - jnp.max(att, axis=-1, keepdims=True))
            att = att * pl.reciprocal(jnp.sum(att, axis=-1, keepdims=True),
                                      approx=True)
            y_h = jnp.dot(att, v_h, preferred_element_type=jnp.float32)  # (T, D)
            # fold head output straight into the output projection (no concat)
            acc = acc + jnp.dot(y_h, wp_l[hh],
                                preferred_element_type=jnp.float32)
        x = acc

        # ---- MLP branch: x = x + mlp(ln2(x)) ----
        h2 = _ln_normalize(x)          # ln2 gamma/beta folded into w1/b1
        m = jnp.dot(h2, w1_ref[l], preferred_element_type=jnp.float32) + b1_ref[l]
        m = jnp.maximum(m, 0.0)
        x = x + jnp.dot(m, w2_ref[l], preferred_element_type=jnp.float32) + b2_ref[l]

    # ---- final LayerNorm (with affine) ----
    x = _ln_normalize(x) * lnfg_ref[...] + lnfb_ref[...]

    # split into the two output streams (static sublane slices)
    o_img_ref[0] = x[:IMG_TOK]
    o_rad_ref[0] = x[IMG_TOK:]


# ------------------------------- wrappers -------------------------------------
def _resident_spec(shape):
    """Full-array spec with a constant index_map -> DMA'd into VMEM once."""
    nd = len(shape)
    return pl.BlockSpec(shape, lambda b, _nd=nd: (0,) * _nd)


def run_gpt(img_tok, rad_tok, p):
    """img_tok: (B, IMG_TOK, C), rad_tok: (B, RAD_TOK, C); p: stacked params."""
    B = img_tok.shape[0]
    weights = [p["pos_emb"],
               p["wqkv"], p["bqkv"],
               p["wp"], p["bp"],
               p["w1"], p["b1"], p["w2"], p["b2"],
               p["lnf_g"], p["lnf_b"]]
    in_specs = [pl.BlockSpec((1, IMG_TOK, N_EMBD), lambda b: (b, 0, 0)),
                pl.BlockSpec((1, RAD_TOK, N_EMBD), lambda b: (b, 0, 0))]
    in_specs += [_resident_spec(w.shape) for w in weights]
    out_specs = [pl.BlockSpec((1, IMG_TOK, N_EMBD), lambda b: (b, 0, 0)),
                 pl.BlockSpec((1, RAD_TOK, N_EMBD), lambda b: (b, 0, 0))]
    return pl.pallas_call(
        gpt_kernel,
        out_shape=(jax.ShapeDtypeStruct((B, IMG_TOK, N_EMBD), jnp.float32),
                   jax.ShapeDtypeStruct((B, RAD_TOK, N_EMBD), jnp.float32)),
        grid=(B,),
        in_specs=in_specs,
        out_specs=out_specs,
        compiler_params=pltpu.CompilerParams(
            dimension_semantics=("parallel",)),  # v7x: one batch elem per TC
    )(img_tok, rad_tok, *weights)


def init_params(key):
    """Deterministic init mirroring GPT._init_weights, with perf-motivated folds.

    Linear weights ~ N(mean, std) stored as (in, out) (Gaussian init is
    symmetric so semantics match y = x @ W^T + b), biases = 0, LayerNorm
    weight = gpt_layer_norm_init_weight / bias = 0, pos_emb = zeros.

    Folds done once here (zero per-forward cost):
      * Q/K/V fused into one (C, 3C) weight; 1/sqrt(head_dim) folded into the
        Q columns.
      * ln1 affine folded into wqkv/bqkv; ln2 affine folded into w1/b1
        (LN(x)@W + b  ==  LN_noaffine(x) @ (g[:,None]*W) + (b + beta@W)).
      * proj weight stored per-head as (H, D, C) so head outputs accumulate
        directly onto the residual.
    """
    def lin(k, fan_in, fan_out):
        w = GPT_LINEAR_INIT_MEAN + GPT_LINEAR_INIT_STD * jax.random.normal(
            k, (fan_in, fan_out), dtype=jnp.float32)
        b = jnp.zeros((fan_out,), jnp.float32)
        return w, b

    scale = 1.0 / math.sqrt(HEAD_DIM)
    ln_g = jnp.full((N_EMBD,), GPT_LN_INIT_WEIGHT, jnp.float32)
    ln_b = jnp.zeros((N_EMBD,), jnp.float32)

    per = {k: [] for k in ("wqkv", "bqkv", "wp", "bp", "w1", "b1", "w2", "b2")}
    for _ in range(N_LAYER):
        key, *ks = jax.random.split(key, 7)
        wq, bq = lin(ks[0], N_EMBD, N_EMBD)
        wk, bk = lin(ks[1], N_EMBD, N_EMBD)
        wv, bv = lin(ks[2], N_EMBD, N_EMBD)
        wp, bp = lin(ks[3], N_EMBD, N_EMBD)
        w1, b1 = lin(ks[4], N_EMBD, HIDDEN)
        w2, b2 = lin(ks[5], HIDDEN, N_EMBD)

        wqkv = jnp.concatenate([wq * scale, wk, wv], axis=1)           # (C, 3C)
        bqkv = jnp.concatenate([bq * scale, bk, bv], axis=0)           # (3C,)
        # fold ln1 affine into the fused QKV projection
        wqkv_f = ln_g[:, None] * wqkv
        bqkv_f = bqkv + ln_b @ wqkv
        # fold ln2 affine into the first MLP linear
        w1_f = ln_g[:, None] * w1
        b1_f = b1 + ln_b @ w1

        per["wqkv"].append(wqkv_f)
        per["bqkv"].append(bqkv_f[None, :])
        per["wp"].append(wp.reshape(N_HEAD, HEAD_DIM, N_EMBD))         # (H, D, C)
        per["bp"].append(bp[None, :])
        per["w1"].append(w1_f)
        per["b1"].append(b1_f[None, :])
        per["w2"].append(w2)
        per["b2"].append(b2[None, :])

    params = {k: jnp.stack(v, axis=0) for k, v in per.items()}
    params["lnf_g"] = jnp.full((1, N_EMBD), GPT_LN_INIT_WEIGHT, jnp.float32)
    params["lnf_b"] = jnp.zeros((1, N_EMBD), jnp.float32)
    params["pos_emb"] = jnp.zeros((T_TOKENS, N_EMBD), jnp.float32)
    return params


def gpt_forward(image_tensor, radar_tensor, params):
    """image_tensor: (bz*seq_len, n_embd, img_h, img_w) NCHW
       radar_tensor: (bz*seq_len, n_embd, radar_h, radar_w) NCHW"""
    bz = radar_tensor.shape[0]
    img_h, img_w = image_tensor.shape[2], image_tensor.shape[3]
    radar_h, radar_w = radar_tensor.shape[2], radar_tensor.shape[3]

    # NCHW -> (B, H*W, C): matches view/permute/view in the torch forward.
    img_tok = jnp.transpose(image_tensor, (0, 2, 3, 1)).reshape(bz, -1, N_EMBD)
    rad_tok = jnp.transpose(radar_tensor, (0, 2, 3, 1)).reshape(bz, -1, N_EMBD)

    # pos_emb add + concat + all Blocks + final LN run inside one pallas_call.
    # drop(.) is identity in eval mode.
    img_out, rad_out = run_gpt(img_tok, rad_tok, params)

    # torch does `.contiguous().view(bz*seq_len, -1, h, w)`: a RAW row-major
    # reinterpretation of the (B, T, C) buffer (no permute back), i.e. a plain
    # reshape here (free metadata op on a contiguous array).
    img_out = img_out.reshape(bz * SEQ_LEN, -1, img_h, img_w)
    rad_out = rad_out.reshape(bz * SEQ_LEN, -1, radar_h, radar_w)
    return img_out, rad_out


# --------------------------------- main ---------------------------------------
if __name__ == "__main__":
    key = jax.random.PRNGKey(0)
    kp, ki, kr = jax.random.split(key, 3)

    params = init_params(kp)
    image_tensor = jax.random.normal(
        ki, (BZ * SEQ_LEN, N_EMBD, IMG_VERT, IMG_HORZ), dtype=jnp.float32)
    radar_tensor = jax.random.normal(
        kr, (BZ * SEQ_LEN, N_EMBD, RADAR_VERT, RADAR_HORZ), dtype=jnp.float32)

    fwd = jax.jit(gpt_forward)
    img_out, rad_out = fwd(image_tensor, radar_tensor, params)
    jax.block_until_ready(img_out)
    jax.block_until_ready(rad_out)

    assert img_out.shape == (BZ * SEQ_LEN, N_EMBD, IMG_VERT, IMG_HORZ)
    assert rad_out.shape == (BZ * SEQ_LEN, N_EMBD, RADAR_VERT, RADAR_HORZ)
    assert bool(jnp.isfinite(img_out).all()) and bool(jnp.isfinite(rad_out).all())
    print("KERNEL_OK")
</pallas_src>

<mosaic_0001>
module attributes {stable_mosaic.version = 11 : i64} {
  func.func @gpt_kernel(%arg0: i32, %arg1: memref<1x64x32xf32, #tpu.memory_space<vmem>>, %arg2: memref<1x16x32xf32, #tpu.memory_space<vmem>>, %arg3: memref<80x32xf32, #tpu.memory_space<vmem>>, %arg4: memref<2x32x96xf32, #tpu.memory_space<vmem>>, %arg5: memref<2x1x96xf32, #tpu.memory_space<vmem>>, %arg6: memref<2x4x8x32xf32, #tpu.memory_space<vmem>>, %arg7: memref<2x1x32xf32, #tpu.memory_space<vmem>>, %arg8: memref<2x32x128xf32, #tpu.memory_space<vmem>>, %arg9: memref<2x1x128xf32, #tpu.memory_space<vmem>>, %arg10: memref<2x128x32xf32, #tpu.memory_space<vmem>>, %arg11: memref<2x1x32xf32, #tpu.memory_space<vmem>>, %arg12: memref<1x32xf32, #tpu.memory_space<vmem>>, %arg13: memref<1x32xf32, #tpu.memory_space<vmem>>, %arg14: memref<1x64x32xf32, #tpu.memory_space<vmem>>, %arg15: memref<1x16x32xf32, #tpu.memory_space<vmem>>) attributes {dimension_semantics = [#tpu.dimension_semantics<parallel>], iteration_bounds = array<i64: 2>, scalar_prefetch = 0 : i64, scratch_operands = 0 : i64, tpu.core_type = #tpu.core_type<tc>, window_params = [{transform_indices = @transform_0, window_bounds = array<i64: 1, 64, 32>}, {transform_indices = @transform_1, window_bounds = array<i64: 1, 16, 32>}, {pipeline_mode = #tpu.pipeline_mode<synchronous>, transform_indices = @transform_2, window_bounds = array<i64: 80, 32>}, {pipeline_mode = #tpu.pipeline_mode<synchronous>, transform_indices = @transform_3, window_bounds = array<i64: 2, 32, 96>}, {pipeline_mode = #tpu.pipeline_mode<synchronous>, transform_indices = @transform_4, window_bounds = array<i64: 2, 1, 96>}, {pipeline_mode = #tpu.pipeline_mode<synchronous>, transform_indices = @transform_5, window_bounds = array<i64: 2, 4, 8, 32>}, {pipeline_mode = #tpu.pipeline_mode<synchronous>, transform_indices = @transform_6, window_bounds = array<i64: 2, 1, 32>}, {pipeline_mode = #tpu.pipeline_mode<synchronous>, transform_indices = @transform_7, window_bounds = array<i64: 2, 32, 128>}, {pipeline_mode = #tpu.pipeline_mode<synchronous>, transform_indices = @transform_8, window_bounds = array<i64: 2, 1, 128>}, {pipeline_mode = #tpu.pipeline_mode<synchronous>, transform_indices = @transform_9, window_bounds = array<i64: 2, 128, 32>}, {pipeline_mode = #tpu.pipeline_mode<synchronous>, transform_indices = @transform_10, window_bounds = array<i64: 2, 1, 32>}, {pipeline_mode = #tpu.pipeline_mode<synchronous>, transform_indices = @transform_11, window_bounds = array<i64: 1, 32>}, {pipeline_mode = #tpu.pipeline_mode<synchronous>, transform_indices = @transform_12, window_bounds = array<i64: 1, 32>}, {transform_indices = @transform_13, window_bounds = array<i64: 1, 64, 32>}, {transform_indices = @transform_14, window_bounds = array<i64: 1, 16, 32>}]} {
    %c0 = arith.constant 0 : index
    %c0_0 = arith.constant 0 : index
    %c0_1 = arith.constant 0 : index
    %0 = vector.load %arg1[%c0, %c0_0, %c0_1] : memref<1x64x32xf32, #tpu.memory_space<vmem>>, vector<1x64x32xf32>
    %1 = vector.shape_cast %0 : vector<1x64x32xf32> to vector<64x32xf32>
    %c0_2 = arith.constant 0 : index
    %c0_3 = arith.constant 0 : index
    %c0_4 = arith.constant 0 : index
    %2 = vector.load %arg2[%c0_2, %c0_3, %c0_4] : memref<1x16x32xf32, #tpu.memory_space<vmem>>, vector<1x16x32xf32>
    %3 = vector.shape_cast %2 : vector<1x16x32xf32> to vector<16x32xf32>
    %4 = tpu.concatenate %1, %3 in 0 : vector<64x32xf32>, vector<16x32xf32> -> vector<80x32xf32>
    %c0_5 = arith.constant 0 : index
    %c0_6 = arith.constant 0 : index
    %5 = vector.load %arg3[%c0_5, %c0_6] : memref<80x32xf32, #tpu.memory_space<vmem>>, vector<80x32xf32>
    %6 = arith.addf %4, %5 : vector<80x32xf32>
    %cst = arith.constant dense<0.000000e+00> : vector<80xf32>
    %7 = vector.multi_reduction <add>, %6, %cst [1] : vector<80x32xf32> to vector<80xf32>
    %8 = vector.shape_cast %7 : vector<80xf32> to vector<80x1xf32>
    %cst_7 = arith.constant 3.200000e+01 : f32
    %9 = vector.broadcast %cst_7 : f32 to vector<80x1xf32>
    %10 = arith.divf %8, %9 : vector<80x1xf32>
    %11 = vector.broadcast %10 : vector<80x1xf32> to vector<80x32xf32>
    %12 = arith.subf %6, %11 : vector<80x32xf32>
    %13 = vector.broadcast %10 : vector<80x1xf32> to vector<80x32xf32>
    %14 = arith.subf %6, %13 : vector<80x32xf32>
    %15 = arith.mulf %12, %14 : vector<80x32xf32>
    %cst_8 = arith.constant dense<0.000000e+00> : vector<80xf32>
    %16 = vector.multi_reduction <add>, %15, %cst_8 [1] : vector<80x32xf32> to vector<80xf32>
    %17 = vector.shape_cast %16 : vector<80xf32> to vector<80x1xf32>
    %cst_9 = arith.constant 3.200000e+01 : f32
    %18 = vector.broadcast %cst_9 : f32 to vector<80x1xf32>
    %19 = arith.divf %17, %18 : vector<80x1xf32>
    %20 = vector.broadcast %10 : vector<80x1xf32> to vector<80x32xf32>
    %21 = arith.subf %6, %20 : vector<80x32xf32>
    %cst_10 = arith.constant 9.99999974E-6 : f32
    %22 = vector.broadcast %cst_10 : f32 to vector<80x1xf32>
    %23 = arith.addf %19, %22 : vector<80x1xf32>
    %24 = math.rsqrt %23 : vector<80x1xf32>
    %25 = vector.broadcast %24 : vector<80x1xf32> to vector<80x32xf32>
    %26 = arith.mulf %21, %25 : vector<80x32xf32>
    %c0_11 = arith.constant 0 : index
    %c0_12 = arith.constant 0 : index
    %c0_13 = arith.constant 0 : index
    %27 = vector.load %arg4[%c0_11, %c0_12, %c0_13] : memref<2x32x96xf32, #tpu.memory_space<vmem>>, vector<1x32x96xf32>
    %28 = vector.shape_cast %27 : vector<1x32x96xf32> to vector<32x96xf32>
    %cst_14 = arith.constant dense<0.000000e+00> : vector<80x96xf32>
    %29 = tpu.matmul %26, %28, %cst_14 {dimension_numbers = #tpu.dot_dimension_numbers<[1], [0], [0], [1], [0, 0, 1, 1], [], []>} : vector<80x32xf32>, vector<32x96xf32>, vector<80x96xf32> -> vector<80x96xf32>
    %c0_15 = arith.constant 0 : index
    %c0_16 = arith.constant 0 : index
    %c0_17 = arith.constant 0 : index
    %30 = vector.load %arg5[%c0_15, %c0_16, %c0_17] : memref<2x1x96xf32, #tpu.memory_space<vmem>>, vector<1x1x96xf32>
    %31 = vector.shape_cast %30 : vector<1x1x96xf32> to vector<1x96xf32>
    %32 = vector.broadcast %31 : vector<1x96xf32> to vector<80x96xf32>
    %33 = arith.addf %29, %32 : vector<80x96xf32>
    %c0_18 = arith.constant 0 : index
    %c0_19 = arith.constant 0 : index
    %c0_20 = arith.constant 0 : index
    %c0_21 = arith.constant 0 : index
    %34 = vector.load %arg6[%c0_18, %c0_19, %c0_20, %c0_21] : memref<2x4x8x32xf32, #tpu.memory_space<vmem>>, vector<1x4x8x32xf32>
    %35 = vector.shape_cast %34 : vector<1x4x8x32xf32> to vector<4x8x32xf32>
    %c0_22 = arith.constant 0 : index
    %c0_23 = arith.constant 0 : index
    %c0_24 = arith.constant 0 : index
    %36 = vector.load %arg7[%c0_22, %c0_23, %c0_24] : memref<2x1x32xf32, #tpu.memory_space<vmem>>, vector<1x1x32xf32>
    %37 = vector.shape_cast %36 : vector<1x1x32xf32> to vector<1x32xf32>
    %38 = vector.broadcast %37 : vector<1x32xf32> to vector<80x32xf32>
    %39 = arith.addf %6, %38 : vector<80x32xf32>
    %40 = vector.extract_strided_slice %33 {offsets = [0, 0], sizes = [80, 8], strides = [1, 1]} : vector<80x96xf32> to vector<80x8xf32>
    %41 = vector.extract_strided_slice %33 {offsets = [0, 32], sizes = [80, 8], strides = [1, 1]} : vector<80x96xf32> to vector<80x8xf32>
    %42 = vector.extract_strided_slice %33 {offsets = [0, 64], sizes = [80, 8], strides = [1, 1]} : vector<80x96xf32> to vector<80x8xf32>
    %cst_25 = arith.constant dense<0.000000e+00> : vector<80x80xf32>
    %43 = tpu.matmul %40, %41, %cst_25 {dimension_numbers = #tpu.dot_dimension_numbers<[1], [1], [0], [0], [0, 0, 1, 0], [], []>} : vector<80x8xf32>, vector<80x8xf32>, vector<80x80xf32> -> vector<80x80xf32>
    %cst_26 = arith.constant dense<0xFF800000> : vector<80xf32>
    %44 = vector.multi_reduction <maximumf>, %43, %cst_26 [1] : vector<80x80xf32> to vector<80xf32>
    %45 = vector.shape_cast %44 : vector<80xf32> to vector<80x1xf32>
    %46 = vector.broadcast %45 : vector<80x1xf32> to vector<80x80xf32>
    %47 = arith.subf %43, %46 : vector<80x80xf32>
    %48 = math.exp %47 : vector<80x80xf32>
    %cst_27 = arith.constant dense<0.000000e+00> : vector<80xf32>
    %49 = vector.multi_reduction <add>, %48, %cst_27 [1] : vector<80x80xf32> to vector<80xf32>
    %50 = vector.shape_cast %49 : vector<80xf32> to vector<80x1xf32>
    %51 = tpu.reciprocal %50 {approx = true} : vector<80x1xf32> -> vector<80x1xf32>
    %52 = vector.broadcast %51 : vector<80x1xf32> to vector<80x80xf32>
    %53 = arith.mulf %48, %52 : vector<80x80xf32>
    %cst_28 = arith.constant dense<0.000000e+00> : vector<80x8xf32>
    %54 = tpu.matmul %53, %42, %cst_28 {dimension_numbers = #tpu.dot_dimension_numbers<[1], [0], [0], [1], [0, 0, 1, 1], [], []>} : vector<80x80xf32>, vector<80x8xf32>, vector<80x8xf32> -> vector<80x8xf32>
    %55 = vector.extract_strided_slice %35 {offsets = [0, 0, 0], sizes = [1, 8, 32], strides = [1, 1, 1]} : vector<4x8x32xf32> to vector<1x8x32xf32>
    %56 = vector.shape_cast %55 : vector<1x8x32xf32> to vector<8x32xf32>
    %cst_29 = arith.constant dense<0.000000e+00> : vector<80x32xf32>
    %57 = tpu.matmul %54, %56, %cst_29 {dimension_numbers = #tpu.dot_dimension_numbers<[1], [0], [0], [1], [0, 0, 1, 1], [], []>} : vector<80x8xf32>, vector<8x32xf32>, vector<80x32xf32> -> vector<80x32xf32>
    %58 = arith.addf %39, %57 : vector<80x32xf32>
    %59 = vector.extract_strided_slice %33 {offsets = [0, 8], sizes = [80, 8], strides = [1, 1]} : vector<80x96xf32> to vector<80x8xf32>
    %60 = vector.extract_strided_slice %33 {offsets = [0, 40], sizes = [80, 8], strides = [1, 1]} : vector<80x96xf32> to vector<80x8xf32>
    %61 = vector.extract_strided_slice %33 {offsets = [0, 72], sizes = [80, 8], strides = [1, 1]} : vector<80x96xf32> to vector<80x8xf32>
    %cst_30 = arith.constant dense<0.000000e+00> : vector<80x80xf32>
    %62 = tpu.matmul %59, %60, %cst_30 {dimension_numbers = #tpu.dot_dimension_numbers<[1], [1], [0], [0], [0, 0, 1, 0], [], []>} : vector<80x8xf32>, vector<80x8xf32>, vector<80x80xf32> -> vector<80x80xf32>
    %cst_31 = arith.constant dense<0xFF800000> : vector<80xf32>
    %63 = vector.multi_reduction <maximumf>, %62, %cst_31 [1] : vector<80x80xf32> to vector<80xf32>
    %64 = vector.shape_cast %63 : vector<80xf32> to vector<80x1xf32>
    %65 = vector.broadcast %64 : vector<80x1xf32> to vector<80x80xf32>
    %66 = arith.subf %62, %65 : vector<80x80xf32>
    %67 = math.exp %66 : vector<80x80xf32>
    %cst_32 = arith.constant dense<0.000000e+00> : vector<80xf32>
    %68 = vector.multi_reduction <add>, %67, %cst_32 [1] : vector<80x80xf32> to vector<80xf32>
    %69 = vector.shape_cast %68 : vector<80xf32> to vector<80x1xf32>
    %70 = tpu.reciprocal %69 {approx = true} : vector<80x1xf32> -> vector<80x1xf32>
    %71 = vector.broadcast %70 : vector<80x1xf32> to vector<80x80xf32>
    %72 = arith.mulf %67, %71 : vector<80x80xf32>
    %cst_33 = arith.constant dense<0.000000e+00> : vector<80x8xf32>
    %73 = tpu.matmul %72, %61, %cst_33 {dimension_numbers = #tpu.dot_dimension_numbers<[1], [0], [0], [1], [0, 0, 1, 1], [], []>} : vector<80x80xf32>, vector<80x8xf32>, vector<80x8xf32> -> vector<80x8xf32>
    %74 = vector.extract_strided_slice %35 {offsets = [1, 0, 0], sizes = [1, 8, 32], strides = [1, 1, 1]} : vector<4x8x32xf32> to vector<1x8x32xf32>
    %75 = vector.shape_cast %74 : vector<1x8x32xf32> to vector<8x32xf32>
    %cst_34 = arith.constant dense<0.000000e+00> : vector<80x32xf32>
    %76 = tpu.matmul %73, %75, %cst_34 {dimension_numbers = #tpu.dot_dimension_numbers<[1], [0], [0], [1], [0, 0, 1, 1], [], []>} : vector<80x8xf32>, vector<8x32xf32>, vector<80x32xf32> -> vector<80x32xf32>
    %77 = arith.addf %58, %76 : vector<80x32xf32>
    %78 = vector.extract_strided_slice %33 {offsets = [0, 16], sizes = [80, 8], strides = [1, 1]} : vector<80x96xf32> to vector<80x8xf32>
    %79 = vector.extract_strided_slice %33 {offsets = [0, 48], sizes = [80, 8], strides = [1, 1]} : vector<80x96xf32> to vector<80x8xf32>
    %80 = vector.extract_strided_slice %33 {offsets = [0, 80], sizes = [80, 8], strides = [1, 1]} : vector<80x96xf32> to vector<80x8xf32>
    %cst_35 = arith.constant dense<0.000000e+00> : vector<80x80xf32>
    %81 = tpu.matmul %78, %79, %cst_35 {dimension_numbers = #tpu.dot_dimension_numbers<[1], [1], [0], [0], [0, 0, 1, 0], [], []>} : vector<80x8xf32>, vector<80x8xf32>, vector<80x80xf32> -> vector<80x80xf32>
    %cst_36 = arith.constant dense<0xFF800000> : vector<80xf32>
    %82 = vector.multi_reduction <maximumf>, %81, %cst_36 [1] : vector<80x80xf32> to vector<80xf32>
    %83 = vector.shape_cast %82 : vector<80xf32> to vector<80x1xf32>
    %84 = vector.broadcast %83 : vector<80x1xf32> to vector<80x80xf32>
    %85 = arith.subf %81, %84 : vector<80x80xf32>
    %86 = math.exp %85 : vector<80x80xf32>
    %cst_37 = arith.constant dense<0.000000e+00> : vector<80xf32>
    %87 = vector.multi_reduction <add>, %86, %cst_37 [1] : vector<80x80xf32> to vector<80xf32>
    %88 = vector.shape_cast %87 : vector<80xf32> to vector<80x1xf32>
    %89 = tpu.reciprocal %88 {approx = true} : vector<80x1xf32> -> vector<80x1xf32>
    %90 = vector.broadcast %89 : vector<80x1xf32> to vector<80x80xf32>
    %91 = arith.mulf %86, %90 : vector<80x80xf32>
    %cst_38 = arith.constant dense<0.000000e+00> : vector<80x8xf32>
    %92 = tpu.matmul %91, %80, %cst_38 {dimension_numbers = #tpu.dot_dimension_numbers<[1], [0], [0], [1], [0, 0, 1, 1], [], []>} : vector<80x80xf32>, vector<80x8xf32>, vector<80x8xf32> -> vector<80x8xf32>
    %93 = vector.extract_strided_slice %35 {offsets = [2, 0, 0], sizes = [1, 8, 32], strides = [1, 1, 1]} : vector<4x8x32xf32> to vector<1x8x32xf32>
    %94 = vector.shape_cast %93 : vector<1x8x32xf32> to vector<8x32xf32>
    %cst_39 = arith.constant dense<0.000000e+00> : vector<80x32xf32>
    %95 = tpu.matmul %92, %94, %cst_39 {dimension_numbers = #tpu.dot_dimension_numbers<[1], [0], [0], [1], [0, 0, 1, 1], [], []>} : vector<80x8xf32>, vector<8x32xf32>, vector<80x32xf32> -> vector<80x32xf32>
    %96 = arith.addf %77, %95 : vector<80x32xf32>
    %97 = vector.extract_strided_slice %33 {offsets = [0, 24], sizes = [80, 8], strides = [1, 1]} : vector<80x96xf32> to vector<80x8xf32>
    %98 = vector.extract_strided_slice %33 {offsets = [0, 56], sizes = [80, 8], strides = [1, 1]} : vector<80x96xf32> to vector<80x8xf32>
    %99 = vector.extract_strided_slice %33 {offsets = [0, 88], sizes = [80, 8], strides = [1, 1]} : vector<80x96xf32> to vector<80x8xf32>
    %cst_40 = arith.constant dense<0.000000e+00> : vector<80x80xf32>
    %100 = tpu.matmul %97, %98, %cst_40 {dimension_numbers = #tpu.dot_dimension_numbers<[1], [1], [0], [0], [0, 0, 1, 0], [], []>} : vector<80x8xf32>, vector<80x8xf32>, vector<80x80xf32> -> vector<80x80xf32>
    %cst_41 = arith.constant dense<0xFF800000> : vector<80xf32>
    %101 = vector.multi_reduction <maximumf>, %100, %cst_41 [1] : vector<80x80xf32> to vector<80xf32>
    %102 = vector.shape_cast %101 : vector<80xf32> to vector<80x1xf32>
    %103 = vector.broadcast %102 : vector<80x1xf32> to vector<80x80xf32>
    %104 = arith.subf %100, %103 : vector<80x80xf32>
    %105 = math.exp %104 : vector<80x80xf32>
    %cst_42 = arith.constant dense<0.000000e+00> : vector<80xf32>
    %106 = vector.multi_reduction <add>, %105, %cst_42 [1] : vector<80x80xf32> to vector<80xf32>
    %107 = vector.shape_cast %106 : vector<80xf32> to vector<80x1xf32>
    %108 = tpu.reciprocal %107 {approx = true} : vector<80x1xf32> -> vector<80x1xf32>
    %109 = vector.broadcast %108 : vector<80x1xf32> to vector<80x80xf32>
    %110 = arith.mulf %105, %109 : vector<80x80xf32>
    %cst_43 = arith.constant dense<0.000000e+00> : vector<80x8xf32>
    %111 = tpu.matmul %110, %99, %cst_43 {dimension_numbers = #tpu.dot_dimension_numbers<[1], [0], [0], [1], [0, 0, 1, 1], [], []>} : vector<80x80xf32>, vector<80x8xf32>, vector<80x8xf32> -> vector<80x8xf32>
    %112 = vector.extract_strided_slice %35 {offsets = [3, 0, 0], sizes = [1, 8, 32], strides = [1, 1, 1]} : vector<4x8x32xf32> to vector<1x8x32xf32>
    %113 = vector.shape_cast %112 : vector<1x8x32xf32> to vector<8x32xf32>
    %cst_44 = arith.constant dense<0.000000e+00> : vector<80x32xf32>
    %114 = tpu.matmul %111, %113, %cst_44 {dimension_numbers = #tpu.dot_dimension_numbers<[1], [0], [0], [1], [0, 0, 1, 1], [], []>} : vector<80x8xf32>, vector<8x32xf32>, vector<80x32xf32> -> vector<80x32xf32>
    %115 = arith.addf %96, %114 : vector<80x32xf32>
    %cst_45 = arith.constant dense<0.000000e+00> : vector<80xf32>
    %116 = vector.multi_reduction <add>, %115, %cst_45 [1] : vector<80x32xf32> to vector<80xf32>
    %117 = vector.shape_cast %116 : vector<80xf32> to vector<80x1xf32>
    %cst_46 = arith.constant 3.200000e+01 : f32
    %118 = vector.broadcast %cst_46 : f32 to vector<80x1xf32>
    %119 = arith.divf %117, %118 : vector<80x1xf32>
    %120 = vector.broadcast %119 : vector<80x1xf32> to vector<80x32xf32>
    %121 = arith.subf %115, %120 : vector<80x32xf32>
    %122 = vector.broadcast %119 : vector<80x1xf32> to vector<80x32xf32>
    %123 = arith.subf %115, %122 : vector<80x32xf32>
    %124 = arith.mulf %121, %123 : vector<80x32xf32>
    %cst_47 = arith.constant dense<0.000000e+00> : vector<80xf32>
    %125 = vector.multi_reduction <add>, %124, %cst_47 [1] : vector<80x32xf32> to vector<80xf32>
    %126 = vector.shape_cast %125 : vector<80xf32> to vector<80x1xf32>
    %cst_48 = arith.constant 3.200000e+01 : f32
    %127 = vector.broadcast %cst_48 : f32 to vector<80x1xf32>
    %128 = arith.divf %126, %127 : vector<80x1xf32>
    %129 = vector.broadcast %119 : vector<80x1xf32> to vector<80x32xf32>
    %130 = arith.subf %115, %129 : vector<80x32xf32>
    %cst_49 = arith.constant 9.99999974E-6 : f32
    %131 = vector.broadcast %cst_49 : f32 to vector<80x1xf32>
    %132 = arith.addf %128, %131 : vector<80x1xf32>
    %133 = math.rsqrt %132 : vector<80x1xf32>
    %134 = vector.broadcast %133 : vector<80x1xf32> to vector<80x32xf32>
    %135 = arith.mulf %130, %134 : vector<80x32xf32>
    %c0_50 = arith.constant 0 : index
    %c0_51 = arith.constant 0 : index
    %c0_52 = arith.constant 0 : index
    %136 = vector.load %arg8[%c0_50, %c0_51, %c0_52] : memref<2x32x128xf32, #tpu.memory_space<vmem>>, vector<1x32x128xf32>
    %137 = vector.shape_cast %136 : vector<1x32x128xf32> to vector<32x128xf32>
    %cst_53 = arith.constant dense<0.000000e+00> : vector<80x128xf32>
    %138 = tpu.matmul %135, %137, %cst_53 {dimension_numbers = #tpu.dot_dimension_numbers<[1], [0], [0], [1], [0, 0, 1, 1], [], []>} : vector<80x32xf32>, vector<32x128xf32>, vector<80x128xf32> -> vector<80x128xf32>
    %c0_54 = arith.constant 0 : index
    %c0_55 = arith.constant 0 : index
    %c0_56 = arith.constant 0 : index
    %139 = vector.load %arg9[%c0_54, %c0_55, %c0_56] : memref<2x1x128xf32, #tpu.memory_space<vmem>>, vector<1x1x128xf32>
    %140 = vector.shape_cast %139 : vector<1x1x128xf32> to vector<1x128xf32>
    %141 = vector.broadcast %140 : vector<1x128xf32> to vector<80x128xf32>
    %142 = arith.addf %138, %141 : vector<80x128xf32>
    %cst_57 = arith.constant 0.000000e+00 : f32
    %143 = vector.broadcast %cst_57 : f32 to vector<80x128xf32>
    %144 = arith.maximumf %142, %143 : vector<80x128xf32>
    %c0_58 = arith.constant 0 : index
    %c0_59 = arith.constant 0 : index
    %c0_60 = arith.constant 0 : index
    %145 = vector.load %arg10[%c0_58, %c0_59, %c0_60] : memref<2x128x32xf32, #tpu.memory_space<vmem>>, vector<1x128x32xf32>
    %146 = vector.shape_cast %145 : vector<1x128x32xf32> to vector<128x32xf32>
    %cst_61 = arith.constant dense<0.000000e+00> : vector<80x32xf32>
    %147 = tpu.matmul %144, %146, %cst_61 {dimension_numbers = #tpu.dot_dimension_numbers<[1], [0], [0], [1], [0, 0, 1, 1], [], []>} : vector<80x128xf32>, vector<128x32xf32>, vector<80x32xf32> -> vector<80x32xf32>
    %148 = arith.addf %115, %147 : vector<80x32xf32>
    %c0_62 = arith.constant 0 : index
    %c0_63 = arith.constant 0 : index
    %c0_64 = arith.constant 0 : index
    %149 = vector.load %arg11[%c0_62, %c0_63, %c0_64] : memref<2x1x32xf32, #tpu.memory_space<vmem>>, vector<1x1x32xf32>
    %150 = vector.shape_cast %149 : vector<1x1x32xf32> to vector<1x32xf32>
    %151 = vector.broadcast %150 : vector<1x32xf32> to vector<80x32xf32>
    %152 = arith.addf %148, %151 : vector<80x32xf32>
    %cst_65 = arith.constant dense<0.000000e+00> : vector<80xf32>
    %153 = vector.multi_reduction <add>, %152, %cst_65 [1] : vector<80x32xf32> to vector<80xf32>
    %154 = vector.shape_cast %153 : vector<80xf32> to vector<80x1xf32>
    %cst_66 = arith.constant 3.200000e+01 : f32
    %155 = vector.broadcast %cst_66 : f32 to vector<80x1xf32>
    %156 = arith.divf %154, %155 : vector<80x1xf32>
    %157 = vector.broadcast %156 : vector<80x1xf32> to vector<80x32xf32>
    %158 = arith.subf %152, %157 : vector<80x32xf32>
    %159 = vector.broadcast %156 : vector<80x1xf32> to vector<80x32xf32>
    %160 = arith.subf %152, %159 : vector<80x32xf32>
    %161 = arith.mulf %158, %160 : vector<80x32xf32>
    %cst_67 = arith.constant dense<0.000000e+00> : vector<80xf32>
    %162 = vector.multi_reduction <add>, %161, %cst_67 [1] : vector<80x32xf32> to vector<80xf32>
    %163 = vector.shape_cast %162 : vector<80xf32> to vector<80x1xf32>
    %cst_68 = arith.constant 3.200000e+01 : f32
    %164 = vector.broadcast %cst_68 : f32 to vector<80x1xf32>
    %165 = arith.divf %163, %164 : vector<80x1xf32>
    %166 = vector.broadcast %156 : vector<80x1xf32> to vector<80x32xf32>
    %167 = arith.subf %152, %166 : vector<80x32xf32>
    %cst_69 = arith.constant 9.99999974E-6 : f32
    %168 = vector.broadcast %cst_69 : f32 to vector<80x1xf32>
    %169 = arith.addf %165, %168 : vector<80x1xf32>
    %170 = math.rsqrt %169 : vector<80x1xf32>
    %171 = vector.broadcast %170 : vector<80x1xf32> to vector<80x32xf32>
    %172 = arith.mulf %167, %171 : vector<80x32xf32>
    %c1 = arith.constant 1 : index
    %c0_70 = arith.constant 0 : index
    %c0_71 = arith.constant 0 : index
    %173 = vector.load %arg4[%c1, %c0_70, %c0_71] : memref<2x32x96xf32, #tpu.memory_space<vmem>>, vector<1x32x96xf32>
    %174 = vector.shape_cast %173 : vector<1x32x96xf32> to vector<32x96xf32>
    %cst_72 = arith.constant dense<0.000000e+00> : vector<80x96xf32>
    %175 = tpu.matmul %172, %174, %cst_72 {dimension_numbers = #tpu.dot_dimension_numbers<[1], [0], [0], [1], [0, 0, 1, 1], [], []>} : vector<80x32xf32>, vector<32x96xf32>, vector<80x96xf32> -> vector<80x96xf32>
    %c1_73 = arith.constant 1 : index
    %c0_74 = arith.constant 0 : index
    %c0_75 = arith.constant 0 : index
    %176 = vector.load %arg5[%c1_73, %c0_74, %c0_75] : memref<2x1x96xf32, #tpu.memory_space<vmem>>, vector<1x1x96xf32>
    %177 = vector.shape_cast %176 : vector<1x1x96xf32> to vector<1x96xf32>
    %178 = vector.broadcast %177 : vector<1x96xf32> to vector<80x96xf32>
    %179 = arith.addf %175, %178 : vector<80x96xf32>
    %c1_76 = arith.constant 1 : index
    %c0_77 = arith.constant 0 : index
    %c0_78 = arith.constant 0 : index
    %c0_79 = arith.constant 0 : index
    %180 = vector.load %arg6[%c1_76, %c0_77, %c0_78, %c0_79] : memref<2x4x8x32xf32, #tpu.memory_space<vmem>>, vector<1x4x8x32xf32>
    %181 = vector.shape_cast %180 : vector<1x4x8x32xf32> to vector<4x8x32xf32>
    %c1_80 = arith.constant 1 : index
    %c0_81 = arith.constant 0 : index
    %c0_82 = arith.constant 0 : index
    %182 = vector.load %arg7[%c1_80, %c0_81, %c0_82] : memref<2x1x32xf32, #tpu.memory_space<vmem>>, vector<1x1x32xf32>
    %183 = vector.shape_cast %182 : vector<1x1x32xf32> to vector<1x32xf32>
    %184 = vector.broadcast %183 : vector<1x32xf32> to vector<80x32xf32>
    %185 = arith.addf %152, %184 : vector<80x32xf32>
    %186 = vector.extract_strided_slice %179 {offsets = [0, 0], sizes = [80, 8], strides = [1, 1]} : vector<80x96xf32> to vector<80x8xf32>
    %187 = vector.extract_strided_slice %179 {offsets = [0, 32], sizes = [80, 8], strides = [1, 1]} : vector<80x96xf32> to vector<80x8xf32>
    %188 = vector.extract_strided_slice %179 {offsets = [0, 64], sizes = [80, 8], strides = [1, 1]} : vector<80x96xf32> to vector<80x8xf32>
    %cst_83 = arith.constant dense<0.000000e+00> : vector<80x80xf32>
    %189 = tpu.matmul %186, %187, %cst_83 {dimension_numbers = #tpu.dot_dimension_numbers<[1], [1], [0], [0], [0, 0, 1, 0], [], []>} : vector<80x8xf32>, vector<80x8xf32>, vector<80x80xf32> -> vector<80x80xf32>
    %cst_84 = arith.constant dense<0xFF800000> : vector<80xf32>
    %190 = vector.multi_reduction <maximumf>, %189, %cst_84 [1] : vector<80x80xf32> to vector<80xf32>
    %191 = vector.shape_cast %190 : vector<80xf32> to vector<80x1xf32>
    %192 = vector.broadcast %191 : vector<80x1xf32> to vector<80x80xf32>
    %193 = arith.subf %189, %192 : vector<80x80xf32>
    %194 = math.exp %193 : vector<80x80xf32>
    %cst_85 = arith.constant dense<0.000000e+00> : vector<80xf32>
    %195 = vector.multi_reduction <add>, %194, %cst_85 [1] : vector<80x80xf32> to vector<80xf32>
    %196 = vector.shape_cast %195 : vector<80xf32> to vector<80x1xf32>
    %197 = tpu.reciprocal %196 {approx = true} : vector<80x1xf32> -> vector<80x1xf32>
    %198 = vector.broadcast %197 : vector<80x1xf32> to vector<80x80xf32>
    %199 = arith.mulf %194, %198 : vector<80x80xf32>
    %cst_86 = arith.constant dense<0.000000e+00> : vector<80x8xf32>
    %200 = tpu.matmul %199, %188, %cst_86 {dimension_numbers = #tpu.dot_dimension_numbers<[1], [0], [0], [1], [0, 0, 1, 1], [], []>} : vector<80x80xf32>, vector<80x8xf32>, vector<80x8xf32> -> vector<80x8xf32>
    %201 = vector.extract_strided_slice %181 {offsets = [0, 0, 0], sizes = [1, 8, 32], strides = [1, 1, 1]} : vector<4x8x32xf32> to vector<1x8x32xf32>
    %202 = vector.shape_cast %201 : vector<1x8x32xf32> to vector<8x32xf32>
    %cst_87 = arith.constant dense<0.000000e+00> : vector<80x32xf32>
    %203 = tpu.matmul %200, %202, %cst_87 {dimension_numbers = #tpu.dot_dimension_numbers<[1], [0], [0], [1], [0, 0, 1, 1], [], []>} : vector<80x8xf32>, vector<8x32xf32>, vector<80x32xf32> -> vector<80x32xf32>
    %204 = arith.addf %185, %203 : vector<80x32xf32>
    %205 = vector.extract_strided_slice %179 {offsets = [0, 8], sizes = [80, 8], strides = [1, 1]} : vector<80x96xf32> to vector<80x8xf32>
    %206 = vector.extract_strided_slice %179 {offsets = [0, 40], sizes = [80, 8], strides = [1, 1]} : vector<80x96xf32> to vector<80x8xf32>
    %207 = vector.extract_strided_slice %179 {offsets = [0, 72], sizes = [80, 8], strides = [1, 1]} : vector<80x96xf32> to vector<80x8xf32>
    %cst_88 = arith.constant dense<0.000000e+00> : vector<80x80xf32>
    %208 = tpu.matmul %205, %206, %cst_88 {dimension_numbers = #tpu.dot_dimension_numbers<[1], [1], [0], [0], [0, 0, 1, 0], [], []>} : vector<80x8xf32>, vector<80x8xf32>, vector<80x80xf32> -> vector<80x80xf32>
    %cst_89 = arith.constant dense<0xFF800000> : vector<80xf32>
    %209 = vector.multi_reduction <maximumf>, %208, %cst_89 [1] : vector<80x80xf32> to vector<80xf32>
    %210 = vector.shape_cast %209 : vector<80xf32> to vector<80x1xf32>
    %211 = vector.broadcast %210 : vector<80x1xf32> to vector<80x80xf32>
    %212 = arith.subf %208, %211 : vector<80x80xf32>
    %213 = math.exp %212 : vector<80x80xf32>
    %cst_90 = arith.constant dense<0.000000e+00> : vector<80xf32>
    %214 = vector.multi_reduction <add>, %213, %cst_90 [1] : vector<80x80xf32> to vector<80xf32>
    %215 = vector.shape_cast %214 : vector<80xf32> to vector<80x1xf32>
    %216 = tpu.reciprocal %215 {approx = true} : vector<80x1xf32> -> vector<80x1xf32>
    %217 = vector.broadcast %216 : vector<80x1xf32> to vector<80x80xf32>
    %218 = arith.mulf %213, %217 : vector<80x80xf32>
    %cst_91 = arith.constant dense<0.000000e+00> : vector<80x8xf32>
    %219 = tpu.matmul %218, %207, %cst_91 {dimension_numbers = #tpu.dot_dimension_numbers<[1], [0], [0], [1], [0, 0, 1, 1], [], []>} : vector<80x80xf32>, vector<80x8xf32>, vector<80x8xf32> -> vector<80x8xf32>
    %220 = vector.extract_strided_slice %181 {offsets = [1, 0, 0], sizes = [1, 8, 32], strides = [1, 1, 1]} : vector<4x8x32xf32> to vector<1x8x32xf32>
    %221 = vector.shape_cast %220 : vector<1x8x32xf32> to vector<8x32xf32>
    %cst_92 = arith.constant dense<0.000000e+00> : vector<80x32xf32>
    %222 = tpu.matmul %219, %221, %cst_92 {dimension_numbers = #tpu.dot_dimension_numbers<[1], [0], [0], [1], [0, 0, 1, 1], [], []>} : vector<80x8xf32>, vector<8x32xf32>, vector<80x32xf32> -> vector<80x32xf32>
    %223 = arith.addf %204, %222 : vector<80x32xf32>
    %224 = vector.extract_strided_slice %179 {offsets = [0, 16], sizes = [80, 8], strides = [1, 1]} : vector<80x96xf32> to vector<80x8xf32>
    %225 = vector.extract_strided_slice %179 {offsets = [0, 48], sizes = [80, 8], strides = [1, 1]} : vector<80x96xf32> to vector<80x8xf32>
    %226 = vector.extract_strided_slice %179 {offsets = [0, 80], sizes = [80, 8], strides = [1, 1]} : vector<80x96xf32> to vector<80x8xf32>
    %cst_93 = arith.constant dense<0.000000e+00> : vector<80x80xf32>
    %227 = tpu.matmul %224, %225, %cst_93 {dimension_numbers = #tpu.dot_dimension_numbers<[1], [1], [0], [0], [0, 0, 1, 0], [], []>} : vector<80x8xf32>, vector<80x8xf32>, vector<80x80xf32> -> vector<80x80xf32>
    %cst_94 = arith.constant dense<0xFF800000> : vector<80xf32>
    %228 = vector.multi_reduction <maximumf>, %227, %cst_94 [1] : vector<80x80xf32> to vector<80xf32>
    %229 = vector.shape_cast %228 : vector<80xf32> to vector<80x1xf32>
    %230 = vector.broadcast %229 : vector<80x1xf32> to vector<80x80xf32>
    %231 = arith.subf %227, %230 : vector<80x80xf32>
    %232 = math.exp %231 : vector<80x80xf32>
    %cst_95 = arith.constant dense<0.000000e+00> : vector<80xf32>
    %233 = vector.multi_reduction <add>, %232, %cst_95 [1] : vector<80x80xf32> to vector<80xf32>
    %234 = vector.shape_cast %233 : vector<80xf32> to vector<80x1xf32>
    %235 = tpu.reciprocal %234 {approx = true} : vector<80x1xf32> -> vector<80x1xf32>
    %236 = vector.broadcast %235 : vector<80x1xf32> to vector<80x80xf32>
    %237 = arith.mulf %232, %236 : vector<80x80xf32>
    %cst_96 = arith.constant dense<0.000000e+00> : vector<80x8xf32>
    %238 = tpu.matmul %237, %226, %cst_96 {dimension_numbers = #tpu.dot_dimension_numbers<[1], [0], [0], [1], [0, 0, 1, 1], [], []>} : vector<80x80xf32>, vector<80x8xf32>, vector<80x8xf32> -> vector<80x8xf32>
    %239 = vector.extract_strided_slice %181 {offsets = [2, 0, 0], sizes = [1, 8, 32], strides = [1, 1, 1]} : vector<4x8x32xf32> to vector<1x8x32xf32>
    %240 = vector.shape_cast %239 : vector<1x8x32xf32> to vector<8x32xf32>
    %cst_97 = arith.constant dense<0.000000e+00> : vector<80x32xf32>
    %241 = tpu.matmul %238, %240, %cst_97 {dimension_numbers = #tpu.dot_dimension_numbers<[1], [0], [0], [1], [0, 0, 1, 1], [], []>} : vector<80x8xf32>, vector<8x32xf32>, vector<80x32xf32> -> vector<80x32xf32>
    %242 = arith.addf %223, %241 : vector<80x32xf32>
    %243 = vector.extract_strided_slice %179 {offsets = [0, 24], sizes = [80, 8], strides = [1, 1]} : vector<80x96xf32> to vector<80x8xf32>
    %244 = vector.extract_strided_slice %179 {offsets = [0, 56], sizes = [80, 8], strides = [1, 1]} : vector<80x96xf32> to vector<80x8xf32>
    %245 = vector.extract_strided_slice %179 {offsets = [0, 88], sizes = [80, 8], strides = [1, 1]} : vector<80x96xf32> to vector<80x8xf32>
    %cst_98 = arith.constant dense<0.000000e+00> : vector<80x80xf32>
    %246 = tpu.matmul %243, %244, %cst_98 {dimension_numbers = #tpu.dot_dimension_numbers<[1], [1], [0], [0], [0, 0, 1, 0], [], []>} : vector<80x8xf32>, vector<80x8xf32>, vector<80x80xf32> -> vector<80x80xf32>
    %cst_99 = arith.constant dense<0xFF800000> : vector<80xf32>
    %247 = vector.multi_reduction <maximumf>, %246, %cst_99 [1] : vector<80x80xf32> to vector<80xf32>
    %248 = vector.shape_cast %247 : vector<80xf32> to vector<80x1xf32>
    %249 = vector.broadcast %248 : vector<80x1xf32> to vector<80x80xf32>
    %250 = arith.subf %246, %249 : vector<80x80xf32>
    %251 = math.exp %250 : vector<80x80xf32>
    %cst_100 = arith.constant dense<0.000000e+00> : vector<80xf32>
    %252 = vector.multi_reduction <add>, %251, %cst_100 [1] : vector<80x80xf32> to vector<80xf32>
    %253 = vector.shape_cast %252 : vector<80xf32> to vector<80x1xf32>
    %254 = tpu.reciprocal %253 {approx = true} : vector<80x1xf32> -> vector<80x1xf32>
    %255 = vector.broadcast %254 : vector<80x1xf32> to vector<80x80xf32>
    %256 = arith.mulf %251, %255 : vector<80x80xf32>
    %cst_101 = arith.constant dense<0.000000e+00> : vector<80x8xf32>
    %257 = tpu.matmul %256, %245, %cst_101 {dimension_numbers = #tpu.dot_dimension_numbers<[1], [0], [0], [1], [0, 0, 1, 1], [], []>} : vector<80x80xf32>, vector<80x8xf32>, vector<80x8xf32> -> vector<80x8xf32>
    %258 = vector.extract_strided_slice %181 {offsets = [3, 0, 0], sizes = [1, 8, 32], strides = [1, 1, 1]} : vector<4x8x32xf32> to vector<1x8x32xf32>
    %259 = vector.shape_cast %258 : vector<1x8x32xf32> to vector<8x32xf32>
    %cst_102 = arith.constant dense<0.000000e+00> : vector<80x32xf32>
    %260 = tpu.matmul %257, %259, %cst_102 {dimension_numbers = #tpu.dot_dimension_numbers<[1], [0], [0], [1], [0, 0, 1, 1], [], []>} : vector<80x8xf32>, vector<8x32xf32>, vector<80x32xf32> -> vector<80x32xf32>
    %261 = arith.addf %242, %260 : vector<80x32xf32>
    %cst_103 = arith.constant dense<0.000000e+00> : vector<80xf32>
    %262 = vector.multi_reduction <add>, %261, %cst_103 [1] : vector<80x32xf32> to vector<80xf32>
    %263 = vector.shape_cast %262 : vector<80xf32> to vector<80x1xf32>
    %cst_104 = arith.constant 3.200000e+01 : f32
    %264 = vector.broadcast %cst_104 : f32 to vector<80x1xf32>
    %265 = arith.divf %263, %264 : vector<80x1xf32>
    %266 = vector.broadcast %265 : vector<80x1xf32> to vector<80x32xf32>
    %267 = arith.subf %261, %266 : vector<80x32xf32>
    %268 = vector.broadcast %265 : vector<80x1xf32> to vector<80x32xf32>
    %269 = arith.subf %261, %268 : vector<80x32xf32>
    %270 = arith.mulf %267, %269 : vector<80x32xf32>
    %cst_105 = arith.constant dense<0.000000e+00> : vector<80xf32>
    %271 = vector.multi_reduction <add>, %270, %cst_105 [1] : vector<80x32xf32> to vector<80xf32>
    %272 = vector.shape_cast %271 : vector<80xf32> to vector<80x1xf32>
    %cst_106 = arith.constant 3.200000e+01 : f32
    %273 = vector.broadcast %cst_106 : f32 to vector<80x1xf32>
    %274 = arith.divf %272, %273 : vector<80x1xf32>
    %275 = vector.broadcast %265 : vector<80x1xf32> to vector<80x32xf32>
    %276 = arith.subf %261, %275 : vector<80x32xf32>
    %cst_107 = arith.constant 9.99999974E-6 : f32
    %277 = vector.broadcast %cst_107 : f32 to vector<80x1xf32>
    %278 = arith.addf %274, %277 : vector<80x1xf32>
    %279 = math.rsqrt %278 : vector<80x1xf32>
    %280 = vector.broadcast %279 : vector<80x1xf32> to vector<80x32xf32>
    %281 = arith.mulf %276, %280 : vector<80x32xf32>
    %c1_108 = arith.constant 1 : index
    %c0_109 = arith.constant 0 : index
    %c0_110 = arith.constant 0 : index
    %282 = vector.load %arg8[%c1_108, %c0_109, %c0_110] : memref<2x32x128xf32, #tpu.memory_space<vmem>>, vector<1x32x128xf32>
    %283 = vector.shape_cast %282 : vector<1x32x128xf32> to vector<32x128xf32>
    %cst_111 = arith.constant dense<0.000000e+00> : vector<80x128xf32>
    %284 = tpu.matmul %281, %283, %cst_111 {dimension_numbers = #tpu.dot_dimension_numbers<[1], [0], [0], [1], [0, 0, 1, 1], [], []>} : vector<80x32xf32>, vector<32x128xf32>, vector<80x128xf32> -> vector<80x128xf32>
    %c1_112 = arith.constant 1 : index
    %c0_113 = arith.constant 0 : index
    %c0_114 = arith.constant 0 : index
    %285 = vector.load %arg9[%c1_112, %c0_113, %c0_114] : memref<2x1x128xf32, #tpu.memory_space<vmem>>, vector<1x1x128xf32>
    %286 = vector.shape_cast %285 : vector<1x1x128xf32> to vector<1x128xf32>
    %287 = vector.broadcast %286 : vector<1x128xf32> to vector<80x128xf32>
    %288 = arith.addf %284, %287 : vector<80x128xf32>
    %cst_115 = arith.constant 0.000000e+00 : f32
    %289 = vector.broadcast %cst_115 : f32 to vector<80x128xf32>
    %290 = arith.maximumf %288, %289 : vector<80x128xf32>
    %c1_116 = arith.constant 1 : index
    %c0_117 = arith.constant 0 : index
    %c0_118 = arith.constant 0 : index
    %291 = vector.load %arg10[%c1_116, %c0_117, %c0_118] : memref<2x128x32xf32, #tpu.memory_space<vmem>>, vector<1x128x32xf32>
    %292 = vector.shape_cast %291 : vector<1x128x32xf32> to vector<128x32xf32>
    %cst_119 = arith.constant dense<0.000000e+00> : vector<80x32xf32>
    %293 = tpu.matmul %290, %292, %cst_119 {dimension_numbers = #tpu.dot_dimension_numbers<[1], [0], [0], [1], [0, 0, 1, 1], [], []>} : vector<80x128xf32>, vector<128x32xf32>, vector<80x32xf32> -> vector<80x32xf32>
    %294 = arith.addf %261, %293 : vector<80x32xf32>
    %c1_120 = arith.constant 1 : index
    %c0_121 = arith.constant 0 : index
    %c0_122 = arith.constant 0 : index
    %295 = vector.load %arg11[%c1_120, %c0_121, %c0_122] : memref<2x1x32xf32, #tpu.memory_space<vmem>>, vector<1x1x32xf32>
    %296 = vector.shape_cast %295 : vector<1x1x32xf32> to vector<1x32xf32>
    %297 = vector.broadcast %296 : vector<1x32xf32> to vector<80x32xf32>
    %298 = arith.addf %294, %297 : vector<80x32xf32>
    %cst_123 = arith.constant dense<0.000000e+00> : vector<80xf32>
    %299 = vector.multi_reduction <add>, %298, %cst_123 [1] : vector<80x32xf32> to vector<80xf32>
    %300 = vector.shape_cast %299 : vector<80xf32> to vector<80x1xf32>
    %cst_124 = arith.constant 3.200000e+01 : f32
    %301 = vector.broadcast %cst_124 : f32 to vector<80x1xf32>
    %302 = arith.divf %300, %301 : vector<80x1xf32>
    %303 = vector.broadcast %302 : vector<80x1xf32> to vector<80x32xf32>
    %304 = arith.subf %298, %303 : vector<80x32xf32>
    %305 = vector.broadcast %302 : vector<80x1xf32> to vector<80x32xf32>
    %306 = arith.subf %298, %305 : vector<80x32xf32>
    %307 = arith.mulf %304, %306 : vector<80x32xf32>
    %cst_125 = arith.constant dense<0.000000e+00> : vector<80xf32>
    %308 = vector.multi_reduction <add>, %307, %cst_125 [1] : vector<80x32xf32> to vector<80xf32>
    %309 = vector.shape_cast %308 : vector<80xf32> to vector<80x1xf32>
    %cst_126 = arith.constant 3.200000e+01 : f32
    %310 = vector.broadcast %cst_126 : f32 to vector<80x1xf32>
    %311 = arith.divf %309, %310 : vector<80x1xf32>
    %312 = vector.broadcast %302 : vector<80x1xf32> to vector<80x32xf32>
    %313 = arith.subf %298, %312 : vector<80x32xf32>
    %cst_127 = arith.constant 9.99999974E-6 : f32
    %314 = vector.broadcast %cst_127 : f32 to vector<80x1xf32>
    %315 = arith.addf %311, %314 : vector<80x1xf32>
    %316 = math.rsqrt %315 : vector<80x1xf32>
    %317 = vector.broadcast %316 : vector<80x1xf32> to vector<80x32xf32>
    %318 = arith.mulf %313, %317 : vector<80x32xf32>
    %c0_128 = arith.constant 0 : index
    %c0_129 = arith.constant 0 : index
    %319 = vector.load %arg12[%c0_128, %c0_129] : memref<1x32xf32, #tpu.memory_space<vmem>>, vector<1x32xf32>
    %320 = vector.broadcast %319 : vector<1x32xf32> to vector<80x32xf32>
    %321 = arith.mulf %318, %320 : vector<80x32xf32>
    %c0_130 = arith.constant 0 : index
    %c0_131 = arith.constant 0 : index
    %322 = vector.load %arg13[%c0_130, %c0_131] : memref<1x32xf32, #tpu.memory_space<vmem>>, vector<1x32xf32>
    %323 = vector.broadcast %322 : vector<1x32xf32> to vector<80x32xf32>
    %324 = arith.addf %321, %323 : vector<80x32xf32>
    %325 = vector.extract_strided_slice %324 {offsets = [0, 0], sizes = [64, 32], strides = [1, 1]} : vector<80x32xf32> to vector<64x32xf32>
    %c0_132 = arith.constant 0 : index
    %c0_133 = arith.constant 0 : index
    %c0_134 = arith.constant 0 : index
    %326 = vector.load %arg14[%c0_132, %c0_133, %c0_134] : memref<1x64x32xf32, #tpu.memory_space<vmem>>, vector<1x64x32xf32>
    %327 = vector.shape_cast %326 : vector<1x64x32xf32> to vector<64x32xf32>
    %328 = vector.shape_cast %325 : vector<64x32xf32> to vector<1x64x32xf32>
    tpu.vector_store %arg14[%c0_132, %c0_133, %c0_134], %328 {strides = array<i32>} : memref<1x64x32xf32, #tpu.memory_space<vmem>>, vector<1x64x32xf32>,
    %329 = vector.extract_strided_slice %324 {offsets = [64, 0], sizes = [16, 32], strides = [1, 1]} : vector<80x32xf32> to vector<16x32xf32>
    %c0_135 = arith.constant 0 : index
    %c0_136 = arith.constant 0 : index
    %c0_137 = arith.constant 0 : index
    %330 = vector.load %arg15[%c0_135, %c0_136, %c0_137] : memref<1x16x32xf32, #tpu.memory_space<vmem>>, vector<1x16x32xf32>
    %331 = vector.shape_cast %330 : vector<1x16x32xf32> to vector<16x32xf32>
    %332 = vector.shape_cast %329 : vector<16x32xf32> to vector<1x16x32xf32>
    tpu.vector_store %arg15[%c0_135, %c0_136, %c0_137], %332 {strides = array<i32>} : memref<1x16x32xf32, #tpu.memory_space<vmem>>, vector<1x16x32xf32>,
    return
  }
  func.func @transform_0(%arg0: i32) -> (i32, i32, i32) {
    %c0_i32 = arith.constant 0 : i32
    %c0_i32_0 = arith.constant 0 : i32
    %c0_i32_1 = arith.constant 0 : i32
    return %arg0, %c0_i32, %c0_i32_0 : i32, i32, i32
  }
  func.func @transform_1(%arg0: i32) -> (i32, i32, i32) {
    %c0_i32 = arith.constant 0 : i32
    %c0_i32_0 = arith.constant 0 : i32
    %c0_i32_1 = arith.constant 0 : i32
    return %arg0, %c0_i32, %c0_i32_0 : i32, i32, i32
  }
  func.func @transform_2(%arg0: i32) -> (i32, i32) {
    %c0_i32 = arith.constant 0 : i32
    %c0_i32_0 = arith.constant 0 : i32
    %c0_i32_1 = arith.constant 0 : i32
    return %c0_i32, %c0_i32_0 : i32, i32
  }
  func.func @transform_3(%arg0: i32) -> (i32, i32, i32) {
    %c0_i32 = arith.constant 0 : i32
    %c0_i32_0 = arith.constant 0 : i32
    %c0_i32_1 = arith.constant 0 : i32
    %c0_i32_2 = arith.constant 0 : i32
    return %c0_i32, %c0_i32_0, %c0_i32_1 : i32, i32, i32
  }
  func.func @transform_4(%arg0: i32) -> (i32, i32, i32) {
    %c0_i32 = arith.constant 0 : i32
    %c0_i32_0 = arith.constant 0 : i32
    %c0_i32_1 = arith.constant 0 : i32
    %c0_i32_2 = arith.constant 0 : i32
    return %c0_i32, %c0_i32_0, %c0_i32_1 : i32, i32, i32
  }
  func.func @transform_5(%arg0: i32) -> (i32, i32, i32, i32) {
    %c0_i32 = arith.constant 0 : i32
    %c0_i32_0 = arith.constant 0 : i32
    %c0_i32_1 = arith.constant 0 : i32
    %c0_i32_2 = arith.constant 0 : i32
    %c0_i32_3 = arith.constant 0 : i32
    return %c0_i32, %c0_i32_0, %c0_i32_1, %c0_i32_2 : i32, i32, i32, i32
  }
  func.func @transform_6(%arg0: i32) -> (i32, i32, i32) {
    %c0_i32 = arith.constant 0 : i32
    %c0_i32_0 = arith.constant 0 : i32
    %c0_i32_1 = arith.constant 0 : i32
    %c0_i32_2 = arith.constant 0 : i32
    return %c0_i32, %c0_i32_0, %c0_i32_1 : i32, i32, i32
  }
  func.func @transform_7(%arg0: i32) -> (i32, i32, i32) {
    %c0_i32 = arith.constant 0 : i32
    %c0_i32_0 = arith.constant 0 : i32
    %c0_i32_1 = arith.constant 0 : i32
    %c0_i32_2 = arith.constant 0 : i32
    return %c0_i32, %c0_i32_0, %c0_i32_1 : i32, i32, i32
  }
  func.func @transform_8(%arg0: i32) -> (i32, i32, i32) {
    %c0_i32 = arith.constant 0 : i32
    %c0_i32_0 = arith.constant 0 : i32
    %c0_i32_1 = arith.constant 0 : i32
    %c0_i32_2 = arith.constant 0 : i32
    return %c0_i32, %c0_i32_0, %c0_i32_1 : i32, i32, i32
  }
  func.func @transform_9(%arg0: i32) -> (i32, i32, i32) {
    %c0_i32 = arith.constant 0 : i32
    %c0_i32_0 = arith.constant 0 : i32
    %c0_i32_1 = arith.constant 0 : i32
    %c0_i32_2 = arith.constant 0 : i32
    return %c0_i32, %c0_i32_0, %c0_i32_1 : i32, i32, i32
  }
  func.func @transform_10(%arg0: i32) -> (i32, i32, i32) {
    %c0_i32 = arith.constant 0 : i32
    %c0_i32_0 = arith.constant 0 : i32
    %c0_i32_1 = arith.constant 0 : i32
    %c0_i32_2 = arith.constant 0 : i32
    return %c0_i32, %c0_i32_0, %c0_i32_1 : i32, i32, i32
  }
  func.func @transform_11(%arg0: i32) -> (i32, i32) {
    %c0_i32 = arith.constant 0 : i32
    %c0_i32_0 = arith.constant 0 : i32
    %c0_i32_1 = arith.constant 0 : i32
    return %c0_i32, %c0_i32_0 : i32, i32
  }
  func.func @transform_12(%arg0: i32) -> (i32, i32) {
    %c0_i32 = arith.constant 0 : i32
    %c0_i32_0 = arith.constant 0 : i32
    %c0_i32_1 = arith.constant 0 : i32
    return %c0_i32, %c0_i32_0 : i32, i32
  }
  func.func @transform_13(%arg0: i32) -> (i32, i32, i32) {
    %c0_i32 = arith.constant 0 : i32
    %c0_i32_0 = arith.constant 0 : i32
    %c0_i32_1 = arith.constant 0 : i32
    return %arg0, %c0_i32, %c0_i32_0 : i32, i32, i32
  }
  func.func @transform_14(%arg0: i32) -> (i32, i32, i32) {
    %c0_i32 = arith.constant 0 : i32
    %c0_i32_0 = arith.constant 0 : i32
    %c0_i32_1 = arith.constant 0 : i32
    return %arg0, %c0_i32, %c0_i32_0 : i32, i32, i32
  }
}

</mosaic_0001>

<bundles_post_ra>
// kernel: gpt_forward.1
= control target key start
LH: loop header
LB: loop body
LE: loop exit
PB: predicated region body
PF: predicated region fallthrough
CT: control target
= control target key end

     0   :  { %s10727_s29 = smov 0   ;;  %s13158_s0 = inlined_call_operand.vmem [shape: f32[2,64,32], index: 0, kind: input, shape index: {}]   ;;  %s13159_s1 = inlined_call_operand.vmem [shape: f32[2,16,32], index: 1, kind: input, shape index: {}]   ;;  %s13160_s2 = inlined_call_operand.vmem [shape: f32[80,32], index: 2, kind: input, shape index: {}]   ;;  %s13161_s3 = inlined_call_operand.vmem [shape: f32[2,32,96], index: 3, kind: input, shape index: {}]   ;;  %s13162_s4 = inlined_call_operand.vmem [shape: f32[2,1,96], index: 4, kind: input, shape index: {}]   ;;  %s13163_s5 = inlined_call_operand.vmem [shape: f32[2,4,8,32], index: 5, kind: input, shape index: {}]   ;;  %s13164_s6 = inlined_call_operand.vmem [shape: f32[2,1,32], index: 6, kind: input, shape index: {}]   ;;  %s13165_s7 = inlined_call_operand.vmem [shape: f32[2,32,128], index: 7, kind: input, shape index: {}]   ;;  %s13166_s8 = inlined_call_operand.vmem [shape: f32[2,1,128], index: 8, kind: input, shape index: {}]   ;;  %s13167_s9 = inlined_call_operand.vmem [shape: f32[2,128,32], index: 9, kind: input, shape index: {}]   ;;  %s13168_s10 = inlined_call_operand.vmem [shape: f32[2,1,32], index: 10, kind: input, shape index: {}]   ;;  %s13169_s11 = inlined_call_operand.vmem [shape: f32[1,32], index: 11, kind: input, shape index: {}]   ;;  %s13170_s12 = inlined_call_operand.vmem [shape: f32[1,32], index: 12, kind: input, shape index: {}]   ;;  %s13171_s13 = inlined_call_operand.vmem [shape: f32[2,64,32], index: 13, kind: output, shape index: {0}]   ;;  %s13172_s14 = inlined_call_operand.vmem [shape: f32[2,16,32], index: 14, kind: output, shape index: {1}]  }
   0x1 LB: > { %s7399_s30 = sadd.s32 4294967295, %s10639_s29   ;;  %p7403_p0 = scmp.ge.s32.totalorder %s10639_s29, 1  ;;  %s10639_s29 = sphi %s10727_s29, %s25_s29  }
   0x2   : > { %p425_p1 = scmp.lt.s32.totalorder %s10639_s29, 3 }
   0x4   : > { %p426_p2 = pnand %p7403_p0, %p425_p1 }
   0x6   : > { %429 = sbr.rel (%p426_p2) target bundleno = 6894 (0x1aee), region = 72 }
   0xd   : > { %p481_p3 = scmp.lt.s32.totalorder %s7399_s30, 1  ;;  %v511_v0 = vld [vmem:[%s13160_s2] sm:$0xff]  ;;  %v513_v1 = vld [vmem:[%s13160_s2 + $0x10] sm:$0xff]  ;;  %v512_v2 = vld [vmem:[%s13160_s2 + $0x8] sm:$0xff]  ;;  %vm531_vm0 = vcmask 261120   ;;  %vm870_vm1 = vcmask 64512  }
   0xe   : > { %v514_v3 = vld [vmem:[%s13160_s2 + $0x18] sm:$0xff]  ;;  %v515_v11 = vld [vmem:[%s13160_s2 + $0x20] sm:$0xff]  ;;  %v516_v15 = vld [vmem:[%s13160_s2 + $0x28] sm:$0xff]  ;;  %s10641_s28 = smov 96   ;;  %s10642_s16 = smov 88   ;;  %vm1026_vm3 = vcmask 654336  }
   0xf   : > { %s13225_s30 = smov (!%p481_p3, %s7399_s30), 1  ;;  %v517_v22 = vld [vmem:[%s13160_s2 + $0x30] sm:$0xff]  ;;  %v518_v25 = vld [vmem:[%s13160_s2 + $0x38] sm:$0xff]  ;;  %v519_v30 = vld [vmem:[%s13160_s2 + $0x40] sm:$0xff]  ;;  %s10643_s17 = smov 120  }
  0x10   : > { %s13178_s15 = sshll.u32 %s13225_s30, 6  ;;  %s13177_s18 = sshll.u32 %s13225_s30, 4  ;;  %v520_v33 = vld [vmem:[%s13160_s2 + $0x48] sm:$0xff]  ;;  %vm10998_vm2 = vmpackc.low %vm870_vm1, %vm870_vm1 }
  0x11   : > { %s485_s24 = scalar_lea.vmem %s13158_s0, %s13178_s15  ;;  %s490_s26 = scalar_lea.vmem %s13159_s1, %s13177_s18 }
  0x12   : > { %v501_v4 = vld [vmem:[%s485_s24] sm:$0xff]  ;;  %v503_v5 = vld [vmem:[%s485_s24 + $0x10] sm:$0xff]  ;;  %v502_v6 = vld [vmem:[%s485_s24 + $0x8] sm:$0xff]  ;;  %s10644_s19 = smov 64   ;;  %s13191_s20 = smov 80  }
  0x13   : > { %v10755_v7 = vadd.f32 %v511_v0, %v501_v4  ;;  %v10757_v8 = vadd.f32 %v513_v1, %v503_v5  ;;  %v10759_v9 = vadd.f32 %v512_v2, %v502_v6  ;;  %v504_v10 = vld [vmem:[%s485_s24 + $0x18] sm:$0xff]  ;;  %v505_v13 = vld [vmem:[%s485_s24 + $0x20] sm:$0xff]  ;;  %v506_v14 = vld [vmem:[%s485_s24 + $0x28] sm:$0xff]  ;;  %s13189_s21 = smov 112   ;;  %s13187_s22 = smov 56  }
  0x14   : > { %v10764_v12 = vadd.f32 %v514_v3, %v504_v10  ;;  %v10778_v20 = vadd.f32 %v515_v11, %v505_v13  ;;  %v10780_v21 = vadd.f32 %v516_v15, %v506_v14  ;;  %v507_v23 = vld [vmem:[%s485_s24 + $0x30] sm:$0xff]  ;;  %v508_v24 = vld [vmem:[%s485_s24 + $0x38] sm:$0xff]  ;;  %v509_v31 = vld [vmem:[%s490_s26] sm:$0xff]  ;;  %s13183_s24 = smov 104   ;;  %s13181_s27 = smov 48  }
  0x15   : > { %v532_v16 = vsel %vm531_vm0, %v10755_v7, 0.0  ;;  %v538_v17 = vsel %vm531_vm0, %v10757_v8, 0.0  ;;  %v535_v18 = vsel %vm531_vm0, %v10759_v9, 0.0  ;;  %v10797_v28 = vadd.f32 %v517_v22, %v507_v23  ;;  %v510_v32 = vld [vmem:[%s490_s26 + $0x8] sm:$0xff]  ;;  %s13185_s26 = smov 72   ;;  %s13179_s23 = smov 40  }
  0x16   : > { %533 = vadd.xlane.f32.xlu0 %v532_v16  ;;  %539 = vadd.xlane.f32.xlu1 %v538_v17  ;;  %v541_v19 = vsel %vm531_vm0, %v10764_v12, 0.0  ;;  %v544_v26 = vsel %vm531_vm0, %v10778_v20, 0.0  ;;  %v547_v27 = vsel %vm531_vm0, %v10780_v21, 0.0  ;;  %v10799_v29 = vadd.f32 %v518_v25, %v508_v24  ;;  %s13215_s18 = smov 104   ;;  %s13216_s25 = smov 48  }
  0x17   : > { %13197 = vst [vmem:[#allocation2_spill] sm:$0xff] %v10797_v28  ;;  %v550_v34 = vsel %vm531_vm0, %v10797_v28, 0.0  ;;  %v10811_v36 = vadd.f32 %v519_v30, %v509_v31  ;;  %v10813_v37 = vadd.f32 %v520_v33, %v510_v32 }
  0x18   : > { %13198 = vst [vmem:[#allocation3_spill] sm:$0xff] %v10799_v29  ;;  %v553_v35 = vsel %vm531_vm0, %v10799_v29, 0.0 }
  0x19   : > { %13199 = vst [vmem:[#allocation4_spill] sm:$0xff] %v10811_v36  ;;  %13200 = vst [vmem:[#allocation5_spill] sm:$0xff] %v10813_v37  ;;  %v556_v38 = vsel %vm531_vm0, %v10811_v36, 0.0  ;;  %v559_v39 = vsel %vm531_vm0, %v10813_v37, 0.0 }
  0x1a   : > { %536 = vadd.xlane.f32.xlu0 %v535_v18  ;;  %542 = vadd.xlane.f32.xlu1 %v541_v19 }
  0x1e   : > { %545 = vadd.xlane.f32.xlu0 %v544_v26  ;;  %548 = vadd.xlane.f32.xlu1 %v547_v27 }
  0x22   : > { %551 = vadd.xlane.f32.xlu0 %v550_v34  ;;  %554 = vadd.xlane.f32.xlu1 %v553_v35  ;;  %v663_v34 = vld [vmem:[%s13161_s3] sm:$0xff]  ;;  %v664_v35 = vld [vmem:[%s13161_s3 + $0x8] sm:$0xff] }
  0x26   : > { %557 = vadd.xlane.f32.xlu0 %v556_v38  ;;  %560 = vadd.xlane.f32.xlu1 %v559_v39  ;;  %v9218_v38 = vpack.c.bf16 %v664_v35, %v663_v34  ;;  %v665_v39 = vld [vmem:[%s13161_s3 + $0x10] sm:$0xff] }
  0x28   : > { %9219 = vmatprep.subr.bf16.mxu0 %v9218_v38 }
  0x29   : > { %9221 = vmatpush3.bf16.msra.mxu0 %v9218_v38 }
  0xa3   : > { %v534_v40 = vpop.xlane.xlu0 %533  ;;  %v540_v41 = vpop.xlane.xlu1 %539 }
  0xa4   : > { %v563_v42 = vmul.f32 0.03125, %v534_v40  ;;  %v565_v43 = vmul.f32 0.03125, %v540_v41  ;;  %v666_v40 = vld [vmem:[%s13161_s3 + $0x18] sm:$0xff] }
  0xa5   : > { %v9222_v41 = vpack.c.bf16 %v666_v40, %v665_v39 }
  0xa6   : > { %v10820_v44 = vsub.f32 %v10755_v7, %v563_v42  ;;  %v10823_v45 = vsub.f32 %v10757_v8, %v565_v43 }
  0xa7   : > { %v537_v46 = vpop.xlane.xlu0 %536  ;;  %v543_v47 = vpop.xlane.xlu1 %542  ;;  %9223 = vmatprep.subr.bf16.mxu0 %v9222_v41 }
  0xa8   : > { %v564_v48 = vmul.f32 0.03125, %v537_v46  ;;  %v566_v49 = vmul.f32 0.03125, %v543_v47  ;;  %v583_v50 = vmul.f32 %v10820_v44, %v10820_v44  ;;  %v585_v51 = vmul.f32 %v10823_v45, %v10823_v45  ;;  %9225 = vmatpush3.bf16.msra.mxu0 %v9222_v41 }
  0xaa   : > { %v10830_v52 = vsub.f32 %v10759_v9, %v564_v48  ;;  %v10833_v53 = vsub.f32 %v10764_v12, %v566_v49  ;;  %v593_v54 = vsel %vm531_vm0, %v583_v50, 0.0  ;;  %v599_v57 = vsel %vm531_vm0, %v585_v51, 0.0 }
  0xab   : > { %594 = vadd.xlane.f32.xlu0 %v593_v54  ;;  %v546_v55 = vpop.xlane.xlu0 %545  ;;  %v549_v56 = vpop.xlane.xlu1 %548 }
  0xac   : > { %v567_v58 = vmul.f32 0.03125, %v546_v55  ;;  %v568_v59 = vmul.f32 0.03125, %v549_v56  ;;  %v584_v60 = vmul.f32 %v10830_v52, %v10830_v52  ;;  %v586_v61 = vmul.f32 %v10833_v53, %v10833_v53 }
  0xae   : > { %v10842_v62 = vsub.f32 %v10778_v20, %v567_v58  ;;  %v10845_v63 = vsub.f32 %v10780_v21, %v568_v59  ;;  %v596_v0 = vsel %vm531_vm0, %v584_v60, 0.0  ;;  %v602_v3 = vsel %vm531_vm0, %v586_v61, 0.0 }
  0xaf   : > { %600 = vadd.xlane.f32.xlu0 %v599_v57  ;;  %597 = vadd.xlane.f32.xlu1 %v596_v0  ;;  %v552_v1 = vpop.xlane.xlu0 %551  ;;  %v555_v2 = vpop.xlane.xlu1 %554 }
  0xb0   : > { %v569_v4 = vmul.f32 0.03125, %v552_v1  ;;  %v570_v5 = vmul.f32 0.03125, %v555_v2  ;;  %v587_v6 = vmul.f32 %v10842_v62, %v10842_v62  ;;  %v588_v10 = vmul.f32 %v10845_v63, %v10845_v63 }
  0xb2   : > { %v10854_v11 = vsub.f32 %v10797_v28, %v569_v4  ;;  %v10857_v13 = vsub.f32 %v10799_v29, %v570_v5  ;;  %v605_v14 = vsel %vm531_vm0, %v587_v6, 0.0  ;;  %v608_v17 = vsel %vm531_vm0, %v588_v10, 0.0 }
  0xb3   : > { %603 = vadd.xlane.f32.xlu1 %v602_v3  ;;  %606 = vadd.xlane.f32.xlu0 %v605_v14  ;;  %v558_v15 = vpop.xlane.xlu0 %557  ;;  %v561_v16 = vpop.xlane.xlu1 %560 }
  0xb4   : > { %v571_v18 = vmul.f32 0.03125, %v558_v15  ;;  %v572_v19 = vmul.f32 0.03125, %v561_v16  ;;  %v589_v22 = vmul.f32 %v10854_v11, %v10854_v11  ;;  %v590_v23 = vmul.f32 %v10857_v13, %v10857_v13 }
  0xb6   : > { %v10866_v24 = vsub.f32 %v10811_v36, %v571_v18  ;;  %v10869_v25 = vsub.f32 %v10813_v37, %v572_v19  ;;  %v611_v26 = vsel %vm531_vm0, %v589_v22, 0.0  ;;  %v614_v27 = vsel %vm531_vm0, %v590_v23, 0.0 }
  0xb7   : > { %609 = vadd.xlane.f32.xlu1 %v608_v17  ;;  %612 = vadd.xlane.f32.xlu0 %v611_v26 }
  0xb8   : > { %v591_v30 = vmul.f32 %v10866_v24, %v10866_v24  ;;  %v592_v31 = vmul.f32 %v10869_v25, %v10869_v25 }
  0xba   : > { %v617_v32 = vsel %vm531_vm0, %v591_v30, 0.0  ;;  %v620_v33 = vsel %vm531_vm0, %v592_v31, 0.0 }
  0xbb   : > { %615 = vadd.xlane.f32.xlu1 %v614_v27  ;;  %618 = vadd.xlane.f32.xlu0 %v617_v32 }
  0xbf   : > { %621 = vadd.xlane.f32.xlu1 %v620_v33 }
 0x138   : > { %v595_v42 = vpop.xlane.xlu0 %594 }
 0x139   : > { %v623_v43 = vmul.f32 0.03125, %v595_v42 }
 0x13b   : > { %v633_v46 = vadd.f32 1e-05, %v623_v43 }
 0x13c   : > { %v598_v47 = vpop.xlane.xlu1 %597  ;;  %v601_v48 = vpop.xlane.xlu0 %600 }
 0x13d   : > { %10213 = vrsqrt.f32 %v633_v46  ;;  %v624_v49 = vmul.f32 0.03125, %v598_v47  ;;  %v625_v50 = vmul.f32 0.03125, %v601_v48 }
 0x13f   : > { %v634_v51 = vadd.f32 1e-05, %v624_v49  ;;  %v635_v54 = vadd.f32 1e-05, %v625_v50 }
 0x140   : > { %v604_v55 = vpop.xlane.xlu1 %603  ;;  %v607_v56 = vpop.xlane.xlu0 %606 }
 0x141   : > { %10215 = vrsqrt.f32 %v634_v51  ;;  %v626_v57 = vmul.f32 0.03125, %v604_v55  ;;  %v627_v58 = vmul.f32 0.03125, %v607_v56 }
 0x142   : > { %10217 = vrsqrt.f32 %v635_v54 }
 0x143   : > { %v636_v59 = vadd.f32 1e-05, %v626_v57  ;;  %v637_v60 = vadd.f32 1e-05, %v627_v58 }
 0x144   : > { %v610_v61 = vpop.xlane.xlu1 %609  ;;  %v613_v0 = vpop.xlane.xlu0 %612 }
 0x145   : > { %10219 = vrsqrt.f32 %v636_v59  ;;  %v628_v1 = vmul.f32 0.03125, %v610_v61  ;;  %v629_v2 = vmul.f32 0.03125, %v613_v0 }
 0x146   : > { %10221 = vrsqrt.f32 %v637_v60 }
 0x147   : > { %v10214_v3 = vpop.eup %10213  ;;  %v638_v4 = vadd.f32 1e-05, %v628_v1  ;;  %v639_v5 = vadd.f32 1e-05, %v629_v2 }
 0x148   : > { %v616_v6 = vpop.xlane.xlu1 %615  ;;  %v619_v10 = vpop.xlane.xlu0 %618  ;;  %v653_v14 = vmul.f32 %v10214_v3, %v10820_v44 }
 0x149   : > { %10223 = vrsqrt.f32 %v638_v4  ;;  %v630_v15 = vmul.f32 0.03125, %v616_v6  ;;  %v631_v16 = vmul.f32 0.03125, %v619_v10 }
 0x14a   : > { %10225 = vrsqrt.f32 %v639_v5  ;;  %8344 = vmatprep.mubr.msk.f32.mxu0 %vm531_vm0, %v653_v14 }
 0x14b   : > { %v10216_v17 = vpop.eup %10215  ;;  %v640_v18 = vadd.f32 1e-05, %v630_v15  ;;  %v641_v19 = vadd.f32 1e-05, %v631_v16 }
 0x14c   : > { %v10218_v22 = vpop.eup %10217  ;;  %v622_v23 = vpop.xlane.xlu1 %621  ;;  %v654_v26 = vmul.f32 %v10216_v17, %v10830_v52 }
 0x14d   : > { %10227 = vrsqrt.f32 %v640_v18  ;;  %v632_v27 = vmul.f32 0.03125, %v622_v23  ;;  %v655_v30 = vmul.f32 %v10218_v22, %v10823_v45 }
 0x14e   : > { %10229 = vrsqrt.f32 %v641_v19  ;;  %8345 = vmatmul.mubr.msk.f32.vlgmr.msra.gmra.mrb[0].mxu0 %vm531_vm0, %v654_v26 }
 0x14f   : > { %v10220_v44 = vpop.eup %10219  ;;  %v642_v31 = vadd.f32 1e-05, %v632_v27  ;;  %8347 = vmatprep.mubr.msk.f32.mxu0 %vm531_vm0, %v655_v30 }
 0x150   : > { %v10222_v32 = vpop.eup %10221  ;;  %v656_v33 = vmul.f32 %v10220_v44, %v10833_v53 }
 0x151   : > { %10231 = vrsqrt.f32 %v642_v31  ;;  %v657_v34 = vmul.f32 %v10222_v32, %v10842_v62 }
 0x152   : > { %8348 = vmatmul.mubr.msk.f32.gmra.mrb[2].mxu0 %vm531_vm0, %v656_v33 }
 0x153   : > { %v10224_v52 = vpop.eup %10223  ;;  %8350 = vmatprep.mubr.msk.f32.mxu0 %vm531_vm0, %v657_v34 }
 0x154   : > { %v10226_v35 = vpop.eup %10225  ;;  %v658_v45 = vmul.f32 %v10224_v52, %v10845_v63  ;;  %v7412_v63 = vld [vmem:[%s13162_s4] ss:$0 sm:$0xff] }
 0x155   : > { %v659_v38 = vmul.f32 %v10226_v35, %v10854_v11 }
 0x156   : > { %8351 = vmatmul.mubr.msk.f32.gmra.mrb[4].mxu0 %vm531_vm0, %v658_v45 }
 0x157   : > { %v10228_v39 = vpop.eup %10227  ;;  %8353 = vmatprep.mubr.msk.f32.mxu0 %vm531_vm0, %v659_v38 }
 0x158   : > { %v10230_v40 = vpop.eup %10229  ;;  %v660_v53 = vmul.f32 %v10228_v39, %v10857_v13 }
 0x159   : > { %v661_v62 = vmul.f32 %v10230_v40, %v10866_v24 }
 0x15a   : > { %8354 = vmatmul.mubr.msk.f32.gmra.mrb[6].mxu0 %vm531_vm0, %v660_v53 }
 0x15b   : > { %v10232_v41 = vpop.eup %10231  ;;  %8356 = vmatprep.mubr.msk.f32.mxu0 %vm531_vm0, %v661_v62 }
 0x15c   : > { %v662_v42 = vmul.f32 %v10232_v41, %v10869_v25 }
 0x15e   : > { %8357 = vmatmul.mubr.msk.f32.gmra.mrb[8].mxu0 %vm531_vm0, %v662_v42 }
 0x221   : > { %v8346_v11 = vpop.f32.mrb[0].mxu0 }
 0x222   : > { %v10914_v43 = vadd.f32 %v8346_v11, %v7412_v63  ;;  %v770_v46 = vpop.f32.mrb[1].mxu0 }
 0x223   : > { %v10916_v13 = vadd.f32 %v7412_v63, %v770_v46 }
 0x225   : > { %v8349_v24 = vpop.f32.mrb[2].mxu0  ;;  %8379 = vmatprep.mubr.msk.f32.mxu1 %vm870_vm1, %v10916_v13  ;;  %v10922_v25 = vpack.i.bf16 %v10914_v43, %v10916_v13 }
 0x226   : > { %v10924_v47 = vadd.f32 %v8349_v24, %v7412_v63  ;;  %v780_v48 = vpop.f32.mrb[3].mxu0 }
 0x227   : > { %v10926_v49 = vadd.f32 %v7412_v63, %v780_v48  ;;  %9814 = vrot.lane.b32.xlu0 %v10922_v25, %s10641_s28 }
 0x229   : > { %v8352_v50 = vpop.f32.mrb[4].mxu0  ;;  %v10932_v51 = vpack.i.bf16 %v10924_v47, %v10926_v49 }
 0x22a   : > { %v10934_v54 = vadd.f32 %v8352_v50, %v7412_v63  ;;  %v790_v55 = vpop.f32.mrb[5].mxu0 }
 0x22b   : > { %v10936_v56 = vadd.f32 %v7412_v63, %v790_v55  ;;  %9819 = vrot.lane.b32.xlu1 %v10932_v51, %s10641_s28 }
 0x22d   : > { %v8355_v57 = vpop.f32.mrb[6].mxu0  ;;  %v10942_v58 = vpack.i.bf16 %v10934_v54, %v10936_v56 }
 0x22e   : > { %v10944_v59 = vadd.f32 %v8355_v57, %v7412_v63  ;;  %v800_v60 = vpop.f32.mrb[7].mxu0 }
 0x22f   : > { %v10946_v61 = vadd.f32 %v7412_v63, %v800_v60  ;;  %9824 = vrot.lane.b32.xlu1 %v10942_v58, %s10641_s28 }
 0x231   : > { %v8358_v0 = vpop.f32.mrb[8].mxu0  ;;  %v10952_v1 = vpack.i.bf16 %v10944_v59, %v10946_v61 }
 0x232   : > { %v10954_v2 = vadd.f32 %v8358_v0, %v7412_v63  ;;  %v810_v3 = vpop.f32.mrb[9].mxu0 }
 0x233   : > { %v10956_v4 = vadd.f32 %v7412_v63, %v810_v3  ;;  %9829 = vrot.lane.b32.xlu1 %v10952_v1, %s10641_s28 }
 0x235   : > { %v10962_v5 = vpack.i.bf16 %v10954_v2, %v10956_v4 }
 0x237   : > { %9839 = vrot.lane.b32.xlu1 %v10922_v25, %s10642_s16  ;;  %9834 = vrot.lane.b32.xlu0 %v10962_v5, %s10641_s28 }
 0x23b   : > { %9849 = vrot.lane.b32.xlu1 %v10942_v58, %s10642_s16  ;;  %9844 = vrot.lane.b32.xlu0 %v10932_v51, %s10642_s16 }
 0x23f   : > { %1469 = vrot.lane.b32.xlu1 %v10914_v43, %s10643_s17  ;;  %9854 = vrot.lane.b32.xlu0 %v10952_v1, %s10642_s16 }
 0x243   : > { %1473 = vrot.lane.b32.xlu1 %v10924_v47, %s10643_s17  ;;  %1467 = vrot.lane.b32.xlu0 %v10916_v13, %s10643_s17 }
 0x247   : > { %9859 = vrot.lane.b32.xlu1 %v10962_v5, %s10642_s16  ;;  %1471 = vrot.lane.b32.xlu0 %v10926_v49, %s10643_s17 }
 0x24b   : > { %1477 = vrot.lane.b32.xlu1 %v10934_v54, %s10643_s17  ;;  %1475 = vrot.lane.b32.xlu0 %v10936_v56, %s10643_s17 }
 0x24f   : > { %1481 = vrot.lane.b32.xlu1 %v10944_v59, %s10643_s17  ;;  %1479 = vrot.lane.b32.xlu0 %v10946_v61, %s10643_s17 }
 0x253   : > { %1485 = vrot.lane.b32.xlu1 %v10954_v2, %s10643_s17  ;;  %1483 = vrot.lane.b32.xlu0 %v10956_v4, %s10643_s17 }
 0x299   : > { %v9815_v6 = vpop.permute.xlu0 %9814 }
 0x29a   : > { %v9817_v10 = vunpack.i.h.bf16 %v9815_v6  ;;  %v9816_v14 = vunpack.i.l.bf16 %v9815_v6 }
 0x29c   : > { %v9226_v16 = vpack.c.bf16 %v9817_v10, %v9816_v14 }
 0x29d   : > { %v9820_v17 = vpop.permute.xlu1 %9819 }
 0x29e   : > { %v9822_v18 = vunpack.i.h.bf16 %v9820_v17  ;;  %v9821_v19 = vunpack.i.l.bf16 %v9820_v17  ;;  %9228 = vmatprep.subr.msk.bf16.mxu1 %vm10998_vm2, %v9226_v16 }
 0x29f   : > { %9231 = vmatpush3.bf16.xpose.msk.msra.mxu1 %vm10998_vm2, %v9226_v16 }
 0x2a0   : > { %v9232_v22 = vpack.c.bf16 %v9822_v18, %v9821_v19 }
 0x2a1   : > { %v9825_v23 = vpop.permute.xlu1 %9824 }
 0x2a2   : > { %v9827_v26 = vunpack.i.h.bf16 %v9825_v23  ;;  %v9826_v27 = vunpack.i.l.bf16 %v9825_v23  ;;  %9234 = vmatprep.subr.msk.bf16.mxu1 %vm10998_vm2, %v9232_v22 }
 0x2a4   : > { %v9238_v30 = vpack.c.bf16 %v9827_v26, %v9826_v27 }
 0x2a5   : > { %v9830_v44 = vpop.permute.xlu1 %9829 }
 0x2a6   : > { %v9832_v31 = vunpack.i.h.bf16 %v9830_v44  ;;  %v9831_v32 = vunpack.i.l.bf16 %v9830_v44 }
 0x2a7   : > { %9237 = vmatpush3.bf16.xpose.msk.msra.mxu1 %vm10998_vm2, %v9232_v22 }
 0x2a8   : > { %9240 = vmatprep.subr.msk.bf16.mxu1 %vm10998_vm2, %v9238_v30  ;;  %v9244_v33 = vpack.c.bf16 %v9832_v31, %v9831_v32 }
 0x2a9   : > { %v9835_v34 = vpop.permute.xlu0 %9834  ;;  %v9840_v38 = vpop.permute.xlu1 %9839 }
 0x2aa   : > { %v9837_v52 = vunpack.i.h.bf16 %v9835_v34  ;;  %v9836_v35 = vunpack.i.l.bf16 %v9835_v34  ;;  %v9842_v39 = vunpack.i.h.bf16 %v9840_v38  ;;  %v9841_v40 = vunpack.i.l.bf16 %v9840_v38 }
 0x2ac   : > { %v9250_v45 = vpack.c.bf16 %v9837_v52, %v9836_v35  ;;  %v9276_v53 = vpack.c.bf16 %v9842_v39, %v9841_v40 }
 0x2ad   : > { %v9845_v62 = vpop.permute.xlu0 %9844  ;;  %v9850_v63 = vpop.permute.xlu1 %9849 }
 0x2ae   : > { %v9847_v41 = vunpack.i.h.bf16 %v9845_v62  ;;  %v9846_v42 = vunpack.i.l.bf16 %v9845_v62  ;;  %v9852_v46 = vunpack.i.h.bf16 %v9850_v63  ;;  %v9851_v24 = vunpack.i.l.bf16 %v9850_v63 }
 0x2af   : > { %9243 = vmatpush3.bf16.xpose.msk.msra.mxu1 %vm10998_vm2, %v9238_v30 }
 0x2b0   : > { %9246 = vmatprep.subr.msk.bf16.mxu1 %vm10998_vm2, %v9244_v33  ;;  %v9282_v11 = vpack.c.bf16 %v9847_v41, %v9846_v42  ;;  %v9288_v50 = vpack.c.bf16 %v9852_v46, %v9851_v24 }
 0x2b1   : > { %v1470_v48 = vpop.permute.xlu1 %1469  ;;  %v9855_v55 = vpop.permute.xlu0 %9854 }
 0x2b2   : > { %v9857_v60 = vunpack.i.h.bf16 %v9855_v55  ;;  %v9856_v0 = vunpack.i.l.bf16 %v9855_v55 }
 0x2b4   : > { %v9294_v3 = vpack.c.bf16 %v9857_v60, %v9856_v0 }
 0x2b5   : > { %v1474_v57 = vpop.permute.xlu1 %1473  ;;  %v1468_v6 = vpop.permute.xlu0 %1467 }
 0x2b7   : > { %9249 = vmatpush3.bf16.xpose.msk.msra.mxu1 %vm10998_vm2, %v9244_v33 }
 0x2b8   : > { %9252 = vmatprep.subr.msk.bf16.mxu1 %vm10998_vm2, %v9250_v45 }
 0x2b9   : > { %v9860_v10 = vpop.permute.xlu1 %9859  ;;  %v1472_v18 = vpop.permute.xlu0 %1471 }
 0x2ba   : > { %v9862_v14 = vunpack.i.h.bf16 %v9860_v10  ;;  %v9861_v16 = vunpack.i.l.bf16 %v9860_v10 }
 0x2bc   : > { %v9300_v17 = vpack.c.bf16 %v9862_v14, %v9861_v16 }
 0x2bd   : > { %v1476_v19 = vpop.permute.xlu0 %1475  ;;  %v1478_v22 = vpop.permute.xlu1 %1477 }
 0x2bf   : > { %9255 = vmatpush3.bf16.xpose.msk.msra.mxu1 %vm10998_vm2, %v9250_v45 }
 0x2c0   : > { %9278 = vmatprep.subr.msk.bf16.mxu1 %vm10998_vm2, %v9276_v53 }
 0x2c1   : > { %v1480_v23 = vpop.permute.xlu0 %1479  ;;  %v1482_v26 = vpop.permute.xlu1 %1481 }
 0x2c5   : > { %v1484_v27 = vpop.permute.xlu0 %1483  ;;  %v1486_v30 = vpop.permute.xlu1 %1485 }
 0x2c6   : > { %8380 = vmatmul.mubr.msk.f32.vlgmr.msra.gmra.mrb[0].mxu1 %vm870_vm1, %v10914_v43 }
 0x2c7   : > { %8382 = vmatprep.mubr.msk.f32.mxu1 %vm870_vm1, %v10926_v49  ;;  %9281 = vmatpush3.bf16.xpose.msk.msra.mxu1 %vm10998_vm2, %v9276_v53 }
 0x2c8   : > { %9284 = vmatprep.subr.msk.bf16.mxu1 %vm10998_vm2, %v9282_v11 }
 0x2ca   : > { %8383 = vmatmul.mubr.msk.f32.gmra.mrb[2].mxu1 %vm870_vm1, %v10924_v47 }
 0x2cb   : > { %8385 = vmatprep.mubr.msk.f32.mxu1 %vm870_vm1, %v10936_v56 }
 0x2ce   : > { %8386 = vmatmul.mubr.msk.f32.gmra.mrb[4].mxu1 %vm870_vm1, %v10934_v54 }
 0x2cf   : > { %8388 = vmatprep.mubr.msk.f32.mxu1 %vm870_vm1, %v10946_v61  ;;  %9287 = vmatpush3.bf16.xpose.msk.msra.mxu1 %vm10998_vm2, %v9282_v11 }
 0x2d0   : > { %9290 = vmatprep.subr.msk.bf16.mxu1 %vm10998_vm2, %v9288_v50 }
 0x2d2   : > { %8389 = vmatmul.mubr.msk.f32.gmra.mrb[6].mxu1 %vm870_vm1, %v10944_v59 }
 0x2d3   : > { %8391 = vmatprep.mubr.msk.f32.mxu1 %vm870_vm1, %v10956_v4 }
 0x2d6   : > { %8392 = vmatmul.mubr.msk.f32.gmra.mrb[8].mxu1 %vm870_vm1, %v10954_v2 }
 0x2d7   : > { %9293 = vmatpush3.bf16.xpose.msk.msra.mxu1 %vm10998_vm2, %v9288_v50  ;;  %8466 = vmatprep.mubr.msk.f32.mxu1 %vm870_vm1, %v1468_v6 }
 0x2d8   : > { %9296 = vmatprep.subr.msk.bf16.mxu1 %vm10998_vm2, %v9294_v3 }
 0x2df   : > { %9299 = vmatpush3.bf16.xpose.msk.msra.mxu1 %vm10998_vm2, %v9294_v3 }
 0x2e0   : > { %9302 = vmatprep.subr.msk.bf16.mxu1 %vm10998_vm2, %v9300_v17 }
 0x2e7   : > { %9305 = vmatpush3.bf16.xpose.msk.msra.mxu1 %vm10998_vm2, %v9300_v17 }
 0x2ee   : > { %8467 = vmatmul.mubr.msk.f32.vlgmr.msra.gmra.mrb[10].mxu1 %vm870_vm1, %v1470_v48 }
 0x2ef   : > { %8469 = vmatprep.mubr.msk.f32.mxu1 %vm870_vm1, %v1472_v18 }
 0x2f2   : > { %8470 = vmatmul.mubr.msk.f32.gmra.mrb[12].mxu1 %vm870_vm1, %v1474_v57 }
 0x2f3   : > { %8472 = vmatprep.mubr.msk.f32.mxu1 %vm870_vm1, %v1476_v19 }
 0x2f6   : > { %8473 = vmatmul.mubr.msk.f32.gmra.mrb[14].mxu1 %vm870_vm1, %v1478_v22 }
 0x2f7   : > { %8475 = vmatprep.mubr.msk.f32.mxu1 %vm870_vm1, %v1480_v23 }
 0x2fa   : > { %8476 = vmatmul.mubr.msk.f32.gmra.mrb[16].mxu1 %vm870_vm1, %v1482_v26 }
 0x2fb   : > { %8478 = vmatprep.mubr.msk.f32.mxu1 %vm870_vm1, %v1484_v27 }
 0x2fe   : > { %8479 = vmatmul.mubr.msk.f32.gmra.mrb[18].mxu1 %vm870_vm1, %v1486_v30 }
 0x399   : > { %v8381_v44 = vpop.f32.mrb[0].mxu1 }
 0x39a   : > { %v977_v31 = vpop.f32.mrb[1].mxu1  ;;  %v1030_v32 = vsel %vm1026_vm3, %v8381_v44, -inf }
 0x39b   : > { %1031 = vmax.xlane.f32.xlu1 %v1030_v32  ;;  %v1027_v33 = vsel %vm1026_vm3, %v977_v31, -inf }
 0x39c   : > { %1028 = vmax.xlane.f32.xlu0 %v1027_v33 }
 0x39d   : > { %v8384_v34 = vpop.f32.mrb[2].mxu1 }
 0x39e   : > { %v987_v52 = vpop.f32.mrb[3].mxu1  ;;  %v1036_v35 = vsel %vm1026_vm3, %v8384_v34, -inf }
 0x39f   : > { %v1033_v40 = vsel %vm1026_vm3, %v987_v52, -inf }
 0x3a0   : > { %1037 = vmax.xlane.f32.xlu0 %v1036_v35 }
 0x3a1   : > { %v8387_v45 = vpop.f32.mrb[4].mxu1 }
 0x3a2   : > { %v997_v38 = vpop.f32.mrb[5].mxu1  ;;  %v1042_v39 = vsel %vm1026_vm3, %v8387_v45, -inf }
 0x3a3   : > { %1043 = vmax.xlane.f32.xlu1 %v1042_v39  ;;  %v1039_v42 = vsel %vm1026_vm3, %v997_v38, -inf }
 0x3a4   : > { %1034 = vmax.xlane.f32.xlu0 %v1033_v40 }
 0x3a5   : > { %v8390_v53 = vpop.f32.mrb[6].mxu1 }
 0x3a6   : > { %v11075_v62 = vpop.f32.mrb[7].mxu1  ;;  %v1048_v41 = vsel %vm1026_vm3, %v8390_v53, -inf }
 0x3a7   : > { %1049 = vmax.xlane.f32.xlu1 %v1048_v41  ;;  %v1045_v24 = vsel %vm1026_vm3, %v11075_v62, -inf }
 0x3a8   : > { %1040 = vmax.xlane.f32.xlu0 %v1039_v42 }
 0x3a9   : > { %v8393_v63 = vpop.f32.mrb[8].mxu1 }
 0x3aa   : > { %v11079_v11 = vpop.f32.mrb[9].mxu1  ;;  %v1054_v46 = vsel %vm1026_vm3, %v8393_v63, -inf }
 0x3ab   : > { %1055 = vmax.xlane.f32.xlu1 %v1054_v46  ;;  %v1051_v48 = vsel %vm1026_vm3, %v11079_v11, -inf }
 0x3ac   : > { %1046 = vmax.xlane.f32.xlu0 %v1045_v24 }
 0x3b0   : > { %1052 = vmax.xlane.f32.xlu0 %v1051_v48 }
 0x3bc   : > { %9869 = vrot.lane.b32.xlu1 %v10932_v51, %s10644_s19 }
 0x3c1   : > { %v11088_v50 = vpop.f32.mrb[10].mxu1 }
 0x3c2   : > { %v11090_v55 = vpop.f32.mrb[11].mxu1 }
 0x3c5   : > { %v11092_v57 = vpop.f32.mrb[12].mxu1 }
 0x3c6   : > { %v11094_v60 = vpop.f32.mrb[13].mxu1  ;;  %9864 = vrot.lane.b32.xlu0 %v10922_v25, %s10644_s19 }
 0x3c9   : > { %v11098_v0 = vpop.f32.mrb[14].mxu1 }
 0x3ca   : > { %v11100_v3 = vpop.f32.mrb[15].mxu1  ;;  %9874 = vrot.lane.b32.xlu0 %v10942_v58, %s10644_s19 }
 0x3cd   : > { %v11104_v6 = vpop.f32.mrb[16].mxu1 }
 0x3ce   : > { %v11106_v10 = vpop.f32.mrb[17].mxu1 }
 0x3d1   : > { %v11108_v14 = vpop.f32.mrb[18].mxu1 }
 0x3d2   : > { %v11110_v16 = vpop.f32.mrb[19].mxu1 }
 0x428   : > { %v1032_v17 = vpop.xlane.xlu1 %1031 }
 0x429   : > { %v1058_v18 = vsub.f32 %v8381_v44, %v1032_v17  ;;  %v1029_v19 = vpop.xlane.xlu0 %1028 }
 0x42a   : > { %v1057_v22 = vsub.f32 %v977_v31, %v1029_v19 }
 0x42b   : > { %v1069_v23 = vmul.f32 1.442695, %v1058_v18 }
 0x42c   : > { %v1067_v26 = vmul.f32 1.442695, %v1057_v22 }
 0x42d   : > { %10233 = vpow2.f32 %v1069_v23  ;;  %v1038_v27 = vpop.xlane.xlu0 %1037 }
 0x42e   : > { %10235 = vpow2.f32 %v1067_v26  ;;  %v1060_v30 = vsub.f32 %v8384_v34, %v1038_v27 }
 0x430   : > { %v1073_v32 = vmul.f32 1.442695, %v1060_v30  ;;  %v1044_v33 = vpop.xlane.xlu1 %1043 }
 0x431   : > { %v1062_v35 = vsub.f32 %v8387_v45, %v1044_v33  ;;  %v1035_v39 = vpop.xlane.xlu0 %1034 }
 0x432   : > { %10237 = vpow2.f32 %v1073_v32  ;;  %v1059_v40 = vsub.f32 %v987_v52, %v1035_v39 }
 0x433   : > { %v1077_v41 = vmul.f32 1.442695, %v1062_v35 }
 0x434   : > { %v1071_v42 = vmul.f32 1.442695, %v1059_v40  ;;  %v1050_v46 = vpop.xlane.xlu1 %1049 }
 0x435   : > { %10239 = vpow2.f32 %v1077_v41  ;;  %v1064_v24 = vsub.f32 %v8390_v53, %v1050_v46  ;;  %v1041_v44 = vpop.xlane.xlu0 %1040 }
 0x436   : > { %10241 = vpow2.f32 %v1071_v42  ;;  %v1061_v31 = vsub.f32 %v997_v38, %v1041_v44 }
 0x437   : > { %v11112_v48 = vpop.eup %10233  ;;  %v1081_v18 = vmul.f32 1.442695, %v1064_v24 }
 0x438   : > { %v11114_v17 = vpop.eup %10235  ;;  %v1075_v34 = vmul.f32 1.442695, %v1061_v31  ;;  %v1056_v19 = vpop.xlane.xlu1 %1055  ;;  %v1090_v45 = vsel %vm1026_vm3, %v11112_v48, 0.0 }
 0x439   : > { %v1066_v22 = vsub.f32 %v8393_v63, %v1056_v19  ;;  %v1047_v52 = vpop.xlane.xlu0 %1046  ;;  %1091 = vadd.xlane.f32.xlu1 %v1090_v45  ;;  %v1087_v23 = vsel %vm1026_vm3, %v11114_v17, 0.0 }
 0x43a   : > { %10243 = vpow2.f32 %v1075_v34  ;;  %v1063_v53 = vsub.f32 %v11075_v62, %v1047_v52  ;;  %1088 = vadd.xlane.f32.xlu0 %v1087_v23 }
 0x43b   : > { %10245 = vpow2.f32 %v1081_v18  ;;  %v1085_v26 = vmul.f32 1.442695, %v1066_v22 }
 0x43c   : > { %v11121_v38 = vpop.eup %10237  ;;  %v1079_v27 = vmul.f32 1.442695, %v1063_v53  ;;  %v9870_v35 = vpop.permute.xlu1 %9869 }
 0x43d   : > { %v1053_v30 = vpop.xlane.xlu0 %1052  ;;  %v1096_v32 = vsel %vm1026_vm3, %v11121_v38, 0.0  ;;  %v9872_v46 = vunpack.i.h.bf16 %v9870_v35  ;;  %v9871_v24 = vunpack.i.l.bf16 %v9870_v35 }
 0x43e   : > { %10247 = vpow2.f32 %v1079_v27  ;;  %v1065_v63 = vsub.f32 %v11079_v11, %v1053_v30  ;;  %1097 = vadd.xlane.f32.xlu1 %v1096_v32 }
 0x43f   : > { %v11126_v33 = vpop.eup %10239  ;;  %10249 = vpow2.f32 %v1085_v26  ;;  %v9260_v23 = vpack.c.bf16 %v9872_v46, %v9871_v24  ;;  %v1671_v46 = vsel %vm1026_vm3, %v11092_v57, -inf  ;;  %v1677_v24 = vsel %vm1026_vm3, %v11098_v0, -inf }
 0x440   : > { %v11128_v39 = vpop.eup %10241  ;;  %v1083_v62 = vmul.f32 1.442695, %v1065_v63  ;;  %v1102_v40 = vsel %vm1026_vm3, %v11126_v33, 0.0 }
 0x441   : > { %v9865_v41 = vpop.permute.xlu0 %9864  ;;  %v1093_v42 = vsel %vm1026_vm3, %v11128_v39, 0.0 }
 0x442   : > { %v9867_v44 = vunpack.i.h.bf16 %v9865_v41  ;;  %v9866_v31 = vunpack.i.l.bf16 %v9865_v41  ;;  %1103 = vadd.xlane.f32.xlu1 %v1102_v40  ;;  %1094 = vadd.xlane.f32.xlu0 %v1093_v42  ;;  %10251 = vpow2.f32 %v1083_v62  ;;  %v1662_v40 = vsel %vm1026_vm3, %v11090_v55, -inf }
 0x443   : > { %v1668_v41 = vsel %vm1026_vm3, %v11094_v60, -inf  ;;  %v1665_v42 = vsel %vm1026_vm3, %v11088_v50, -inf }
 0x444   : > { %v11134_v11 = vpop.eup %10243  ;;  %v9256_v18 = vpack.c.bf16 %v9867_v44, %v9866_v31  ;;  %v1674_v44 = vsel %vm1026_vm3, %v11100_v3, -inf  ;;  %v1683_v31 = vsel %vm1026_vm3, %v11104_v6, -inf }
 0x445   : > { %v9875_v34 = vpop.permute.xlu0 %9874  ;;  %v1099_v19 = vsel %vm1026_vm3, %v11134_v11, 0.0  ;;  %v11138_v45 = vpop.eup %10245 }
 0x446   : > { %v9877_v22 = vunpack.i.h.bf16 %v9875_v34  ;;  %v9876_v52 = vunpack.i.l.bf16 %v9875_v34  ;;  %1100 = vadd.xlane.f32.xlu1 %v1099_v19  ;;  %9257 = vmatprep.subr.bf16.mxu0 %v9256_v18  ;;  %v1108_v26 = vsel %vm1026_vm3, %v11138_v45, 0.0  ;;  %v1689_v34 = vsel %vm1026_vm3, %v11108_v14, -inf }
 0x447   : > { %9259 = vmatpush3.bf16.msra.mxu0 %v9256_v18  ;;  %v1680_v18 = vsel %vm1026_vm3, %v11106_v10, -inf  ;;  %v1686_v19 = vsel %vm1026_vm3, %v11110_v16, -inf }
 0x448   : > { %v11140_v53 = vpop.eup %10247  ;;  %9261 = vmatprep.subr.bf16.mxu0 %v9260_v23  ;;  %v9264_v32 = vpack.c.bf16 %v9877_v22, %v9876_v52 }
 0x449   : > { %v1105_v27 = vsel %vm1026_vm3, %v11140_v53, 0.0  ;;  %v11146_v30 = vpop.eup %10249 }
 0x44a   : > { %1109 = vadd.xlane.f32.xlu1 %v1108_v26  ;;  %1106 = vadd.xlane.f32.xlu0 %v1105_v27  ;;  %v1114_v63 = vsel %vm1026_vm3, %v11146_v30, 0.0 }
 0x44b   : > { %9263 = vmatpush3.bf16.msra.mxu0 %v9260_v23 }
 0x44c   : > { %9265 = vmatprep.subr.bf16.mxu0 %v9264_v32  ;;  %v11150_v35 = vpop.eup %10251 }
 0x44d   : > { %v1111_v62 = vsel %vm1026_vm3, %v11150_v35, 0.0 }
 0x44e   : > { %1115 = vadd.xlane.f32.xlu1 %v1114_v63 }
 0x44f   : > { %9267 = vmatpush3.bf16.msra.mxu0 %v9264_v32 }
 0x452   : > { %1112 = vadd.xlane.f32.xlu1 %v1111_v62 }
 0x460   : > { %9884 = vrot.lane.b32.xlu0 %v10962_v5, %s10644_s19 }
 0x463   : > { %9879 = vrot.lane.b32.xlu1 %v10952_v1, %s10644_s19 }
 0x464   : > { %9889 = vrot.lane.b32.xlu0 %v10922_v25, %s13191_s20 }
 0x467   : > { %9899 = vrot.lane.b32.xlu1 %v10942_v58, %s13191_s20 }
 0x468   : > { %9894 = vrot.lane.b32.xlu0 %v10932_v51, %s13191_s20 }
 0x46b   : > { %9909 = vrot.lane.b32.xlu1 %v10962_v5, %s13191_s20 }
 0x46c   : > { %9904 = vrot.lane.b32.xlu0 %v10952_v1, %s13191_s20 }
 0x46f   : > { %2104 = vrot.lane.b32.xlu1 %v10914_v43, %s13189_s21 }
 0x470   : > { %2102 = vrot.lane.b32.xlu0 %v10916_v13, %s13189_s21 }
 0x473   : > { %2108 = vrot.lane.b32.xlu1 %v10924_v47, %s13189_s21 }
 0x474   : > { %2106 = vrot.lane.b32.xlu0 %v10926_v49, %s13189_s21 }
 0x477   : > { %2112 = vrot.lane.b32.xlu1 %v10934_v54, %s13189_s21 }
 0x478   : > { %2110 = vrot.lane.b32.xlu0 %v10936_v56, %s13189_s21 }
 0x47b   : > { %2116 = vrot.lane.b32.xlu1 %v10944_v59, %s13189_s21 }
 0x47c   : > { %2114 = vrot.lane.b32.xlu0 %v10946_v61, %s13189_s21 }
 0x47f   : > { %2120 = vrot.lane.b32.xlu1 %v10954_v2, %s13189_s21 }
 0x480   : > { %2118 = vrot.lane.b32.xlu0 %v10956_v4, %s13189_s21  ;;  %s13214_s21 = smov 72  }
 0x49f   : > { %1663 = vmax.xlane.f32.xlu0 %v1662_v40 }
 0x4a3   : > { %1669 = vmax.xlane.f32.xlu0 %v1668_v41  ;;  %1666 = vmax.xlane.f32.xlu1 %v1665_v42 }
 0x4a7   : > { %1672 = vmax.xlane.f32.xlu0 %v1671_v46  ;;  %1678 = vmax.xlane.f32.xlu1 %v1677_v24 }
 0x4ab   : > { %1675 = vmax.xlane.f32.xlu0 %v1674_v44  ;;  %1684 = vmax.xlane.f32.xlu1 %v1683_v31 }
 0x4af   : > { %1681 = vmax.xlane.f32.xlu0 %v1680_v18  ;;  %1690 = vmax.xlane.f32.xlu1 %v1689_v34 }
 0x4b3   : > { %1687 = vmax.xlane.f32.xlu0 %v1686_v19 }
 0x4c0   : > { %9919 = vrot.lane.b32.xlu1 %v10932_v51, %s13187_s22 }
 0x4c6   : > { %v1092_v22 = vpop.xlane.xlu1 %1091 }
 0x4c7   : > { %v1089_v52 = vpop.xlane.xlu0 %1088 }
 0x4c8   : > { %10253 = vrcp.f32 %v1089_v52 }
 0x4c9   : > { %9914 = vrot.lane.b32.xlu0 %v10922_v25, %s13187_s22  ;;  %10255 = vrcp.f32 %v1092_v22 }
 0x4cb   : > { %v1098_v23 = vpop.xlane.xlu1 %1097 }
 0x4cd   : > { %9924 = vrot.lane.b32.xlu0 %v10942_v58, %s13187_s22 }
 0x4cf   : > { %v1104_v26 = vpop.xlane.xlu1 %1103  ;;  %v1095_v32 = vpop.xlane.xlu0 %1094 }
 0x4d0   : > { %10257 = vrcp.f32 %v1095_v32 }
 0x4d1   : > { %10259 = vrcp.f32 %v1098_v23 }
 0x4d2   : > { %v10254_v27 = vpop.eup %10253 }
 0x4d3   : > { %v1101_v63 = vpop.xlane.xlu1 %1100  ;;  %v1127_v62 = vmul.f32 %v10254_v27, %v11114_v17 }
 0x4d4   : > { %10261 = vrcp.f32 %v1101_v63  ;;  %v819_v63 = vld [vmem:[%s13163_s5] sm:$0xff] }
 0x4d5   : > { %8414 = vmatprep.mubr.msk.f32.mxu0 %vm1026_vm3, %v1127_v62  ;;  %10263 = vrcp.f32 %v1104_v26 }
 0x4d7   : > { %v1110_v40 = vpop.xlane.xlu1 %1109  ;;  %v1107_v41 = vpop.xlane.xlu0 %1106 }
 0x4d8   : > { %10265 = vrcp.f32 %v1107_v41 }
 0x4d9   : > { %10267 = vrcp.f32 %v1110_v40 }
 0x4db   : > { %v1116_v42 = vpop.xlane.xlu1 %1115  ;;  %v9885_v46 = vpop.permute.xlu0 %9884 }
 0x4dc   : > { %v9887_v19 = vunpack.i.h.bf16 %v9885_v46  ;;  %v9886_v52 = vunpack.i.l.bf16 %v9885_v46 }
 0x4df   : > { %v1113_v24 = vpop.xlane.xlu1 %1112  ;;  %v9890_v44 = vpop.permute.xlu0 %9889 }
 0x4e0   : > { %v9892_v31 = vunpack.i.h.bf16 %v9890_v44  ;;  %v9891_v18 = vunpack.i.l.bf16 %v9890_v44  ;;  %10269 = vrcp.f32 %v1113_v24 }
 0x4e1   : > { %10271 = vrcp.f32 %v1116_v42 }
 0x4e2   : > { %v9326_v34 = vpack.c.bf16 %v9892_v31, %v9891_v18 }
 0x4e3   : > { %v9880_v36 = vpop.permute.xlu1 %9879  ;;  %v9895_v37 = vpop.permute.xlu0 %9894 }
 0x4e4   : > { %v9882_v28 = vunpack.i.h.bf16 %v9880_v36  ;;  %v9881_v29 = vunpack.i.l.bf16 %v9880_v36  ;;  %v9897_v17 = vunpack.i.h.bf16 %v9895_v37  ;;  %v9896_v27 = vunpack.i.l.bf16 %v9895_v37  ;;  %9328 = vmatprep.subr.msk.bf16.mxu1 %vm10998_vm2, %v9326_v34  ;;  %v10256_v37 = vpop.eup %10255 }
 0x4e5   : > { %9331 = vmatpush3.bf16.xpose.msk.msra.mxu1 %vm10998_vm2, %v9326_v34  ;;  %v9272_v36 = vpack.c.bf16 %v9887_v19, %v9886_v52  ;;  %v1128_v26 = vmul.f32 %v10256_v37, %v11112_v48 }
 0x4e6   : > { %v9332_v62 = vpack.c.bf16 %v9897_v17, %v9896_v27  ;;  %v9268_v22 = vpack.c.bf16 %v9882_v28, %v9881_v29  ;;  %v10258_v28 = vpop.eup %10257 }
 0x4e7   : > { %v9900_v32 = vpop.permute.xlu1 %9899  ;;  %v9905_v44 = vpop.permute.xlu0 %9904  ;;  %v1129_v18 = vmul.f32 %v10258_v28, %v11128_v39 }
 0x4e8   : > { %v9902_v31 = vunpack.i.h.bf16 %v9900_v32  ;;  %v9901_v46 = vunpack.i.l.bf16 %v9900_v32  ;;  %9269 = vmatprep.subr.bf16.mxu0 %v9268_v22  ;;  %9334 = vmatprep.subr.msk.bf16.mxu1 %vm10998_vm2, %v9332_v62  ;;  %v10260_v41 = vpop.eup %10259  ;;  %v9907_v19 = vunpack.i.h.bf16 %v9905_v44  ;;  %v9906_v52 = vunpack.i.l.bf16 %v9905_v44 }
 0x4e9   : > { %9271 = vmatpush3.bf16.msra.mxu0 %v9268_v22  ;;  %v10262_v34 = vpop.eup %10261  ;;  %v1130_v40 = vmul.f32 %v10260_v41, %v11121_v38 }
 0x4ea   : > { %9273 = vmatprep.subr.bf16.mxu0 %v9272_v36  ;;  %v9338_v29 = vpack.c.bf16 %v9902_v31, %v9901_v46  ;;  %v10264_v48 = vpop.eup %10263  ;;  %v1131_v24 = vmul.f32 %v10262_v34, %v11134_v11  ;;  %v9344_v27 = vpack.c.bf16 %v9907_v19, %v9906_v52 }
 0x4eb   : > { %v2103_v23 = vpop.permute.xlu0 %2102  ;;  %v10266_v17 = vpop.eup %10265  ;;  %v1132_v39 = vmul.f32 %v10264_v48, %v11126_v33 }
 0x4ec   : > { %8553 = vmatprep.mubr.msk.f32.mxu1 %vm870_vm1, %v2103_v23  ;;  %v10268_v42 = vpop.eup %10267  ;;  %v1133_v38 = vmul.f32 %v10266_v17, %v11140_v53 }
 0x4ed   : > { %9275 = vmatpush3.bf16.msra.mxu0 %v9272_v36  ;;  %9337 = vmatpush3.bf16.xpose.msk.msra.mxu1 %vm10998_vm2, %v9332_v62  ;;  %v9910_v62 = vpop.permute.xlu1 %9909  ;;  %v10270_v22 = vpop.eup %10269  ;;  %v1134_v44 = vmul.f32 %v10268_v42, %v11138_v45 }
 0x4ee   : > { %9340 = vmatprep.subr.msk.bf16.mxu1 %vm10998_vm2, %v9338_v29  ;;  %8429 = vmatprep.subr.mxu0 %v819_v63  ;;  %v9912_v11 = vunpack.i.h.bf16 %v9910_v62  ;;  %v9911_v32 = vunpack.i.l.bf16 %v9910_v62  ;;  %v10272_v31 = vpop.eup %10271  ;;  %v1135_v46 = vmul.f32 %v10270_v22, %v11150_v35 }
 0x4ef   : > { %v1136_v33 = vmul.f32 %v10272_v31, %v11146_v30  ;;  %v2107_v45 = vpop.permute.xlu0 %2106 }
 0x4f0   : > { %8415 = vmatmul.mubr.msk.f32.vlgmr.msra.gmra.mrb[10].mxu0 %vm1026_vm3, %v1128_v26  ;;  %v9350_v36 = vpack.c.bf16 %v9912_v11, %v9911_v32 }
 0x4f1   : > { %8417 = vmatprep.mubr.msk.f32.mxu0 %vm1026_vm3, %v1129_v18  ;;  %8430 = vmatpush3.msra.mxu0 %v819_v63  ;;  %v2105_v53 = vpop.permute.xlu1 %2104 }
 0x4f3   : > { %v2111_v37 = vpop.permute.xlu0 %2110 }
 0x4f4   : > { %8418 = vmatmul.mubr.msk.f32.gmra.mrb[12].mxu0 %vm1026_vm3, %v1130_v40 }
 0x4f5   : > { %8420 = vmatprep.mubr.msk.f32.mxu0 %vm1026_vm3, %v1131_v24  ;;  %9343 = vmatpush3.bf16.xpose.msk.msra.mxu1 %vm10998_vm2, %v9338_v29  ;;  %v2109_v35 = vpop.permute.xlu1 %2108 }
 0x4f6   : > { %9346 = vmatprep.subr.msk.bf16.mxu1 %vm10998_vm2, %v9344_v27 }
 0x4f7   : > { %v2115_v63 = vpop.permute.xlu0 %2114 }
 0x4f8   : > { %8421 = vmatmul.mubr.msk.f32.gmra.mrb[14].mxu0 %vm1026_vm3, %v1132_v39 }
 0x4f9   : > { %8423 = vmatprep.mubr.msk.f32.mxu0 %vm1026_vm3, %v1133_v38  ;;  %v2113_v23 = vpop.permute.xlu1 %2112 }
 0x4fb   : > { %v2119_v28 = vpop.permute.xlu0 %2118 }
 0x4fc   : > { %8424 = vmatmul.mubr.msk.f32.gmra.mrb[16].mxu0 %vm1026_vm3, %v1134_v44 }
 0x4fd   : > { %8426 = vmatprep.mubr.msk.f32.mxu0 %vm1026_vm3, %v1135_v46  ;;  %9349 = vmatpush3.bf16.xpose.msk.msra.mxu1 %vm10998_vm2, %v9344_v27  ;;  %v2117_v30 = vpop.permute.xlu1 %2116 }
 0x4fe   : > { %9352 = vmatprep.subr.msk.bf16.mxu1 %vm10998_vm2, %v9350_v36 }
 0x500   : > { %8427 = vmatmul.mubr.msk.f32.gmra.mrb[18].mxu0 %vm1026_vm3, %v1136_v33 }
 0x501   : > { %v2121_v29 = vpop.permute.xlu1 %2120 }
 0x505   : > { %9355 = vmatpush3.bf16.xpose.msk.msra.mxu1 %vm10998_vm2, %v9350_v36 }
 0x50c   : > { %8554 = vmatmul.mubr.msk.f32.vlgmr.msra.gmra.mrb[20].mxu1 %vm870_vm1, %v2105_v53 }
 0x50d   : > { %8556 = vmatprep.mubr.msk.f32.mxu1 %vm870_vm1, %v2107_v45 }
 0x510   : > { %8557 = vmatmul.mubr.msk.f32.gmra.mrb[22].mxu1 %vm870_vm1, %v2109_v35 }
 0x511   : > { %8559 = vmatprep.mubr.msk.f32.mxu1 %vm870_vm1, %v2111_v37 }
 0x514   : > { %8560 = vmatmul.mubr.msk.f32.gmra.mrb[24].mxu1 %vm870_vm1, %v2113_v23 }
 0x515   : > { %8562 = vmatprep.mubr.msk.f32.mxu1 %vm870_vm1, %v2115_v63 }
 0x518   : > { %8563 = vmatmul.mubr.msk.f32.gmra.mrb[26].mxu1 %vm870_vm1, %v2117_v30 }
 0x519   : > { %8565 = vmatprep.mubr.msk.f32.mxu1 %vm870_vm1, %v2119_v28 }
 0x51c   : > { %8566 = vmatmul.mubr.msk.f32.gmra.mrb[28].mxu1 %vm870_vm1, %v2121_v29 }
 0x52c   : > { %v1664_v26 = vpop.xlane.xlu0 %1663 }
 0x52d   : > { %v1692_v41 = vsub.f32 %v11090_v55, %v1664_v26 }
 0x52f   : > { %v1702_v18 = vmul.f32 1.442695, %v1692_v41 }
 0x530   : > { %v1667_v34 = vpop.xlane.xlu1 %1666  ;;  %v1670_v19 = vpop.xlane.xlu0 %1669 }
 0x531   : > { %10273 = vpow2.f32 %v1702_v18  ;;  %v1693_v52 = vsub.f32 %v11088_v50, %v1667_v34  ;;  %v1694_v40 = vsub.f32 %v11094_v60, %v1670_v19 }
 0x533   : > { %v1704_v48 = vmul.f32 1.442695, %v1693_v52  ;;  %v1706_v24 = vmul.f32 1.442695, %v1694_v40 }
 0x534   : > { %v1679_v17 = vpop.xlane.xlu1 %1678  ;;  %v1673_v27 = vpop.xlane.xlu0 %1672 }
 0x535   : > { %10275 = vpow2.f32 %v1704_v48  ;;  %v1697_v62 = vsub.f32 %v11098_v0, %v1679_v17  ;;  %v1695_v39 = vsub.f32 %v11092_v57, %v1673_v27 }
 0x536   : > { %10277 = vpow2.f32 %v1706_v24 }
 0x537   : > { %v1708_v42 = vmul.f32 1.442695, %v1695_v39  ;;  %v1712_v55 = vmul.f32 1.442695, %v1697_v62 }
 0x538   : > { %v1685_v38 = vpop.xlane.xlu1 %1684  ;;  %v1676_v22 = vpop.xlane.xlu0 %1675 }
 0x539   : > { %v1696_v11 = vsub.f32 %v11100_v3, %v1676_v22  ;;  %10279 = vpow2.f32 %v1708_v42  ;;  %v1699_v60 = vsub.f32 %v11104_v6, %v1685_v38 }
 0x53a   : > { %10281 = vpow2.f32 %v1712_v55 }
 0x53b   : > { %v11273_v50 = vpop.eup %10273  ;;  %v1710_v32 = vmul.f32 1.442695, %v1696_v11  ;;  %v1716_v3 = vmul.f32 1.442695, %v1699_v60 }
 0x53c   : > { %v1682_v44 = vpop.xlane.xlu0 %1681  ;;  %v1722_v0 = vsel %vm1026_vm3, %v11273_v50, 0.0  ;;  %v1691_v31 = vpop.xlane.xlu1 %1690 }
 0x53d   : > { %v1698_v57 = vsub.f32 %v11106_v10, %v1682_v44  ;;  %1723 = vadd.xlane.f32.xlu0 %v1722_v0  ;;  %10283 = vpow2.f32 %v1710_v32  ;;  %v1701_v53 = vsub.f32 %v11108_v14, %v1691_v31 }
 0x53f   : > { %v11279_v46 = vpop.eup %10275  ;;  %v1714_v36 = vmul.f32 1.442695, %v1698_v57  ;;  %v1720_v37 = vmul.f32 1.442695, %v1701_v53 }
 0x540   : > { %v11281_v33 = vpop.eup %10277  ;;  %v1688_v45 = vpop.xlane.xlu0 %1687  ;;  %v1725_v6 = vsel %vm1026_vm3, %v11279_v46, 0.0 }
 0x541   : > { %1726 = vadd.xlane.f32.xlu1 %v1725_v6  ;;  %10285 = vpow2.f32 %v1714_v36  ;;  %v1728_v35 = vsel %vm1026_vm3, %v11281_v33, 0.0  ;;  %v1700_v23 = vsub.f32 %v11110_v16, %v1688_v45 }
 0x542   : > { %1729 = vadd.xlane.f32.xlu0 %v1728_v35  ;;  %10287 = vpow2.f32 %v1716_v3 }
 0x543   : > { %v11288_v10 = vpop.eup %10279  ;;  %10289 = vpow2.f32 %v1720_v37  ;;  %v1718_v41 = vmul.f32 1.442695, %v1700_v23 }
 0x544   : > { %v9915_v63 = vpop.permute.xlu0 %9914  ;;  %v1731_v14 = vsel %vm1026_vm3, %v11288_v10, 0.0  ;;  %v11293_v29 = vpop.eup %10281 }
 0x545   : > { %v9917_v30 = vunpack.i.h.bf16 %v9915_v63  ;;  %v9916_v28 = vunpack.i.l.bf16 %v9915_v63  ;;  %1732 = vadd.xlane.f32.xlu1 %v1731_v14  ;;  %v1737_v18 = vsel %vm1026_vm3, %v11293_v29, 0.0  ;;  %10291 = vpow2.f32 %v1718_v41 }
 0x547   : > { %v9306_v26 = vpack.c.bf16 %v9917_v30, %v9916_v28  ;;  %v11297_v34 = vpop.eup %10283 }
 0x548   : > { %v1734_v19 = vsel %vm1026_vm3, %v11297_v34, 0.0 }
 0x549   : > { %9307 = vmatprep.subr.bf16.mxu0 %v9306_v26  ;;  %1738 = vadd.xlane.f32.xlu1 %v1737_v18 }
 0x54b   : > { %v11299_v16 = vpop.eup %10285 }
 0x54c   : > { %v1740_v52 = vsel %vm1026_vm3, %v11299_v16, 0.0  ;;  %v11305_v40 = vpop.eup %10287 }
 0x54d   : > { %1735 = vadd.xlane.f32.xlu1 %v1734_v19  ;;  %1741 = vadd.xlane.f32.xlu0 %v1740_v52  ;;  %v1743_v48 = vsel %vm1026_vm3, %v11305_v40, 0.0  ;;  %v11309_v24 = vpop.eup %10289 }
 0x54e   : > { %v1749_v17 = vsel %vm1026_vm3, %v11309_v24, 0.0 }
 0x54f   : > { %v11313_v27 = vpop.eup %10291 }
 0x550   : > { %v1746_v62 = vsel %vm1026_vm3, %v11313_v27, 0.0 }
 0x551   : > { %1744 = vadd.xlane.f32.xlu1 %v1743_v48 }
 0x555   : > { %1750 = vadd.xlane.f32.xlu1 %v1749_v17 }
 0x559   : > { %1747 = vadd.xlane.f32.xlu1 %v1746_v62 }
 0x563   : > { %9934 = vrot.lane.b32.xlu0 %v10962_v5, %s13187_s22 }
 0x567   : > { %9939 = vrot.lane.b32.xlu0 %v10922_v25, %s13185_s26 }
 0x56a   : > { %9929 = vrot.lane.b32.xlu1 %v10952_v1, %s13187_s22  ;;  %s13222_s22 = sshll.u32 %s13225_s30, 6 }
 0x56b   : > { %9944 = vrot.lane.b32.xlu0 %v10932_v51, %s13185_s26 }
 0x56e   : > { %9949 = vrot.lane.b32.xlu1 %v10942_v58, %s13185_s26 }
 0x56f   : > { %9954 = vrot.lane.b32.xlu0 %v10952_v1, %s13185_s26 }
 0x572   : > { %9959 = vrot.lane.b32.xlu1 %v10962_v5, %s13185_s26  ;;  %s13217_s26 = smov 40  }
 0x573   : > { %2737 = vrot.lane.b32.xlu0 %v10916_v13, %s13183_s24 }
 0x576   : > { %2739 = vrot.lane.b32.xlu1 %v10914_v43, %s13183_s24  ;;  %v9920_v43 = vpop.permute.xlu1 %9919 }
 0x577   : > { %2741 = vrot.lane.b32.xlu0 %v10926_v49, %s13183_s24  ;;  %v9922_v13 = vunpack.i.h.bf16 %v9920_v43  ;;  %v9925_v49 = vpop.permute.xlu0 %9924 }
 0x578   : > { %v9926_v42 = vunpack.i.l.bf16 %v9925_v49 }
 0x57a   : > { %2743 = vrot.lane.b32.xlu1 %v10924_v47, %s13183_s24  ;;  %v9921_v47 = vunpack.i.l.bf16 %v9920_v43 }
 0x57b   : > { %2745 = vrot.lane.b32.xlu0 %v10936_v56, %s13183_s24 }
 0x57e   : > { %2747 = vrot.lane.b32.xlu1 %v10934_v54, %s13183_s24  ;;  %v9927_v54 = vunpack.i.h.bf16 %v9925_v49 }
 0x57f   : > { %2749 = vrot.lane.b32.xlu0 %v10946_v61, %s13183_s24  ;;  %v9310_v61 = vpack.c.bf16 %v9922_v13, %v9921_v47 }
 0x580   : > { %v9314_v55 = vpack.c.bf16 %v9927_v54, %v9926_v42 }
 0x582   : > { %2751 = vrot.lane.b32.xlu1 %v10944_v59, %s13183_s24 }
 0x583   : > { %2753 = vrot.lane.b32.xlu0 %v10956_v4, %s13183_s24 }
 0x586   : > { %2755 = vrot.lane.b32.xlu1 %v10954_v2, %s13183_s24 }
 0x5c3   : > { %v8416_v56 = vpop.f32.mrb[10].mxu0 }
 0x5c4   : > { %v1263_v39 = vpop.f32.mrb[11].mxu0 }
 0x5c5   : > { %8431 = vmatprep.mubr.msk.f32.mxu0 %vm870_vm1, %v1263_v39 }
 0x5c6   : > { %8432 = vmatmul.mubr.msk.f32.vlgmr.msra.gmra.mrb[20].mxu0 %vm870_vm1, %v8416_v56 }
 0x5c7   : > { %9309 = vmatpush3.bf16.msra.mxu0 %v9306_v26  ;;  %v8419_v59 = vpop.f32.mrb[12].mxu0 }
 0x5c8   : > { %9311 = vmatprep.subr.bf16.mxu0 %v9310_v61  ;;  %v1273_v4 = vpop.f32.mrb[13].mxu0 }
 0x5c9   : > { %8434 = vmatprep.mubr.msk.f32.mxu0 %vm870_vm1, %v1273_v4 }
 0x5ca   : > { %v1724_v2 = vpop.xlane.xlu0 %1723  ;;  %8435 = vmatmul.mubr.msk.f32.gmra.mrb[22].mxu0 %vm870_vm1, %v8419_v59 }
 0x5cb   : > { %10293 = vrcp.f32 %v1724_v2  ;;  %9313 = vmatpush3.bf16.msra.mxu0 %v9310_v61  ;;  %v8422_v38 = vpop.f32.mrb[14].mxu0 }
 0x5cc   : > { %9315 = vmatprep.subr.bf16.mxu0 %v9314_v55  ;;  %v1283_v22 = vpop.f32.mrb[15].mxu0 }
 0x5cd   : > { %8437 = vmatprep.mubr.msk.f32.mxu0 %vm870_vm1, %v1283_v22 }
 0x5ce   : > { %v1727_v11 = vpop.xlane.xlu1 %1726  ;;  %8438 = vmatmul.mubr.msk.f32.gmra.mrb[24].mxu0 %vm870_vm1, %v8422_v38 }
 0x5cf   : > { %9317 = vmatpush3.bf16.msra.mxu0 %v9314_v55  ;;  %v8425_v60 = vpop.f32.mrb[16].mxu0  ;;  %v1730_v3 = vpop.xlane.xlu0 %1729  ;;  %10295 = vrcp.f32 %v1727_v11 }
 0x5d0   : > { %v1293_v32 = vpop.f32.mrb[17].mxu0  ;;  %10297 = vrcp.f32 %v1730_v3 }
 0x5d1   : > { %8440 = vmatprep.mubr.msk.f32.mxu0 %vm870_vm1, %v1293_v32 }
 0x5d2   : > { %8441 = vmatmul.mubr.msk.f32.gmra.mrb[26].mxu0 %vm870_vm1, %v8425_v60  ;;  %v1733_v44 = vpop.xlane.xlu1 %1732 }
 0x5d3   : > { %v8428_v0 = vpop.f32.mrb[18].mxu0  ;;  %10299 = vrcp.f32 %v1733_v44 }
 0x5d4   : > { %v1303_v31 = vpop.f32.mrb[19].mxu0 }
 0x5d5   : > { %v10294_v57 = vpop.eup %10293  ;;  %8443 = vmatprep.mubr.msk.f32.mxu0 %vm870_vm1, %v1303_v31 }
 0x5d6   : > { %8444 = vmatmul.mubr.msk.f32.gmra.mrb[28].mxu0 %vm870_vm1, %v8428_v0  ;;  %v1762_v36 = vmul.f32 %v10294_v57, %v11273_v50  ;;  %v1739_v53 = vpop.xlane.xlu1 %1738 }
 0x5d8   : > { %8501 = vmatprep.mubr.msk.f32.mxu0 %vm1026_vm3, %v1762_v36 }
 0x5da   : > { %v1736_v45 = vpop.xlane.xlu1 %1735  ;;  %v1742_v6 = vpop.xlane.xlu0 %1741 }
 0x5db   : > { %10301 = vrcp.f32 %v1736_v45 }
 0x5dc   : > { %10303 = vrcp.f32 %v1739_v53 }
 0x5dd   : > { %10305 = vrcp.f32 %v1742_v6 }
 0x5de   : > { %v11363_v35 = vpop.xlane.xlu1 %1744  ;;  %v9935_v37 = vpop.permute.xlu0 %9934 }
 0x5df   : > { %v11365_v23 = vpop.f32.mrb[20].mxu1  ;;  %v9937_v59 = vunpack.i.h.bf16 %v9935_v37  ;;  %v9936_v4 = vunpack.i.l.bf16 %v9935_v37  ;;  %10307 = vrcp.f32 %v11363_v35 }
 0x5e0   : > { %v11367_v63 = vpop.f32.mrb[21].mxu1  ;;  %v2300_v30 = vsel %vm1026_vm3, %v11365_v23, -inf }
 0x5e1   : > { %2301 = vmax.xlane.f32.xlu1 %v2300_v30  ;;  %v2297_v50 = vsel %vm1026_vm3, %v11367_v63, -inf  ;;  %v9322_v44 = vpack.c.bf16 %v9937_v59, %v9936_v4 }
 0x5e2   : > { %v11373_v28 = vpop.xlane.xlu1 %1750  ;;  %v9940_v14 = vpop.permute.xlu0 %9939  ;;  %2298 = vmax.xlane.f32.xlu0 %v2297_v50 }
 0x5e3   : > { %v9942_v26 = vunpack.i.h.bf16 %v9940_v14  ;;  %v9941_v41 = vunpack.i.l.bf16 %v9940_v14  ;;  %v11375_v18 = vpop.f32.mrb[22].mxu1  ;;  %v10296_v14 = vpop.eup %10295 }
 0x5e4   : > { %v11377_v19 = vpop.f32.mrb[23].mxu1  ;;  %v2306_v54 = vsel %vm1026_vm3, %v11375_v18, -inf }
 0x5e5   : > { %v9376_v52 = vpack.c.bf16 %v9942_v26, %v9941_v41  ;;  %v2303_v48 = vsel %vm1026_vm3, %v11377_v19, -inf  ;;  %v10298_v26 = vpop.eup %10297 }
 0x5e6   : > { %v1748_v17 = vpop.xlane.xlu1 %1747  ;;  %v9945_v62 = vpop.permute.xlu0 %9944  ;;  %2304 = vmax.xlane.f32.xlu0 %v2303_v48 }
 0x5e7   : > { %v9947_v43 = vunpack.i.h.bf16 %v9945_v62  ;;  %v9946_v13 = vunpack.i.l.bf16 %v9945_v62  ;;  %v11381_v47 = vpop.f32.mrb[24].mxu1  ;;  %9378 = vmatprep.subr.msk.bf16.mxu1 %vm10998_vm2, %v9376_v52  ;;  %10309 = vrcp.f32 %v1748_v17  ;;  %v10300_v48 = vpop.eup %10299  ;;  %v1764_v62 = vmul.f32 %v10298_v26, %v11281_v33 }
 0x5e8   : > { %v11385_v49 = vpop.f32.mrb[25].mxu1  ;;  %9381 = vmatpush3.bf16.xpose.msk.msra.mxu1 %vm10998_vm2, %v9376_v52  ;;  %v2312_v56 = vsel %vm1026_vm3, %v11381_v47, -inf  ;;  %v1763_v52 = vmul.f32 %v10296_v14, %v11279_v46  ;;  %10311 = vrcp.f32 %v11373_v28  ;;  %v1765_v46 = vmul.f32 %v10300_v48, %v11288_v10 }
 0x5e9   : > { %v9382_v39 = vpack.c.bf16 %v9947_v43, %v9946_v13  ;;  %2313 = vmax.xlane.f32.xlu1 %v2312_v56  ;;  %v2309_v60 = vsel %vm1026_vm3, %v11385_v49, -inf  ;;  %v10302_v43 = vpop.eup %10301 }
 0x5ea   : > { %v9930_v42 = vpop.permute.xlu1 %9929  ;;  %v9955_v61 = vpop.permute.xlu0 %9954  ;;  %2307 = vmax.xlane.f32.xlu0 %v2306_v54  ;;  %v1766_v33 = vmul.f32 %v10302_v43, %v11297_v34 }
 0x5eb   : > { %v9932_v2 = vunpack.i.h.bf16 %v9930_v42  ;;  %v9931_v55 = vunpack.i.l.bf16 %v9930_v42  ;;  %v11393_v38 = vpop.f32.mrb[26].mxu1  ;;  %9384 = vmatprep.subr.msk.bf16.mxu1 %vm10998_vm2, %v9382_v39  ;;  %v9957_v53 = vunpack.i.h.bf16 %v9955_v61  ;;  %v9956_v41 = vunpack.i.l.bf16 %v9955_v61  ;;  %v10304_v35 = vpop.eup %10303 }
 0x5ec   : > { %v11397_v22 = vpop.f32.mrb[27].mxu1  ;;  %v2318_v11 = vsel %vm1026_vm3, %v11393_v38, -inf  ;;  %v10306_v17 = vpop.eup %10305  ;;  %v1767_v28 = vmul.f32 %v10304_v35, %v11293_v29 }
 0x5ed   : > { %2319 = vmax.xlane.f32.xlu1 %v2318_v11  ;;  %v9318_v32 = vpack.c.bf16 %v9932_v2, %v9931_v55  ;;  %v2315_v50 = vsel %vm1026_vm3, %v11397_v22, -inf  ;;  %v9394_v13 = vpack.c.bf16 %v9957_v53, %v9956_v41  ;;  %v10308_v42 = vpop.eup %10307  ;;  %v1768_v61 = vmul.f32 %v10306_v17, %v11299_v16 }
 0x5ee   : > { %v9950_v0 = vpop.permute.xlu1 %9949  ;;  %v2738_v31 = vpop.permute.xlu0 %2737  ;;  %2310 = vmax.xlane.f32.xlu0 %v2309_v60  ;;  %v1769_v10 = vmul.f32 %v10308_v42, %v11305_v40  ;;  %v820_v40 = vld [vmem:[%s13163_s5 + $0x8] sm:$0xff] }
 0x5ef   : > { %v9952_v57 = vunpack.i.h.bf16 %v9950_v0  ;;  %v9951_v36 = vunpack.i.l.bf16 %v9950_v0  ;;  %9319 = vmatprep.subr.bf16.mxu0 %v9318_v32  ;;  %v11403_v3 = vpop.f32.mrb[28].mxu1  ;;  %8640 = vmatprep.mubr.msk.f32.mxu1 %vm870_vm1, %v2738_v31 }
 0x5f0   : > { %9321 = vmatpush3.bf16.msra.mxu0 %v9318_v32  ;;  %v11406_v37 = vpop.f32.mrb[29].mxu1  ;;  %9387 = vmatpush3.bf16.xpose.msk.msra.mxu1 %vm10998_vm2, %v9382_v39  ;;  %v2324_v45 = vsel %vm1026_vm3, %v11403_v3, -inf }
 0x5f1   : > { %v9388_v30 = vpack.c.bf16 %v9952_v57, %v9951_v36  ;;  %2325 = vmax.xlane.f32.xlu1 %v2324_v45  ;;  %9323 = vmatprep.subr.bf16.mxu0 %v9322_v44  ;;  %v2321_v6 = vsel %vm1026_vm3, %v11406_v37, -inf  ;;  %v10310_v59 = vpop.eup %10309 }
 0x5f2   : > { %2316 = vmax.xlane.f32.xlu0 %v2315_v50  ;;  %v9960_v56 = vpop.permute.xlu1 %9959  ;;  %v10312_v34 = vpop.eup %10311  ;;  %v1770_v29 = vmul.f32 %v10310_v59, %v11313_v27 }
 0x5f3   : > { %9390 = vmatprep.subr.msk.bf16.mxu1 %vm10998_vm2, %v9388_v30  ;;  %v9962_v39 = vunpack.i.h.bf16 %v9960_v56  ;;  %v9961_v54 = vunpack.i.l.bf16 %v9960_v56  ;;  %v1771_v16 = vmul.f32 %v10312_v34, %v11309_v24  ;;  %v2742_v55 = vpop.permute.xlu0 %2741 }
 0x5f4   : > { %9325 = vmatpush3.bf16.msra.mxu0 %v9322_v44 }
 0x5f5   : > { %v9400_v4 = vpack.c.bf16 %v9962_v39, %v9961_v54  ;;  %8516 = vmatprep.subr.mxu0 %v820_v40 }
 0x5f6   : > { %2322 = vmax.xlane.f32.xlu0 %v2321_v6  ;;  %v2740_v2 = vpop.permute.xlu1 %2739 }
 0x5f7   : > { %8502 = vmatmul.mubr.msk.f32.vlgmr.msra.gmra.mrb[30].mxu0 %vm1026_vm3, %v1763_v52  ;;  %v2746_v11 = vpop.permute.xlu0 %2745 }
 0x5f8   : > { %8504 = vmatprep.mubr.msk.f32.mxu0 %vm1026_vm3, %v1764_v62  ;;  %9393 = vmatpush3.bf16.xpose.msk.msra.mxu1 %vm10998_vm2, %v9388_v30 }
 0x5f9   : > { %9396 = vmatprep.subr.msk.bf16.mxu1 %vm10998_vm2, %v9394_v13  ;;  %8517 = vmatpush3.msra.mxu0 %v820_v40 }
 0x5fa   : > { %v2744_v27 = vpop.permute.xlu1 %2743 }
 0x5fb   : > { %8505 = vmatmul.mubr.msk.f32.gmra.mrb[32].mxu0 %vm1026_vm3, %v1765_v46  ;;  %v2750_v60 = vpop.permute.xlu0 %2749 }
 0x5fc   : > { %8507 = vmatprep.mubr.msk.f32.mxu0 %vm1026_vm3, %v1766_v33 }
 0x5fe   : > { %v2748_v24 = vpop.permute.xlu1 %2747 }
 0x5ff   : > { %8508 = vmatmul.mubr.msk.f32.gmra.mrb[34].mxu0 %vm1026_vm3, %v1767_v28  ;;  %v2754_v0 = vpop.permute.xlu0 %2753 }
 0x600   : > { %8510 = vmatprep.mubr.msk.f32.mxu0 %vm1026_vm3, %v1768_v61  ;;  %9399 = vmatpush3.bf16.xpose.msk.msra.mxu1 %vm10998_vm2, %v9394_v13 }
 0x601   : > { %9402 = vmatprep.subr.msk.bf16.mxu1 %vm10998_vm2, %v9400_v4 }
 0x602   : > { %9969 = vrot.lane.b32.xlu1 %v10932_v51, %s13181_s27  ;;  %v2752_v32 = vpop.permute.xlu1 %2751 }
 0x603   : > { %8511 = vmatmul.mubr.msk.f32.gmra.mrb[36].mxu0 %vm1026_vm3, %v1769_v10 }
 0x604   : > { %8513 = vmatprep.mubr.msk.f32.mxu0 %vm1026_vm3, %v1770_v29 }
 0x606   : > { %v2756_v31 = vpop.permute.xlu1 %2755 }
 0x607   : > { %8514 = vmatmul.mubr.msk.f32.gmra.mrb[38].mxu0 %vm1026_vm3, %v1771_v16 }
 0x608   : > { %9405 = vmatpush3.bf16.xpose.msk.msra.mxu1 %vm10998_vm2, %v9400_v4 }
 0x60c   : > { %9964 = vrot.lane.b32.xlu0 %v10922_v25, %s13181_s27 }
 0x60f   : > { %8641 = vmatmul.mubr.msk.f32.vlgmr.msra.gmra.mrb[30].mxu1 %vm870_vm1, %v2740_v2 }
 0x610   : > { %8643 = vmatprep.mubr.msk.f32.mxu1 %vm870_vm1, %v2742_v55  ;;  %9974 = vrot.lane.b32.xlu0 %v10942_v58, %s13181_s27 }
 0x613   : > { %8644 = vmatmul.mubr.msk.f32.gmra.mrb[32].mxu1 %vm870_vm1, %v2744_v27 }
 0x614   : > { %8646 = vmatprep.mubr.msk.f32.mxu1 %vm870_vm1, %v2746_v11 }
 0x617   : > { %8647 = vmatmul.mubr.msk.f32.gmra.mrb[34].mxu1 %vm870_vm1, %v2748_v24 }
 0x618   : > { %8649 = vmatprep.mubr.msk.f32.mxu1 %vm870_vm1, %v2750_v60 }
 0x61b   : > { %8650 = vmatmul.mubr.msk.f32.gmra.mrb[36].mxu1 %vm870_vm1, %v2752_v32 }
 0x61c   : > { %8652 = vmatprep.mubr.msk.f32.mxu1 %vm870_vm1, %v2754_v0 }
 0x61f   : > { %8653 = vmatmul.mubr.msk.f32.gmra.mrb[38].mxu1 %vm870_vm1, %v2756_v31 }
 0x66e   : > { %v2302_v57 = vpop.xlane.xlu1 %2301 }
 0x66f   : > { %v2328_v36 = vsub.f32 %v11365_v23, %v2302_v57  ;;  %v2299_v44 = vpop.xlane.xlu0 %2298 }
 0x670   : > { %v2327_v45 = vsub.f32 %v11367_v63, %v2299_v44 }
 0x671   : > { %v2339_v30 = vmul.f32 1.442695, %v2328_v36 }
 0x672   : > { %v2337_v50 = vmul.f32 1.442695, %v2327_v45 }
 0x673   : > { %10313 = vpow2.f32 %v2339_v30  ;;  %v2305_v14 = vpop.xlane.xlu0 %2304 }
 0x674   : > { %10315 = vpow2.f32 %v2337_v50  ;;  %v2329_v26 = vsub.f32 %v11377_v19, %v2305_v14 }
 0x676   : > { %v2341_v53 = vmul.f32 1.442695, %v2329_v26  ;;  %v2314_v41 = vpop.xlane.xlu1 %2313 }
 0x677   : > { %v2332_v52 = vsub.f32 %v11381_v47, %v2314_v41  ;;  %v2308_v6 = vpop.xlane.xlu0 %2307 }
 0x678   : > { %10317 = vpow2.f32 %v2341_v53  ;;  %v2330_v48 = vsub.f32 %v11375_v18, %v2308_v6 }
 0x679   : > { %v2347_v62 = vmul.f32 1.442695, %v2332_v52 }
 0x67a   : > { %v2343_v23 = vmul.f32 1.442695, %v2330_v48  ;;  %v2320_v43 = vpop.xlane.xlu1 %2319 }
 0x67b   : > { %v2311_v13 = vpop.xlane.xlu0 %2310  ;;  %v2334_v19 = vsub.f32 %v11393_v38, %v2320_v43 }
 0x67c   : > { %10319 = vpow2.f32 %v2343_v23  ;;  %v2331_v63 = vsub.f32 %v11385_v49, %v2311_v13 }
 0x67d   : > { %v11472_v56 = vpop.eup %10313  ;;  %10321 = vpow2.f32 %v2347_v62  ;;  %v2351_v54 = vmul.f32 1.442695, %v2334_v19 }
 0x67e   : > { %v11474_v46 = vpop.eup %10315  ;;  %v2345_v35 = vmul.f32 1.442695, %v2331_v63  ;;  %v2360_v47 = vsel %vm1026_vm3, %v11472_v56, 0.0  ;;  %v2326_v33 = vpop.xlane.xlu1 %2325 }
 0x67f   : > { %v2317_v18 = vpop.xlane.xlu0 %2316  ;;  %2361 = vadd.xlane.f32.xlu1 %v2360_v47  ;;  %v2357_v17 = vsel %vm1026_vm3, %v11474_v46, 0.0  ;;  %v2336_v28 = vsub.f32 %v11403_v3, %v2326_v33 }
 0x680   : > { %v2333_v39 = vsub.f32 %v11397_v22, %v2317_v18  ;;  %2358 = vadd.xlane.f32.xlu0 %v2357_v17  ;;  %10323 = vpow2.f32 %v2345_v35 }
 0x681   : > { %v2355_v4 = vmul.f32 1.442695, %v2336_v28 }
 0x682   : > { %v11482_v49 = vpop.eup %10317  ;;  %v2349_v38 = vmul.f32 1.442695, %v2333_v39  ;;  %v9970_v44 = vpop.permute.xlu1 %9969 }
 0x683   : > { %v2323_v42 = vpop.xlane.xlu0 %2322  ;;  %v2363_v61 = vsel %vm1026_vm3, %v11482_v49, 0.0  ;;  %v9972_v45 = vunpack.i.h.bf16 %v9970_v44  ;;  %v9971_v30 = vunpack.i.l.bf16 %v9970_v44 }
 0x684   : > { %10325 = vpow2.f32 %v2349_v38  ;;  %2364 = vadd.xlane.f32.xlu0 %v2363_v61  ;;  %v2335_v22 = vsub.f32 %v11406_v37, %v2323_v42 }
 0x685   : > { %10327 = vpow2.f32 %v2351_v54  ;;  %v9360_v52 = vpack.c.bf16 %v9972_v45, %v9971_v30 }
 0x686   : > { %v11487_v59 = vpop.eup %10319  ;;  %10329 = vpow2.f32 %v2355_v4  ;;  %v2353_v2 = vmul.f32 1.442695, %v2335_v22 }
 0x687   : > { %v9965_v10 = vpop.permute.xlu0 %9964  ;;  %v2366_v34 = vsel %vm1026_vm3, %v11487_v59, 0.0  ;;  %v11492_v29 = vpop.eup %10321 }
 0x688   : > { %v9967_v3 = vunpack.i.h.bf16 %v9965_v10  ;;  %v9966_v16 = vunpack.i.l.bf16 %v9965_v10  ;;  %2367 = vadd.xlane.f32.xlu1 %v2366_v34  ;;  %v2372_v55 = vsel %vm1026_vm3, %v11492_v29, 0.0  ;;  %10331 = vpow2.f32 %v2353_v2 }
 0x68a   : > { %v9356_v40 = vpack.c.bf16 %v9967_v3, %v9966_v16  ;;  %v11496_v27 = vpop.eup %10323 }
 0x68b   : > { %v2369_v11 = vsel %vm1026_vm3, %v11496_v27, 0.0  ;;  %v9975_v50 = vpop.permute.xlu0 %9974 }
 0x68c   : > { %2373 = vadd.xlane.f32.xlu1 %v2372_v55  ;;  %9357 = vmatprep.subr.bf16.mxu0 %v9356_v40  ;;  %v9977_v53 = vunpack.i.h.bf16 %v9975_v50  ;;  %v9976_v41 = vunpack.i.l.bf16 %v9975_v50 }
 0x68e   : > { %v11498_v37 = vpop.eup %10325  ;;  %v9364_v62 = vpack.c.bf16 %v9977_v53, %v9976_v41 }
 0x68f   : > { %v2375_v24 = vsel %vm1026_vm3, %v11498_v37, 0.0  ;;  %v11504_v60 = vpop.eup %10327 }
 0x690   : > { %2370 = vadd.xlane.f32.xlu1 %v2369_v11  ;;  %2376 = vadd.xlane.f32.xlu0 %v2375_v24  ;;  %v2378_v32 = vsel %vm1026_vm3, %v11504_v60, 0.0  ;;  %v11508_v0 = vpop.eup %10329 }
 0x691   : > { %v2384_v31 = vsel %vm1026_vm3, %v11508_v0, 0.0 }
 0x692   : > { %v11512_v57 = vpop.eup %10331 }
 0x693   : > { %v2381_v36 = vsel %vm1026_vm3, %v11512_v57, 0.0 }
 0x694   : > { %2379 = vadd.xlane.f32.xlu1 %v2378_v32 }
 0x698   : > { %2385 = vadd.xlane.f32.xlu1 %v2384_v31 }
 0x69c   : > { %2382 = vadd.xlane.f32.xlu1 %v2381_v36 }
 0x6a6   : > { %9984 = vrot.lane.b32.xlu0 %v10962_v5, %s13181_s27 }
 0x6ad   : > { %9979 = vrot.lane.b32.xlu1 %v10952_v1, %s13181_s27  ;;  %s13103_s27 = scalar_lea.vmem %s13171_s13, %s13222_s22 }
 0x6ca   : > { %v8503_v14 = vpop.f32.mrb[30].mxu0 }
 0x6cb   : > { %v1898_v26 = vpop.f32.mrb[31].mxu0 }
 0x6cc   : > { %8518 = vmatprep.mubr.msk.f32.mxu0 %vm870_vm1, %v1898_v26 }
 0x6cd   : > { %8519 = vmatmul.mubr.msk.f32.vlgmr.msra.gmra.mrb[20].mxu0 %vm870_vm1, %v8503_v14 }
 0x6ce   : > { %9359 = vmatpush3.bf16.msra.mxu0 %v9356_v40  ;;  %v8506_v6 = vpop.f32.mrb[32].mxu0 }
 0x6cf   : > { %9361 = vmatprep.subr.bf16.mxu0 %v9360_v52  ;;  %v1908_v48 = vpop.f32.mrb[33].mxu0 }
 0x6d0   : > { %8521 = vmatprep.mubr.msk.f32.mxu0 %vm870_vm1, %v1908_v48 }
 0x6d1   : > { %8522 = vmatmul.mubr.msk.f32.gmra.mrb[22].mxu0 %vm870_vm1, %v8506_v6 }
 0x6d2   : > { %9363 = vmatpush3.bf16.msra.mxu0 %v9360_v52  ;;  %v8509_v23 = vpop.f32.mrb[34].mxu0 }
 0x6d3   : > { %9365 = vmatprep.subr.bf16.mxu0 %v9364_v62  ;;  %v1918_v43 = vpop.f32.mrb[35].mxu0 }
 0x6d4   : > { %8524 = vmatprep.mubr.msk.f32.mxu0 %vm870_vm1, %v1918_v43  ;;  %v821_v43 = vld [vmem:[%s13163_s5 + $0x10] sm:$0xff] }
 0x6d5   : > { %8525 = vmatmul.mubr.msk.f32.gmra.mrb[24].mxu0 %vm870_vm1, %v8509_v23 }
 0x6d6   : > { %9367 = vmatpush3.bf16.msra.mxu0 %v9364_v62  ;;  %v8512_v13 = vpop.f32.mrb[36].mxu0 }
 0x6d7   : > { %v1928_v63 = vpop.f32.mrb[37].mxu0 }
 0x6d8   : > { %8527 = vmatprep.mubr.msk.f32.mxu0 %vm870_vm1, %v1928_v63 }
 0x6d9   : > { %8528 = vmatmul.mubr.msk.f32.gmra.mrb[26].mxu0 %vm870_vm1, %v8512_v13 }
 0x6da   : > { %v8515_v19 = vpop.f32.mrb[38].mxu0 }
 0x6db   : > { %v1938_v35 = vpop.f32.mrb[39].mxu0 }
 0x6dc   : > { %8530 = vmatprep.mubr.msk.f32.mxu0 %vm870_vm1, %v1938_v35 }
 0x6dd   : > { %8531 = vmatmul.mubr.msk.f32.gmra.mrb[28].mxu0 %vm870_vm1, %v8515_v19 }
 0x6e2   : > { %v11530_v47 = vpop.f32.mrb[30].mxu1 }
 0x6e3   : > { %v11532_v33 = vpop.f32.mrb[31].mxu1  ;;  %v2935_v18 = vsel %vm1026_vm3, %v11530_v47, -inf }
 0x6e4   : > { %2936 = vmax.xlane.f32.xlu1 %v2935_v18  ;;  %v2932_v17 = vsel %vm1026_vm3, %v11532_v33, -inf }
 0x6e5   : > { %2933 = vmax.xlane.f32.xlu0 %v2932_v17 }
 0x6e6   : > { %v11538_v39 = vpop.f32.mrb[32].mxu1 }
 0x6e7   : > { %v11540_v54 = vpop.f32.mrb[33].mxu1  ;;  %v2941_v61 = vsel %vm1026_vm3, %v11538_v39, -inf }
 0x6e8   : > { %v2938_v28 = vsel %vm1026_vm3, %v11540_v54, -inf }
 0x6e9   : > { %2939 = vmax.xlane.f32.xlu0 %v2938_v28 }
 0x6ea   : > { %v11544_v38 = vpop.f32.mrb[34].mxu1 }
 0x6eb   : > { %v11546_v42 = vpop.f32.mrb[35].mxu1  ;;  %v2947_v2 = vsel %vm1026_vm3, %v11544_v38, -inf }
 0x6ec   : > { %v2944_v10 = vsel %vm1026_vm3, %v11546_v42, -inf }
 0x6ed   : > { %2942 = vmax.xlane.f32.xlu0 %v2941_v61 }
 0x6ee   : > { %v11550_v4 = vpop.f32.mrb[36].mxu1 }
 0x6ef   : > { %v11552_v22 = vpop.f32.mrb[37].mxu1  ;;  %v2953_v55 = vsel %vm1026_vm3, %v11550_v4, -inf }
 0x6f0   : > { %v2950_v34 = vsel %vm1026_vm3, %v11552_v22, -inf }
 0x6f1   : > { %2945 = vmax.xlane.f32.xlu0 %v2944_v10  ;;  %2951 = vmax.xlane.f32.xlu1 %v2950_v34 }
 0x6f2   : > { %v11558_v3 = vpop.f32.mrb[38].mxu1 }
 0x6f3   : > { %v11560_v16 = vpop.f32.mrb[39].mxu1  ;;  %v2959_v11 = vsel %vm1026_vm3, %v11558_v3, -inf }
 0x6f4   : > { %v2956_v40 = vsel %vm1026_vm3, %v11560_v16, -inf }
 0x6f5   : > { %2948 = vmax.xlane.f32.xlu0 %v2947_v2  ;;  %2957 = vmax.xlane.f32.xlu1 %v2956_v40 }
 0x6f9   : > { %2954 = vmax.xlane.f32.xlu0 %v2953_v55 }
 0x6fd   : > { %2960 = vmax.xlane.f32.xlu0 %v2959_v11 }
 0x706   : > { %9989 = vrot.lane.b32.xlu1 %v10922_v25, %s13179_s23 }
 0x70a   : > { %9999 = vrot.lane.b32.xlu1 %v10942_v58, %s13179_s23 }
 0x70c   : > { %v2362_v32 = vpop.xlane.xlu1 %2361 }
 0x70d   : > { %v2359_v24 = vpop.xlane.xlu0 %2358 }
 0x70e   : > { %10333 = vrcp.f32 %v2359_v24 }
 0x70f   : > { %10335 = vrcp.f32 %v2362_v32 }
 0x711   : > { %v2365_v50 = vpop.xlane.xlu0 %2364 }
 0x712   : > { %10337 = vrcp.f32 %v2365_v50 }
 0x713   : > { %9994 = vrot.lane.b32.xlu0 %v10932_v51, %s13179_s23 }
 0x715   : > { %v2368_v31 = vpop.xlane.xlu1 %2367 }
 0x716   : > { %10339 = vrcp.f32 %v2368_v31 }
 0x718   : > { %v10334_v36 = vpop.eup %10333 }
 0x719   : > { %v2374_v44 = vpop.xlane.xlu1 %2373  ;;  %v2397_v45 = vmul.f32 %v10334_v36, %v11474_v46  ;;  %v10336_v23 = vpop.eup %10335 }
 0x71a   : > { %v2398_v63 = vmul.f32 %v10336_v23, %v11472_v56 }
 0x71b   : > { %8588 = vmatprep.mubr.msk.f32.mxu0 %vm1026_vm3, %v2397_v45 }
 0x71c   : > { %v10338_v13 = vpop.eup %10337 }
 0x71d   : > { %v2371_v30 = vpop.xlane.xlu1 %2370  ;;  %v2377_v25 = vpop.xlane.xlu0 %2376  ;;  %v2399_v35 = vmul.f32 %v10338_v13, %v11482_v49 }
 0x71e   : > { %10341 = vrcp.f32 %v2371_v30 }
 0x71f   : > { %10343 = vrcp.f32 %v2374_v44 }
 0x720   : > { %10345 = vrcp.f32 %v2377_v25  ;;  %v10340_v19 = vpop.eup %10339 }
 0x721   : > { %v2380_v14 = vpop.xlane.xlu1 %2379  ;;  %v9985_v58 = vpop.permute.xlu0 %9984  ;;  %v2400_v17 = vmul.f32 %v10340_v19, %v11487_v59 }
 0x722   : > { %v9987_v52 = vunpack.i.h.bf16 %v9985_v58  ;;  %v9986_v6 = vunpack.i.l.bf16 %v9985_v58  ;;  %10347 = vrcp.f32 %v2380_v14 }
 0x724   : > { %v9372_v46 = vpack.c.bf16 %v9987_v52, %v9986_v6 }
 0x725   : > { %v2386_v26 = vpop.xlane.xlu1 %2385 }
 0x728   : > { %v10342_v18 = vpop.eup %10341 }
 0x729   : > { %v2383_v53 = vpop.xlane.xlu1 %2382  ;;  %v10344_v28 = vpop.eup %10343  ;;  %v2401_v61 = vmul.f32 %v10342_v18, %v11496_v27 }
 0x72a   : > { %10349 = vrcp.f32 %v2383_v53  ;;  %v10346_v10 = vpop.eup %10345  ;;  %v2402_v56 = vmul.f32 %v10344_v28, %v11492_v29 }
 0x72b   : > { %10351 = vrcp.f32 %v2386_v26  ;;  %v2403_v34 = vmul.f32 %v10346_v10, %v11498_v37 }
 0x72c   : > { %v10348_v49 = vpop.eup %10347 }
 0x72d   : > { %v9980_v41 = vpop.permute.xlu1 %9979  ;;  %v2404_v59 = vmul.f32 %v10348_v49, %v11504_v60 }
 0x72e   : > { %v9982_v51 = vunpack.i.h.bf16 %v9980_v41  ;;  %v9981_v48 = vunpack.i.l.bf16 %v9980_v41 }
 0x730   : > { %v9368_v62 = vpack.c.bf16 %v9982_v51, %v9981_v48 }
 0x732   : > { %9369 = vmatprep.subr.bf16.mxu0 %v9368_v62 }
 0x733   : > { %9371 = vmatpush3.bf16.msra.mxu0 %v9368_v62 }
 0x734   : > { %9373 = vmatprep.subr.bf16.mxu0 %v9372_v46  ;;  %v10350_v2 = vpop.eup %10349 }
 0x735   : > { %v10352_v40 = vpop.eup %10351  ;;  %v2405_v27 = vmul.f32 %v10350_v2, %v11512_v57 }
 0x736   : > { %v2406_v55 = vmul.f32 %v10352_v40, %v11508_v0 }
 0x737   : > { %9375 = vmatpush3.bf16.msra.mxu0 %v9372_v46 }
 0x738   : > { %8603 = vmatprep.subr.mxu0 %v821_v43 }
 0x73a   : > { %8589 = vmatmul.mubr.msk.f32.vlgmr.msra.gmra.mrb[40].mxu0 %vm1026_vm3, %v2398_v63 }
 0x73b   : > { %8591 = vmatprep.mubr.msk.f32.mxu0 %vm1026_vm3, %v2399_v35  ;;  %8604 = vmatpush3.msra.mxu0 %v821_v43 }
 0x73e   : > { %8592 = vmatmul.mubr.msk.f32.gmra.mrb[42].mxu0 %vm1026_vm3, %v2400_v17 }
 0x73f   : > { %8594 = vmatprep.mubr.msk.f32.mxu0 %vm1026_vm3, %v2401_v61 }
 0x742   : > { %8595 = vmatmul.mubr.msk.f32.gmra.mrb[44].mxu0 %vm1026_vm3, %v2402_v56 }
 0x743   : > { %8597 = vmatprep.mubr.msk.f32.mxu0 %vm1026_vm3, %v2403_v34 }
 0x746   : > { %8598 = vmatmul.mubr.msk.f32.gmra.mrb[46].mxu0 %vm1026_vm3, %v2404_v59 }
 0x747   : > { %8600 = vmatprep.mubr.msk.f32.mxu0 %vm1026_vm3, %v2405_v27 }
 0x74a   : > { %8601 = vmatmul.mubr.msk.f32.gmra.mrb[48].mxu0 %vm1026_vm3, %v2406_v55 }
 0x771   : > { %v2937_v29 = vpop.xlane.xlu1 %2936 }
 0x772   : > { %v2963_v37 = vsub.f32 %v11530_v47, %v2937_v29  ;;  %v2934_v11 = vpop.xlane.xlu0 %2933 }
 0x773   : > { %v2962_v24 = vsub.f32 %v11532_v33, %v2934_v11 }
 0x774   : > { %v2974_v32 = vmul.f32 1.442695, %v2963_v37 }
 0x775   : > { %v2972_v31 = vmul.f32 1.442695, %v2962_v24 }
 0x776   : > { %10353 = vpow2.f32 %v2974_v32  ;;  %v2940_v60 = vpop.xlane.xlu0 %2939 }
 0x777   : > { %10355 = vpow2.f32 %v2972_v31  ;;  %v2964_v57 = vsub.f32 %v11540_v54, %v2940_v60 }
 0x779   : > { %v2976_v45 = vmul.f32 1.442695, %v2964_v57 }
 0x77a   : > { %v2943_v36 = vpop.xlane.xlu0 %2942 }
 0x77b   : > { %v2965_v44 = vsub.f32 %v11538_v39, %v2943_v36 }
 0x77d   : > { %v2978_v0 = vmul.f32 1.442695, %v2965_v44 }
 0x77e   : > { %v2952_v30 = vpop.xlane.xlu1 %2951  ;;  %v2946_v50 = vpop.xlane.xlu0 %2945 }
 0x77f   : > { %10357 = vpow2.f32 %v2978_v0  ;;  %v2966_v47 = vsub.f32 %v11546_v42, %v2946_v50  ;;  %v2968_v35 = vsub.f32 %v11552_v22, %v2952_v30 }
 0x780   : > { %v11604_v14 = vpop.eup %10353  ;;  %10359 = vpow2.f32 %v2976_v45 }
 0x781   : > { %v11606_v33 = vpop.eup %10355  ;;  %v2980_v25 = vmul.f32 1.442695, %v2966_v47  ;;  %v2995_v26 = vsel %vm1026_vm3, %v11604_v14, 0.0  ;;  %v2984_v17 = vmul.f32 1.442695, %v2968_v35 }
 0x782   : > { %2996 = vadd.xlane.f32.xlu0 %v2995_v26  ;;  %v2958_v54 = vpop.xlane.xlu1 %2957  ;;  %v2949_v53 = vpop.xlane.xlu0 %2948  ;;  %v2992_v39 = vsel %vm1026_vm3, %v11606_v33, 0.0 }
 0x783   : > { %v2967_v58 = vsub.f32 %v11544_v38, %v2949_v53  ;;  %2993 = vadd.xlane.f32.xlu1 %v2992_v39  ;;  %10361 = vpow2.f32 %v2980_v25  ;;  %v2970_v18 = vsub.f32 %v11560_v16, %v2958_v54 }
 0x785   : > { %v2982_v42 = vmul.f32 1.442695, %v2967_v58  ;;  %v2988_v10 = vmul.f32 1.442695, %v2970_v18 }
 0x786   : > { %v9990_v41 = vpop.permute.xlu1 %9989  ;;  %v2955_v19 = vpop.xlane.xlu0 %2954 }
 0x787   : > { %v9992_v52 = vunpack.i.h.bf16 %v9990_v41  ;;  %v9991_v6 = vunpack.i.l.bf16 %v9990_v41  ;;  %10363 = vpow2.f32 %v2982_v42  ;;  %v2969_v28 = vsub.f32 %v11550_v4, %v2955_v19 }
 0x788   : > { %10365 = vpow2.f32 %v2984_v17 }
 0x789   : > { %v11613_v51 = vpop.eup %10357  ;;  %v9406_v48 = vpack.c.bf16 %v9992_v52, %v9991_v6  ;;  %v2986_v56 = vmul.f32 1.442695, %v2969_v28  ;;  %10367 = vpow2.f32 %v2988_v10 }
 0x78a   : > { %v3001_v62 = vsel %vm1026_vm3, %v11613_v51, 0.0  ;;  %v11617_v46 = vpop.eup %10359  ;;  %v2961_v61 = vpop.xlane.xlu0 %2960 }
 0x78b   : > { %3002 = vadd.xlane.f32.xlu0 %v3001_v62  ;;  %9407 = vmatprep.subr.bf16.mxu0 %v9406_v48  ;;  %v2998_v38 = vsel %vm1026_vm3, %v11617_v46, 0.0  ;;  %v2971_v49 = vsub.f32 %v11558_v3, %v2961_v61  ;;  %10369 = vpow2.f32 %v2986_v56  ;;  %v10000_v27 = vpop.permute.xlu1 %9999 }
 0x78c   : > { %v10002_v24 = vunpack.i.h.bf16 %v10000_v27  ;;  %v10001_v32 = vunpack.i.l.bf16 %v10000_v27 }
 0x78d   : > { %v11619_v23 = vpop.eup %10361 }
 0x78e   : > { %v3004_v43 = vsel %vm1026_vm3, %v11619_v23, 0.0  ;;  %v9995_v40 = vpop.permute.xlu0 %9994  ;;  %v9414_v45 = vpack.c.bf16 %v10002_v24, %v10001_v32 }
 0x78f   : > { %2999 = vadd.xlane.f32.xlu0 %v2998_v38  ;;  %3005 = vadd.xlane.f32.xlu1 %v3004_v43  ;;  %v9997_v55 = vunpack.i.h.bf16 %v9995_v40  ;;  %v9996_v29 = vunpack.i.l.bf16 %v9995_v40 }
 0x791   : > { %v11625_v13 = vpop.eup %10363  ;;  %v9410_v60 = vpack.c.bf16 %v9997_v55, %v9996_v29 }
 0x792   : > { %v3007_v63 = vsel %vm1026_vm3, %v11625_v13, 0.0  ;;  %v11637_v34 = vpop.eup %10365 }
 0x793   : > { %3008 = vadd.xlane.f32.xlu0 %v3007_v63  ;;  %v3010_v22 = vsel %vm1026_vm3, %v11637_v34, 0.0 }
 0x7a0   : > { %10004 = vrot.lane.b32.xlu1 %v10952_v1, %s13179_s23  ;;  %v2990_v1 = vmul.f32 1.442695, %v2971_v49 }
 0x7a2   : > { %10371 = vpow2.f32 %v2990_v1 }
 0x7a9   : > { %10009 = vrot.lane.b32.xlu0 %v10962_v5, %s13179_s23  ;;  %v11639_v5 = vpop.eup %10367  ;;  %s13223_s23 = sshll.u32 %s13225_s30, 4 }
 0x7aa   : > { %v11643_v16 = vpop.eup %10369  ;;  %v3016_v4 = vsel %vm1026_vm3, %v11639_v5, 0.0 }
 0x7ab   : > { %v3013_v3 = vsel %vm1026_vm3, %v11643_v16, 0.0 }
 0x7ac   : > { %v11649_v2 = vpop.eup %10371 }
 0x7ad   : > { %v3019_v59 = vsel %vm1026_vm3, %v11649_v2, 0.0 }
 0x7c4   : > { %3011 = vadd.xlane.f32.xlu1 %v3010_v22 }
 0x7c8   : > { %3017 = vadd.xlane.f32.xlu1 %v3016_v4  ;;  %3014 = vadd.xlane.f32.xlu0 %v3013_v3 }
 0x7cc   : > { %3020 = vadd.xlane.f32.xlu1 %v3019_v59 }
 0x80d   : > { %v8590_v37 = vpop.f32.mrb[40].mxu0 }
 0x80e   : > { %v2533_v11 = vpop.f32.mrb[41].mxu0 }
 0x80f   : > { %8605 = vmatprep.mubr.msk.f32.mxu0 %vm870_vm1, %v2533_v11  ;;  %v2997_v44 = vpop.xlane.xlu0 %2996 }
 0x810   : > { %v2994_v31 = vpop.xlane.xlu1 %2993  ;;  %8606 = vmatmul.mubr.msk.f32.vlgmr.msra.gmra.mrb[20].mxu0 %vm870_vm1, %v8590_v37 }
 0x811   : > { %9409 = vmatpush3.bf16.msra.mxu0 %v9406_v48  ;;  %v8593_v57 = vpop.f32.mrb[42].mxu0  ;;  %10373 = vrcp.f32 %v2994_v31 }
 0x812   : > { %9411 = vmatprep.subr.bf16.mxu0 %v9410_v60  ;;  %v2543_v36 = vpop.f32.mrb[43].mxu0  ;;  %10375 = vrcp.f32 %v2997_v44 }
 0x813   : > { %8608 = vmatprep.mubr.msk.f32.mxu0 %vm870_vm1, %v2543_v36 }
 0x814   : > { %8609 = vmatmul.mubr.msk.f32.gmra.mrb[22].mxu0 %vm870_vm1, %v8593_v57  ;;  %v7423_v57 = vld [vmem:[%s13164_s6] ss:$0 sm:$0xff] }
 0x815   : > { %9413 = vmatpush3.bf16.msra.mxu0 %v9410_v60  ;;  %v8596_v0 = vpop.f32.mrb[44].mxu0  ;;  %v831_v36 = vadd.f32 %v7423_v57, %v10759_v9  ;;  %v830_v44 = vadd.f32 %v7423_v57, %v10755_v7 }
 0x816   : > { %9415 = vmatprep.subr.bf16.mxu0 %v9414_v45  ;;  %v2553_v30 = vpop.f32.mrb[45].mxu0 }
 0x817   : > { %8611 = vmatprep.mubr.msk.f32.mxu0 %vm870_vm1, %v2553_v30 }
 0x818   : > { %v3003_v50 = vpop.xlane.xlu0 %3002  ;;  %8612 = vmatmul.mubr.msk.f32.gmra.mrb[24].mxu0 %vm870_vm1, %v8596_v0 }
 0x819   : > { %9417 = vmatpush3.bf16.msra.mxu0 %v9414_v45  ;;  %v8599_v47 = vpop.f32.mrb[46].mxu0 }
 0x81a   : > { %v2563_v25 = vpop.f32.mrb[47].mxu0 }
 0x81b   : > { %8614 = vmatprep.mubr.msk.f32.mxu0 %vm870_vm1, %v2563_v25  ;;  %v10374_v26 = vpop.eup %10373  ;;  %v832_v25 = vadd.f32 %v7423_v57, %v10757_v8 }
 0x81c   : > { %v3000_v54 = vpop.xlane.xlu0 %2999  ;;  %8615 = vmatmul.mubr.msk.f32.gmra.mrb[26].mxu0 %vm870_vm1, %v8599_v47  ;;  %v3006_v53 = vpop.xlane.xlu1 %3005  ;;  %v3032_v42 = vmul.f32 %v10374_v26, %v11606_v33 }
 0x81d   : > { %v8602_v39 = vpop.f32.mrb[48].mxu0  ;;  %10377 = vrcp.f32 %v3000_v54  ;;  %v10376_v33 = vpop.eup %10375 }
 0x81e   : > { %v2573_v58 = vpop.f32.mrb[49].mxu0  ;;  %10379 = vrcp.f32 %v3003_v50  ;;  %v3033_v18 = vmul.f32 %v10376_v33, %v11604_v14  ;;  %v833_v50 = vadd.f32 %v7423_v57, %v10764_v12  ;;  %v834_v12 = vadd.f32 %v7423_v57, %v10778_v20 }
 0x81f   : > { %8617 = vmatprep.mubr.msk.f32.mxu0 %vm870_vm1, %v2573_v58  ;;  %10381 = vrcp.f32 %v3006_v53 }
 0x820   : > { %8618 = vmatmul.mubr.msk.f32.gmra.mrb[28].mxu0 %vm870_vm1, %v8602_v39  ;;  %v10005_v41 = vpop.permute.xlu1 %10004  ;;  %v3009_v52 = vpop.xlane.xlu0 %3008  ;;  %v835_v39 = vadd.f32 %v7423_v57, %v10780_v21 }
 0x821   : > { %8675 = vmatprep.mubr.msk.f32.mxu0 %vm1026_vm3, %v3032_v42  ;;  %v10007_v6 = vunpack.i.h.bf16 %v10005_v41  ;;  %v10006_v48 = vunpack.i.l.bf16 %v10005_v41  ;;  %10383 = vrcp.f32 %v3009_v52 }
 0x823   : > { %v9418_v62 = vpack.c.bf16 %v10007_v6, %v10006_v48 }
 0x824   : > { %v10010_v38 = vpop.permute.xlu0 %10009 }
 0x825   : > { %v10012_v43 = vunpack.i.h.bf16 %v10010_v38  ;;  %v10011_v63 = vunpack.i.l.bf16 %v10010_v38  ;;  %9419 = vmatprep.subr.bf16.mxu0 %v9418_v62 }
 0x826   : > { %9421 = vmatpush3.bf16.msra.mxu0 %v9418_v62  ;;  %v13203_v62 = vld [vmem:[#allocation3_spill] sm:$0xff] }
 0x827   : > { %v9422_v19 = vpack.c.bf16 %v10012_v43, %v10011_v63  ;;  %v10378_v35 = vpop.eup %10377  ;;  %v837_v38 = vadd.f32 %v7423_v57, %v13203_v62  ;;  %v13204_v43 = vld [vmem:[#allocation2_spill] sm:$0xff] }
 0x828   : > { %v10380_v17 = vpop.eup %10379  ;;  %v3034_v28 = vmul.f32 %v10378_v35, %v11617_v46  ;;  %v836_v63 = vadd.f32 %v7423_v57, %v13204_v43 }
 0x829   : > { %9423 = vmatprep.subr.bf16.mxu0 %v9422_v19  ;;  %v10382_v61 = vpop.eup %10381  ;;  %v3035_v10 = vmul.f32 %v10380_v17, %v11613_v51 }
 0x82a   : > { %9425 = vmatpush3.bf16.msra.mxu0 %v9422_v19  ;;  %v3036_v49 = vmul.f32 %v10382_v61, %v11619_v23  ;;  %v13206_v61 = vld [vmem:[#allocation4_spill] sm:$0xff] }
 0x82b   : > { %v10384_v56 = vpop.eup %10383 }
 0x82c   : > { %v3037_v1 = vmul.f32 %v10384_v56, %v11625_v13 }
 0x82d   : > { %8676 = vmatmul.mubr.msk.f32.vlgmr.msra.gmra.mrb[50].mxu0 %vm1026_vm3, %v3033_v18  ;;  %v13205_v18 = vld [vmem:[#allocation5_spill] sm:$0xff] }
 0x82e   : > { %8678 = vmatprep.mubr.msk.f32.mxu0 %vm1026_vm3, %v3034_v28  ;;  %v839_v17 = vadd.f32 %v7423_v57, %v13205_v18 }
 0x831   : > { %8679 = vmatmul.mubr.msk.f32.gmra.mrb[52].mxu0 %vm1026_vm3, %v3035_v10  ;;  %v838_v10 = vadd.f32 %v7423_v57, %v13206_v61 }
 0x832   : > { %8681 = vmatprep.mubr.msk.f32.mxu0 %vm1026_vm3, %v3036_v49 }
 0x835   : > { %8682 = vmatmul.mubr.msk.f32.gmra.mrb[54].mxu0 %vm1026_vm3, %v3037_v1 }
 0x851   : > { %v3012_v14 = vpop.xlane.xlu1 %3011 }
 0x852   : > { %10385 = vrcp.f32 %v3012_v14 }
 0x855   : > { %v3018_v46 = vpop.xlane.xlu1 %3017  ;;  %v3015_v22 = vpop.xlane.xlu0 %3014 }
 0x856   : > { %10387 = vrcp.f32 %v3018_v46 }
 0x857   : > { %10389 = vrcp.f32 %v3015_v22 }
 0x859   : > { %v3021_v4 = vpop.xlane.xlu1 %3020 }
 0x85a   : > { %10391 = vrcp.f32 %v3021_v4 }
 0x85c   : > { %v10386_v51 = vpop.eup %10385 }
 0x85d   : > { %v3038_v3 = vmul.f32 %v10386_v51, %v11637_v34  ;;  %v822_v34 = vld [vmem:[%s13163_s5 + $0x18] sm:$0xff] }
 0x85e   : > { %8690 = vmatprep.subr.mxu0 %v822_v34 }
 0x85f   : > { %8684 = vmatprep.mubr.msk.f32.mxu0 %vm1026_vm3, %v3038_v3  ;;  %8691 = vmatpush3.msra.mxu0 %v822_v34 }
 0x860   : > { %v10388_v23 = vpop.eup %10387 }
 0x861   : > { %v10390_v59 = vpop.eup %10389  ;;  %v3040_v40 = vmul.f32 %v10388_v23, %v11639_v5 }
 0x862   : > { %v3039_v13 = vmul.f32 %v10390_v59, %v11643_v16 }
 0x864   : > { %v10392_v27 = vpop.eup %10391  ;;  %8685 = vmatmul.mubr.msk.f32.gmra.mrb[56].mxu0 %vm1026_vm3, %v3039_v13 }
 0x865   : > { %8687 = vmatprep.mubr.msk.f32.mxu0 %vm1026_vm3, %v3040_v40  ;;  %v3041_v55 = vmul.f32 %v10392_v27, %v11649_v2 }
 0x868   : > { %8688 = vmatmul.mubr.msk.f32.gmra.mrb[58].mxu0 %vm1026_vm3, %v3041_v55 }
 0x900   : > { %v8677_v29 = vpop.f32.mrb[50].mxu0 }
 0x901   : > { %v3168_v37 = vpop.f32.mrb[51].mxu0 }
 0x902   : > { %8692 = vmatprep.mubr.msk.f32.mxu0 %vm870_vm1, %v3168_v37 }
 0x903   : > { %8693 = vmatmul.mubr.msk.f32.vlgmr.msra.gmra.mrb[20].mxu0 %vm870_vm1, %v8677_v29 }
 0x904   : > { %v8680_v5 = vpop.f32.mrb[52].mxu0 }
 0x905   : > { %v3178_v16 = vpop.f32.mrb[53].mxu0 }
 0x906   : > { %8695 = vmatprep.mubr.msk.f32.mxu0 %vm870_vm1, %v3178_v16 }
 0x907   : > { %8696 = vmatmul.mubr.msk.f32.gmra.mrb[22].mxu0 %vm870_vm1, %v8680_v5 }
 0x908   : > { %v8683_v2 = vpop.f32.mrb[54].mxu0 }
 0x909   : > { %v3188_v11 = vpop.f32.mrb[55].mxu0 }
 0x90a   : > { %8698 = vmatprep.mubr.msk.f32.mxu0 %vm870_vm1, %v3188_v11 }
 0x90b   : > { %8699 = vmatmul.mubr.msk.f32.gmra.mrb[24].mxu0 %vm870_vm1, %v8683_v2 }
 0x937   : > { %v8686_v24 = vpop.f32.mrb[56].mxu0 }
 0x938   : > { %v3198_v32 = vpop.f32.mrb[57].mxu0 }
 0x939   : > { %8701 = vmatprep.mubr.msk.f32.mxu0 %vm870_vm1, %v3198_v32 }
 0x93a   : > { %8702 = vmatmul.mubr.msk.f32.gmra.mrb[26].mxu0 %vm870_vm1, %v8686_v24 }
 0x93b   : > { %v8689_v31 = vpop.f32.mrb[58].mxu0 }
 0x93c   : > { %v3208_v60 = vpop.f32.mrb[59].mxu0 }
 0x93d   : > { %8704 = vmatprep.mubr.msk.f32.mxu0 %vm870_vm1, %v3208_v60 }
 0x93e   : > { %8705 = vmatmul.mubr.msk.f32.gmra.mrb[28].mxu0 %vm870_vm1, %v8689_v31 }
 0x9d6   : > { %v8694_v45 = vpop.f32.mrb[20].mxu0 }
 0x9d7   : > { %v11701_v0 = vadd.f32 %v8694_v45, %v831_v36  ;;  %v3313_v30 = vpop.f32.mrb[21].mxu0 }
 0x9d8   : > { %v11704_v47 = vadd.f32 %v3313_v30, %v830_v44 }
 0x9d9   : > { %v3375_v26 = vsel %vm531_vm0, %v11701_v0, 0.0 }
 0x9da   : > { %3376 = vadd.xlane.f32.xlu1 %v3375_v26  ;;  %v8697_v54 = vpop.f32.mrb[22].mxu0  ;;  %v3372_v9 = vsel %vm531_vm0, %v11704_v47, 0.0 }
 0x9db   : > { %v11711_v53 = vadd.f32 %v8697_v54, %v833_v50  ;;  %3373 = vadd.xlane.f32.xlu0 %v3372_v9  ;;  %v3323_v7 = vpop.f32.mrb[23].mxu0 }
 0x9dc   : > { %v11714_v58 = vadd.f32 %v3323_v7, %v832_v25 }
 0x9dd   : > { %v3381_v8 = vsel %vm531_vm0, %v11711_v53, 0.0 }
 0x9de   : > { %3382 = vadd.xlane.f32.xlu1 %v3381_v8  ;;  %v8700_v42 = vpop.f32.mrb[24].mxu0  ;;  %v3378_v41 = vsel %vm531_vm0, %v11714_v58, 0.0  ;;  %v3503_v8 = vld [vmem:[%s13165_s7 + $0x8] sm:$0xff] }
 0x9df   : > { %v11721_v52 = vadd.f32 %v8700_v42, %v835_v39  ;;  %3379 = vadd.xlane.f32.xlu0 %v3378_v41  ;;  %v3333_v6 = vpop.f32.mrb[25].mxu0  ;;  %v3504_v41 = vld [vmem:[%s13165_s7 + $0x10] sm:$0xff] }
 0x9e0   : > { %v11723_v48 = vadd.f32 %v3333_v6, %v834_v12  ;;  %v3502_v12 = vld [vmem:[%s13165_s7] sm:$0xff]  ;;  %v3505_v6 = vld [vmem:[%s13165_s7 + $0x18] sm:$0xff] }
 0x9e1   : > { %v3387_v21 = vsel %vm531_vm0, %v11721_v52, 0.0  ;;  %v9426_v42 = vpack.c.bf16 %v3503_v8, %v3502_v12 }
 0x9e2   : > { %3388 = vadd.xlane.f32.xlu1 %v3387_v21  ;;  %v3384_v20 = vsel %vm531_vm0, %v11723_v48, 0.0  ;;  %v9430_v21 = vpack.c.bf16 %v3505_v6, %v3504_v41 }
 0x9e3   : > { %3385 = vadd.xlane.f32.xlu0 %v3384_v20  ;;  %9427 = vmatprep.subr.bf16.mxu1 %v9426_v42 }
 0x9e4   : > { %9429 = vmatpush3.bf16.msra.mxu1 %v9426_v42 }
 0x9e5   : > { %9431 = vmatprep.subr.bf16.mxu1 %v9430_v21 }
 0x9e8   : > { %9433 = vmatpush3.bf16.msra.mxu1 %v9430_v21 }
 0xa0d   : > { %v8703_v19 = vpop.f32.mrb[26].mxu0 }
 0xa0e   : > { %v11731_v33 = vadd.f32 %v8703_v19, %v837_v38  ;;  %v3343_v35 = vpop.f32.mrb[27].mxu0 }
 0xa0f   : > { %v11734_v28 = vadd.f32 %v3343_v35, %v836_v63 }
 0xa10   : > { %v3393_v56 = vsel %vm531_vm0, %v11731_v33, 0.0 }
 0xa11   : > { %3394 = vadd.xlane.f32.xlu1 %v3393_v56  ;;  %v8706_v49 = vpop.f32.mrb[28].mxu0  ;;  %v3390_v1 = vsel %vm531_vm0, %v11734_v28, 0.0 }
 0xa12   : > { %v11741_v14 = vadd.f32 %v8706_v49, %v839_v17  ;;  %3391 = vadd.xlane.f32.xlu0 %v3390_v1  ;;  %v3353_v46 = vpop.f32.mrb[29].mxu0 }
 0xa13   : > { %v11743_v22 = vadd.f32 %v3353_v46, %v838_v10 }
 0xa14   : > { %v3399_v4 = vsel %vm531_vm0, %v11741_v14, 0.0 }
 0xa15   : > { %3400 = vadd.xlane.f32.xlu1 %v3399_v4  ;;  %v3396_v51 = vsel %vm531_vm0, %v11743_v22, 0.0 }
 0xa16   : > { %3397 = vadd.xlane.f32.xlu0 %v3396_v51 }
 0xa67   : > { %v3377_v3 = vpop.xlane.xlu1 %3376 }
 0xa68   : > { %v3403_v23 = vmul.f32 0.03125, %v3377_v3  ;;  %v3374_v59 = vpop.xlane.xlu0 %3373 }
 0xa69   : > { %v3402_v40 = vmul.f32 0.03125, %v3374_v59 }
 0xa6a   : > { %v11750_v13 = vsub.f32 %v11701_v0, %v3403_v23 }
 0xa6b   : > { %v11753_v27 = vsub.f32 %v11704_v47, %v3402_v40  ;;  %v3383_v55 = vpop.xlane.xlu1 %3382  ;;  %v3668_v40 = vld [vmem:[%s13167_s9] sm:$0xff] }
 0xa6c   : > { %v3405_v34 = vmul.f32 0.03125, %v3383_v55  ;;  %v3380_v29 = vpop.xlane.xlu0 %3379  ;;  %v3423_v37 = vmul.f32 %v11750_v13, %v11750_v13  ;;  %v3669_v55 = vld [vmem:[%s13167_s9 + $0x8] sm:$0xff] }
 0xa6d   : > { %v3404_v5 = vmul.f32 0.03125, %v3380_v29  ;;  %v3422_v16 = vmul.f32 %v11753_v27, %v11753_v27  ;;  %v9434_v29 = vpack.c.bf16 %v3669_v55, %v3668_v40 }
 0xa6e   : > { %v11760_v2 = vsub.f32 %v11711_v53, %v3405_v34  ;;  %v3435_v11 = vsel %vm531_vm0, %v3423_v37, 0.0  ;;  %v3670_v34 = vld [vmem:[%s13167_s9 + $0x10] sm:$0xff]  ;;  %v3671_v37 = vld [vmem:[%s13167_s9 + $0x18] sm:$0xff] }
 0xa6f   : > { %v11764_v24 = vsub.f32 %v11714_v58, %v3404_v5  ;;  %v3389_v32 = vpop.xlane.xlu1 %3388  ;;  %3436 = vadd.xlane.f32.xlu1 %v3435_v11  ;;  %v3432_v31 = vsel %vm531_vm0, %v3422_v16, 0.0  ;;  %v9438_v5 = vpack.c.bf16 %v3671_v37, %v3670_v34  ;;  %v3672_v16 = vld [vmem:[%s13167_s9 + $0x20] sm:$0xff]  ;;  %v3673_v11 = vld [vmem:[%s13167_s9 + $0x28] sm:$0xff]  ;;  %9435 = vmatprep.subr.bf16.mxu0 %v9434_v29 }
 0xa70   : > { %v3407_v60 = vmul.f32 0.03125, %v3389_v32  ;;  %v3386_v57 = vpop.xlane.xlu0 %3385  ;;  %3433 = vadd.xlane.f32.xlu0 %v3432_v31  ;;  %v3425_v36 = vmul.f32 %v11760_v2, %v11760_v2  ;;  %9437 = vmatpush3.bf16.msra.mxu0 %v9434_v29  ;;  %v9442_v32 = vpack.c.bf16 %v3673_v11, %v3672_v16  ;;  %v3674_v31 = vld [vmem:[%s13167_s9 + $0x30] sm:$0xff] }
 0xa71   : > { %v3406_v44 = vmul.f32 0.03125, %v3386_v57  ;;  %v3424_v45 = vmul.f32 %v11764_v24, %v11764_v24  ;;  %9439 = vmatprep.subr.bf16.mxu0 %v9438_v5 }
 0xa72   : > { %v11772_v30 = vsub.f32 %v11721_v52, %v3407_v60  ;;  %v3441_v50 = vsel %vm531_vm0, %v3425_v36, 0.0  ;;  %v3675_v60 = vld [vmem:[%s13167_s9 + $0x38] sm:$0xff]  ;;  %v3676_v36 = vld [vmem:[%s13167_s9 + $0x40] sm:$0xff] }
 0xa73   : > { %v11776_v25 = vsub.f32 %v11723_v48, %v3406_v44  ;;  %3442 = vadd.xlane.f32.xlu1 %v3441_v50  ;;  %v3438_v26 = vsel %vm531_vm0, %v3424_v45, 0.0  ;;  %v9446_v57 = vpack.c.bf16 %v3675_v60, %v3674_v31  ;;  %v3677_v44 = vld [vmem:[%s13167_s9 + $0x48] sm:$0xff]  ;;  %v3678_v50 = vld [vmem:[%s13167_s9 + $0x50] sm:$0xff] }
 0xa74   : > { %3439 = vadd.xlane.f32.xlu0 %v3438_v26  ;;  %v3427_v54 = vmul.f32 %v11772_v30, %v11772_v30  ;;  %9441 = vmatpush3.bf16.msra.mxu0 %v9438_v5  ;;  %v9450_v45 = vpack.c.bf16 %v3677_v44, %v3676_v36  ;;  %v3679_v26 = vld [vmem:[%s13167_s9 + $0x58] sm:$0xff] }
 0xa75   : > { %v3426_v9 = vmul.f32 %v11776_v25, %v11776_v25  ;;  %9443 = vmatprep.subr.bf16.mxu0 %v9442_v32 }
 0xa76   : > { %v3447_v7 = vsel %vm531_vm0, %v3427_v54, 0.0  ;;  %v9454_v54 = vpack.c.bf16 %v3679_v26, %v3678_v50 }
 0xa77   : > { %3448 = vadd.xlane.f32.xlu1 %v3447_v7  ;;  %v3444_v39 = vsel %vm531_vm0, %v3426_v9, 0.0  ;;  %v3680_v9 = vld [vmem:[%s13167_s9 + $0x60] sm:$0xff]  ;;  %v3681_v7 = vld [vmem:[%s13167_s9 + $0x68] sm:$0xff] }
 0xa78   : > { %3445 = vadd.xlane.f32.xlu0 %v3444_v39  ;;  %9445 = vmatpush3.bf16.msra.mxu0 %v9442_v32  ;;  %v9458_v39 = vpack.c.bf16 %v3681_v7, %v3680_v9 }
 0xa79   : > { %9447 = vmatprep.subr.bf16.mxu0 %v9446_v57 }
 0xa7c   : > { %9449 = vmatpush3.bf16.msra.mxu0 %v9446_v57 }
 0xa7d   : > { %9451 = vmatprep.subr.bf16.mxu0 %v9450_v45 }
 0xa80   : > { %9453 = vmatpush3.bf16.msra.mxu0 %v9450_v45 }
 0xa81   : > { %9455 = vmatprep.subr.bf16.mxu0 %v9454_v54 }
 0xa84   : > { %9457 = vmatpush3.bf16.msra.mxu0 %v9454_v54 }
 0xa85   : > { %9459 = vmatprep.subr.bf16.mxu0 %v9458_v39 }
 0xa88   : > { %9461 = vmatpush3.bf16.msra.mxu0 %v9458_v39 }
 0xa9e   : > { %v3395_v20 = vpop.xlane.xlu1 %3394 }
 0xa9f   : > { %v3409_v62 = vmul.f32 0.03125, %v3395_v20  ;;  %v3392_v38 = vpop.xlane.xlu0 %3391 }
 0xaa0   : > { %v3408_v43 = vmul.f32 0.03125, %v3392_v38 }
 0xaa1   : > { %v11798_v63 = vsub.f32 %v11731_v33, %v3409_v62 }
 0xaa2   : > { %v11801_v19 = vsub.f32 %v11734_v28, %v3408_v43  ;;  %v3401_v35 = vpop.xlane.xlu1 %3400 }
 0xaa3   : > { %v3411_v18 = vmul.f32 0.03125, %v3401_v35  ;;  %v3398_v17 = vpop.xlane.xlu0 %3397  ;;  %v3429_v61 = vmul.f32 %v11798_v63, %v11798_v63 }
 0xaa4   : > { %v3410_v10 = vmul.f32 0.03125, %v3398_v17  ;;  %v3428_v56 = vmul.f32 %v11801_v19, %v11801_v19 }
 0xaa5   : > { %v11808_v49 = vsub.f32 %v11741_v14, %v3411_v18  ;;  %v3453_v1 = vsel %vm531_vm0, %v3429_v61, 0.0 }
 0xaa6   : > { %v11812_v46 = vsub.f32 %v11743_v22, %v3410_v10  ;;  %3454 = vadd.xlane.f32.xlu1 %v3453_v1  ;;  %v3450_v4 = vsel %vm531_vm0, %v3428_v56, 0.0 }
 0xaa7   : > { %3451 = vadd.xlane.f32.xlu0 %v3450_v4  ;;  %v3431_v51 = vmul.f32 %v11808_v49, %v11808_v49 }
 0xaa8   : > { %v3430_v3 = vmul.f32 %v11812_v46, %v11812_v46 }
 0xaa9   : > { %v3459_v23 = vsel %vm531_vm0, %v3431_v51, 0.0 }
 0xaaa   : > { %3460 = vadd.xlane.f32.xlu1 %v3459_v23  ;;  %v3456_v59 = vsel %vm531_vm0, %v3430_v3, 0.0 }
 0xaab   : > { %3457 = vadd.xlane.f32.xlu0 %v3456_v59 }
 0xafc   : > { %v3437_v12 = vpop.xlane.xlu1 %3436 }
 0xafd   : > { %v3463_v8 = vmul.f32 0.03125, %v3437_v12  ;;  %v3434_v42 = vpop.xlane.xlu0 %3433 }
 0xafe   : > { %v3462_v41 = vmul.f32 0.03125, %v3434_v42 }
 0xaff   : > { %v3473_v6 = vadd.f32 1e-05, %v3463_v8 }
 0xb00   : > { %v3472_v21 = vadd.f32 1e-05, %v3462_v41  ;;  %v3443_v20 = vpop.xlane.xlu1 %3442 }
 0xb01   : > { %10393 = vrsqrt.f32 %v3473_v6  ;;  %v3465_v62 = vmul.f32 0.03125, %v3443_v20  ;;  %v3440_v38 = vpop.xlane.xlu0 %3439 }
 0xb02   : > { %10395 = vrsqrt.f32 %v3472_v21  ;;  %v3464_v43 = vmul.f32 0.03125, %v3440_v38 }
 0xb03   : > { %v3475_v35 = vadd.f32 1e-05, %v3465_v62 }
 0xb04   : > { %v3474_v18 = vadd.f32 1e-05, %v3464_v43  ;;  %v3449_v17 = vpop.xlane.xlu1 %3448 }
 0xb05   : > { %10397 = vrsqrt.f32 %v3475_v35  ;;  %v3467_v61 = vmul.f32 0.03125, %v3449_v17  ;;  %v3446_v10 = vpop.xlane.xlu0 %3445 }
 0xb06   : > { %10399 = vrsqrt.f32 %v3474_v18  ;;  %v3466_v56 = vmul.f32 0.03125, %v3446_v10 }
 0xb07   : > { %v3477_v1 = vadd.f32 1e-05, %v3467_v61 }
 0xb08   : > { %v3476_v4 = vadd.f32 1e-05, %v3466_v56 }
 0xb09   : > { %10401 = vrsqrt.f32 %v3477_v1 }
 0xb0a   : > { %10403 = vrsqrt.f32 %v3476_v4 }
 0xb0b   : > { %v10394_v51 = vpop.eup %10393 }
 0xb0c   : > { %v10396_v3 = vpop.eup %10395  ;;  %v3493_v59 = vmul.f32 %v10394_v51, %v11750_v13 }
 0xb0d   : > { %v3492_v23 = vmul.f32 %v10396_v3, %v11753_v27 }
 0xb0f   : > { %v10398_v40 = vpop.eup %10397  ;;  %8715 = vmatprep.mubr.msk.f32.mxu1 %vm531_vm0, %v3492_v23 }
 0xb10   : > { %v10400_v55 = vpop.eup %10399  ;;  %8716 = vmatmul.mubr.msk.f32.vlgmr.msra.gmra.mrb[40].mxu1 %vm531_vm0, %v3493_v59  ;;  %v3495_v29 = vmul.f32 %v10398_v40, %v11760_v2 }
 0xb11   : > { %v3494_v34 = vmul.f32 %v10400_v55, %v11764_v24 }
 0xb13   : > { %v10402_v37 = vpop.eup %10401  ;;  %8718 = vmatprep.mubr.msk.f32.mxu1 %vm531_vm0, %v3494_v34 }
 0xb14   : > { %v10404_v5 = vpop.eup %10403  ;;  %8719 = vmatmul.mubr.msk.f32.gmra.mrb[42].mxu1 %vm531_vm0, %v3495_v29  ;;  %v3497_v13 = vmul.f32 %v10402_v37, %v11772_v30 }
 0xb15   : > { %v3496_v27 = vmul.f32 %v10404_v5, %v11776_v25 }
 0xb17   : > { %8721 = vmatprep.mubr.msk.f32.mxu1 %vm531_vm0, %v3496_v27 }
 0xb18   : > { %8722 = vmatmul.mubr.msk.f32.gmra.mrb[44].mxu1 %vm531_vm0, %v3497_v13 }
 0xb33   : > { %v3455_v16 = vpop.xlane.xlu1 %3454 }
 0xb34   : > { %v3469_v11 = vmul.f32 0.03125, %v3455_v16  ;;  %v3452_v32 = vpop.xlane.xlu0 %3451 }
 0xb35   : > { %v3468_v24 = vmul.f32 0.03125, %v3452_v32  ;;  %v7595_v32 = vld [vmem:[%s13168_s10] ss:$0 sm:$0xff] }
 0xb36   : > { %v3479_v31 = vadd.f32 1e-05, %v3469_v11 }
 0xb37   : > { %v3478_v2 = vadd.f32 1e-05, %v3468_v24  ;;  %v3461_v60 = vpop.xlane.xlu1 %3460 }
 0xb38   : > { %10405 = vrsqrt.f32 %v3479_v31  ;;  %v3471_v57 = vmul.f32 0.03125, %v3461_v60  ;;  %v3458_v36 = vpop.xlane.xlu0 %3457 }
 0xb39   : > { %10407 = vrsqrt.f32 %v3478_v2  ;;  %v3470_v44 = vmul.f32 0.03125, %v3458_v36 }
 0xb3a   : > { %v3481_v45 = vadd.f32 1e-05, %v3471_v57 }
 0xb3b   : > { %v3480_v25 = vadd.f32 1e-05, %v3470_v44 }
 0xb3c   : > { %10409 = vrsqrt.f32 %v3481_v45 }
 0xb3d   : > { %10411 = vrsqrt.f32 %v3480_v25 }
 0xb42   : > { %v10406_v30 = vpop.eup %10405 }
 0xb43   : > { %v10408_v50 = vpop.eup %10407  ;;  %v3499_v54 = vmul.f32 %v10406_v30, %v11798_v63  ;;  %v3683_v63 = vld [vmem:[%s13167_s9 + $0x78] sm:$0xff] }
 0xb44   : > { %v3498_v26 = vmul.f32 %v10408_v50, %v11801_v19  ;;  %v3682_v19 = vld [vmem:[%s13167_s9 + $0x70] sm:$0xff] }
 0xb45   : > { %v9462_v8 = vpack.c.bf16 %v3683_v63, %v3682_v19 }
 0xb46   : > { %v10410_v9 = vpop.eup %10409  ;;  %8724 = vmatprep.mubr.msk.f32.mxu1 %vm531_vm0, %v3498_v26 }
 0xb47   : > { %v10412_v7 = vpop.eup %10411  ;;  %8725 = vmatmul.mubr.msk.f32.gmra.mrb[46].mxu1 %vm531_vm0, %v3499_v54  ;;  %v3501_v12 = vmul.f32 %v10410_v9, %v11808_v49  ;;  %9463 = vmatprep.subr.bf16.mxu0 %v9462_v8 }
 0xb48   : > { %v3500_v39 = vmul.f32 %v10412_v7, %v11812_v46  ;;  %9465 = vmatpush3.bf16.msra.mxu0 %v9462_v8  ;;  %v7584_v46 = vld [vmem:[%s13166_s8] ss:$0 sm:$0xff] }
 0xb4a   : > { %8727 = vmatprep.mubr.msk.f32.mxu1 %vm531_vm0, %v3500_v39 }
 0xb4b   : > { %8728 = vmatmul.mubr.msk.f32.gmra.mrb[48].mxu1 %vm531_vm0, %v3501_v12 }
 0xbe3   : > { %v8717_v49 = vpop.f32.mrb[40].mxu1 }
 0xbe4   : > { %v3615_v42 = vadd.f32 %v8717_v49, %v7584_v46  ;;  %v3609_v41 = vpop.f32.mrb[41].mxu1 }
 0xbe5   : > { %v3610_v6 = vadd.f32 %v7584_v46, %v3609_v41 }
 0xbe6   : > { %v3659_v62 = vmax.f32 %v3615_v42, 0.0 }
 0xbe7   : > { %v3658_v21 = vmax.f32 %v3610_v6, 0.0  ;;  %v8720_v20 = vpop.f32.mrb[42].mxu1 }
 0xbe8   : > { %v3625_v38 = vadd.f32 %v8720_v20, %v7584_v46  ;;  %v3619_v43 = vpop.f32.mrb[43].mxu1 }
 0xbe9   : > { %v3620_v35 = vadd.f32 %v7584_v46, %v3619_v43  ;;  %8762 = vmatprep.mubr.f32.mxu0 %v3658_v21 }
 0xbea   : > { %8763 = vmatmul.mubr.f32.vlgmr.msra.gmra.mrb[60].mxu0 %v3659_v62  ;;  %v3661_v61 = vmax.f32 %v3625_v38, 0.0 }
 0xbeb   : > { %v3660_v18 = vmax.f32 %v3620_v35, 0.0  ;;  %v8723_v17 = vpop.f32.mrb[44].mxu1 }
 0xbec   : > { %v3635_v10 = vadd.f32 %v8723_v17, %v7584_v46  ;;  %v3629_v56 = vpop.f32.mrb[45].mxu1 }
 0xbed   : > { %v3630_v1 = vadd.f32 %v7584_v46, %v3629_v56  ;;  %8765 = vmatprep.mubr.f32.mxu0 %v3660_v18 }
 0xbee   : > { %8766 = vmatmul.mubr.f32.gmra.mrb[62].mxu0 %v3661_v61  ;;  %v3663_v51 = vmax.f32 %v3635_v10, 0.0 }
 0xbef   : > { %v3662_v4 = vmax.f32 %v3630_v1, 0.0 }
 0xbf1   : > { %8768 = vmatprep.mubr.f32.mxu0 %v3662_v4 }
 0xbf2   : > { %8769 = vmatmul.mubr.f32.gmra.mrb[64].mxu0 %v3663_v51 }
 0xc1a   : > { %v8726_v3 = vpop.f32.mrb[46].mxu1 }
 0xc1b   : > { %v3645_v23 = vadd.f32 %v8726_v3, %v7584_v46  ;;  %v3639_v59 = vpop.f32.mrb[47].mxu1 }
 0xc1c   : > { %v3640_v40 = vadd.f32 %v7584_v46, %v3639_v59 }
 0xc1d   : > { %v3665_v29 = vmax.f32 %v3645_v23, 0.0 }
 0xc1e   : > { %v3664_v55 = vmax.f32 %v3640_v40, 0.0  ;;  %v8729_v34 = vpop.f32.mrb[48].mxu1 }
 0xc1f   : > { %v3655_v37 = vadd.f32 %v8729_v34, %v7584_v46  ;;  %v3649_v5 = vpop.f32.mrb[49].mxu1 }
 0xc20   : > { %v3650_v27 = vadd.f32 %v7584_v46, %v3649_v5  ;;  %8771 = vmatprep.mubr.f32.mxu0 %v3664_v55 }
 0xc21   : > { %8772 = vmatmul.mubr.f32.gmra.mrb[66].mxu0 %v3665_v29  ;;  %v3667_v16 = vmax.f32 %v3655_v37, 0.0 }
 0xc22   : > { %v3666_v13 = vmax.f32 %v3650_v27, 0.0 }
 0xc24   : > { %8774 = vmatprep.mubr.f32.mxu0 %v3666_v13 }
 0xc25   : > { %8775 = vmatmul.mubr.f32.gmra.mrb[68].mxu0 %v3667_v16 }
 0xcbd   : > { %v8764_v11 = vpop.f32.mrb[60].mxu0 }
 0xcbe   : > { %v3800_v24 = vadd.f32 %v11701_v0, %v8764_v11  ;;  %v3750_v31 = vpop.f32.mrb[61].mxu0 }
 0xcbf   : > { %v3799_v2 = vadd.f32 %v11704_v47, %v3750_v31 }
 0xcc0   : > { %v11897_v60 = vadd.f32 %v7595_v32, %v3800_v24 }
 0xcc1   : > { %v11899_v57 = vadd.f32 %v7595_v32, %v3799_v2  ;;  %v8767_v36 = vpop.f32.mrb[62].mxu0 }
 0xcc2   : > { %v3802_v44 = vadd.f32 %v11711_v53, %v8767_v36  ;;  %v3760_v45 = vpop.f32.mrb[63].mxu0  ;;  %v3829_v25 = vsel %vm531_vm0, %v11897_v60, 0.0 }
 0xcc3   : > { %v3801_v30 = vadd.f32 %v11714_v58, %v3760_v45  ;;  %3830 = vadd.xlane.f32.xlu1 %v3829_v25  ;;  %v3826_v0 = vsel %vm531_vm0, %v11899_v57, 0.0  ;;  %v7596_v25 = vld [vmem:[%s13161_s3 + $0x20] sm:$0xff] }
 0xcc4   : > { %v11907_v50 = vadd.f32 %v7595_v32, %v3802_v44  ;;  %3827 = vadd.xlane.f32.xlu0 %v3826_v0 }
 0xcc5   : > { %v11909_v47 = vadd.f32 %v7595_v32, %v3801_v30  ;;  %v8770_v26 = vpop.f32.mrb[64].mxu0  ;;  %v7597_v30 = vld [vmem:[%s13161_s3 + $0x28] sm:$0xff] }
 0xcc6   : > { %v3804_v54 = vadd.f32 %v11721_v52, %v8770_v26  ;;  %v3770_v9 = vpop.f32.mrb[65].mxu0  ;;  %v3835_v53 = vsel %vm531_vm0, %v11907_v50, 0.0  ;;  %v9466_v0 = vpack.c.bf16 %v7597_v30, %v7596_v25  ;;  %v7598_v26 = vld [vmem:[%s13161_s3 + $0x30] sm:$0xff] }
 0xcc7   : > { %v3803_v7 = vadd.f32 %v11723_v48, %v3770_v9  ;;  %3836 = vadd.xlane.f32.xlu1 %v3835_v53  ;;  %v3832_v58 = vsel %vm531_vm0, %v11909_v47, 0.0 }
 0xcc8   : > { %v11917_v39 = vadd.f32 %v7595_v32, %v3804_v54  ;;  %3833 = vadd.xlane.f32.xlu0 %v3832_v58  ;;  %9467 = vmatprep.subr.bf16.mxu1 %v9466_v0  ;;  %v7599_v54 = vld [vmem:[%s13161_s3 + $0x38] sm:$0xff] }
 0xcc9   : > { %v11919_v12 = vadd.f32 %v7595_v32, %v3803_v7  ;;  %9469 = vmatpush3.bf16.msra.mxu1 %v9466_v0  ;;  %v9470_v9 = vpack.c.bf16 %v7599_v54, %v7598_v26 }
 0xcca   : > { %13207 = vst [vmem:[#allocation3_spill] sm:$0xff] %v11917_v39  ;;  %v3841_v19 = vsel %vm531_vm0, %v11917_v39, 0.0 }
 0xccb   : > { %3842 = vadd.xlane.f32.xlu1 %v3841_v19  ;;  %v3838_v52 = vsel %vm531_vm0, %v11919_v12, 0.0  ;;  %9471 = vmatprep.subr.bf16.mxu1 %v9470_v9 }
 0xccc   : > { %3839 = vadd.xlane.f32.xlu0 %v3838_v52 }
 0xccd   : > { %9473 = vmatpush3.bf16.msra.mxu1 %v9470_v9 }
 0xcf4   : > { %v8773_v63 = vpop.f32.mrb[66].mxu0 }
 0xcf5   : > { %v3806_v48 = vadd.f32 %v11731_v33, %v8773_v63  ;;  %v3780_v8 = vpop.f32.mrb[67].mxu0 }
 0xcf6   : > { %v3805_v46 = vadd.f32 %v11734_v28, %v3780_v8 }
 0xcf7   : > { %v11927_v49 = vadd.f32 %v7595_v32, %v3806_v48 }
 0xcf8   : > { %v11929_v42 = vadd.f32 %v7595_v32, %v3805_v46  ;;  %v8776_v41 = vpop.f32.mrb[68].mxu0 }
 0xcf9   : > { %13208 = vst [vmem:[#allocation2_spill] sm:$0xff] %v11927_v49  ;;  %v3808_v6 = vadd.f32 %v11741_v14, %v8776_v41  ;;  %v3790_v21 = vpop.f32.mrb[69].mxu0  ;;  %v3847_v20 = vsel %vm531_vm0, %v11927_v49, 0.0 }
 0xcfa   : > { %v3807_v62 = vadd.f32 %v11743_v22, %v3790_v21  ;;  %3848 = vadd.xlane.f32.xlu1 %v3847_v20  ;;  %v3844_v33 = vsel %vm531_vm0, %v11929_v42, 0.0 }
 0xcfb   : > { %v11937_v38 = vadd.f32 %v7595_v32, %v3808_v6  ;;  %3845 = vadd.xlane.f32.xlu0 %v3844_v33 }
 0xcfc   : > { %v11939_v28 = vadd.f32 %v7595_v32, %v3807_v62 }
 0xcfd   : > { %13209 = vst [vmem:[#allocation5_spill] sm:$0xff] %v11937_v38  ;;  %v3853_v43 = vsel %vm531_vm0, %v11937_v38, 0.0 }
 0xcfe   : > { %13210 = vst [vmem:[#allocation4_spill] sm:$0xff] %v11939_v28  ;;  %3854 = vadd.xlane.f32.xlu1 %v3853_v43  ;;  %v3850_v14 = vsel %vm531_vm0, %v11939_v28, 0.0 }
 0xcff   : > { %3851 = vadd.xlane.f32.xlu0 %v3850_v14 }
 0xd50   : > { %v3831_v35 = vpop.xlane.xlu1 %3830 }
 0xd51   : > { %v3857_v18 = vmul.f32 0.03125, %v3831_v35  ;;  %v3828_v22 = vpop.xlane.xlu0 %3827 }
 0xd52   : > { %v3856_v17 = vmul.f32 0.03125, %v3828_v22 }
 0xd53   : > { %v11946_v61 = vsub.f32 %v11897_v60, %v3857_v18 }
 0xd54   : > { %v11949_v10 = vsub.f32 %v11899_v57, %v3856_v17  ;;  %v3837_v56 = vpop.xlane.xlu1 %3836 }
 0xd55   : > { %v3859_v1 = vmul.f32 0.03125, %v3837_v56  ;;  %v3834_v4 = vpop.xlane.xlu0 %3833  ;;  %v3877_v51 = vmul.f32 %v11946_v61, %v11946_v61 }
 0xd56   : > { %v3858_v3 = vmul.f32 0.03125, %v3834_v4  ;;  %v3876_v23 = vmul.f32 %v11949_v10, %v11949_v10 }
 0xd57   : > { %v11956_v59 = vsub.f32 %v11907_v50, %v3859_v1  ;;  %v3889_v40 = vsel %vm531_vm0, %v3877_v51, 0.0 }
 0xd58   : > { %v11960_v55 = vsub.f32 %v11909_v47, %v3858_v3  ;;  %v3843_v34 = vpop.xlane.xlu1 %3842  ;;  %3890 = vadd.xlane.f32.xlu1 %v3889_v40  ;;  %v3886_v29 = vsel %vm531_vm0, %v3876_v23, 0.0 }
 0xd59   : > { %v3861_v37 = vmul.f32 0.03125, %v3843_v34  ;;  %3887 = vadd.xlane.f32.xlu0 %v3886_v29  ;;  %v3840_v5 = vpop.xlane.xlu0 %3839  ;;  %v3879_v27 = vmul.f32 %v11956_v59, %v11956_v59 }
 0xd5a   : > { %v3860_v13 = vmul.f32 0.03125, %v3840_v5  ;;  %v3878_v16 = vmul.f32 %v11960_v55, %v11960_v55 }
 0xd5b   : > { %v11968_v11 = vsub.f32 %v11917_v39, %v3861_v37  ;;  %v3895_v32 = vsel %vm531_vm0, %v3879_v27, 0.0 }
 0xd5c   : > { %v11972_v24 = vsub.f32 %v11919_v12, %v3860_v13  ;;  %3896 = vadd.xlane.f32.xlu1 %v3895_v32  ;;  %v3892_v31 = vsel %vm531_vm0, %v3878_v16, 0.0 }
 0xd5d   : > { %3893 = vadd.xlane.f32.xlu0 %v3892_v31  ;;  %v3881_v2 = vmul.f32 %v11968_v11, %v11968_v11 }
 0xd5e   : > { %v3880_v36 = vmul.f32 %v11972_v24, %v11972_v24 }
 0xd5f   : > { %v3901_v44 = vsel %vm531_vm0, %v3881_v2, 0.0 }
 0xd60   : > { %3902 = vadd.xlane.f32.xlu1 %v3901_v44  ;;  %v3898_v45 = vsel %vm531_vm0, %v3880_v36, 0.0 }
 0xd61   : > { %3899 = vadd.xlane.f32.xlu0 %v3898_v45 }
 0xd87   : > { %v3849_v53 = vpop.xlane.xlu1 %3848 }
 0xd88   : > { %v3863_v7 = vmul.f32 0.03125, %v3849_v53  ;;  %v3846_v58 = vpop.xlane.xlu0 %3845 }
 0xd89   : > { %v3862_v19 = vmul.f32 0.03125, %v3846_v58 }
 0xd8a   : > { %v11994_v52 = vsub.f32 %v11927_v49, %v3863_v7 }
 0xd8b   : > { %v11997_v63 = vsub.f32 %v11929_v42, %v3862_v19  ;;  %v3855_v48 = vpop.xlane.xlu1 %3854 }
 0xd8c   : > { %v3865_v8 = vmul.f32 0.03125, %v3855_v48  ;;  %v3852_v46 = vpop.xlane.xlu0 %3851  ;;  %v3883_v41 = vmul.f32 %v11994_v52, %v11994_v52 }
 0xd8d   : > { %v3864_v6 = vmul.f32 0.03125, %v3852_v46  ;;  %v3882_v21 = vmul.f32 %v11997_v63, %v11997_v63 }
 0xd8e   : > { %v12004_v20 = vsub.f32 %v11937_v38, %v3865_v8  ;;  %v3907_v62 = vsel %vm531_vm0, %v3883_v41, 0.0 }
 0xd8f   : > { %v12008_v33 = vsub.f32 %v11939_v28, %v3864_v6  ;;  %3908 = vadd.xlane.f32.xlu1 %v3907_v62  ;;  %v3904_v43 = vsel %vm531_vm0, %v3882_v21, 0.0 }
 0xd90   : > { %3905 = vadd.xlane.f32.xlu0 %v3904_v43  ;;  %v3885_v14 = vmul.f32 %v12004_v20, %v12004_v20 }
 0xd91   : > { %v3884_v35 = vmul.f32 %v12008_v33, %v12008_v33 }
 0xd92   : > { %v3913_v18 = vsel %vm531_vm0, %v3885_v14, 0.0 }
 0xd93   : > { %3914 = vadd.xlane.f32.xlu1 %v3913_v18  ;;  %v3910_v22 = vsel %vm531_vm0, %v3884_v35, 0.0 }
 0xd94   : > { %3911 = vadd.xlane.f32.xlu0 %v3910_v22 }
 0xde5   : > { %v3891_v17 = vpop.xlane.xlu1 %3890 }
 0xde6   : > { %v3917_v56 = vmul.f32 0.03125, %v3891_v17  ;;  %v3888_v1 = vpop.xlane.xlu0 %3887 }
 0xde7   : > { %v3916_v4 = vmul.f32 0.03125, %v3888_v1 }
 0xde8   : > { %v3927_v51 = vadd.f32 1e-05, %v3917_v56 }
 0xde9   : > { %v3926_v3 = vadd.f32 1e-05, %v3916_v4  ;;  %v3897_v23 = vpop.xlane.xlu1 %3896 }
 0xdea   : > { %10413 = vrsqrt.f32 %v3927_v51  ;;  %v3919_v40 = vmul.f32 0.03125, %v3897_v23  ;;  %v3894_v34 = vpop.xlane.xlu0 %3893 }
 0xdeb   : > { %10415 = vrsqrt.f32 %v3926_v3  ;;  %v3918_v29 = vmul.f32 0.03125, %v3894_v34 }
 0xdec   : > { %v3929_v37 = vadd.f32 1e-05, %v3919_v40 }
 0xded   : > { %v3928_v5 = vadd.f32 1e-05, %v3918_v29  ;;  %v3903_v27 = vpop.xlane.xlu1 %3902 }
 0xdee   : > { %10417 = vrsqrt.f32 %v3929_v37  ;;  %v3921_v13 = vmul.f32 0.03125, %v3903_v27  ;;  %v3900_v16 = vpop.xlane.xlu0 %3899 }
 0xdef   : > { %10419 = vrsqrt.f32 %v3928_v5  ;;  %v3920_v32 = vmul.f32 0.03125, %v3900_v16 }
 0xdf0   : > { %v3931_v31 = vadd.f32 1e-05, %v3921_v13 }
 0xdf1   : > { %v3930_v2 = vadd.f32 1e-05, %v3920_v32 }
 0xdf2   : > { %10421 = vrsqrt.f32 %v3931_v31 }
 0xdf3   : > { %10423 = vrsqrt.f32 %v3930_v2 }
 0xdf4   : > { %v10414_v36 = vpop.eup %10413 }
 0xdf5   : > { %v10416_v44 = vpop.eup %10415  ;;  %v3947_v25 = vmul.f32 %v10414_v36, %v11946_v61 }
 0xdf6   : > { %v3946_v45 = vmul.f32 %v10416_v44, %v11949_v10 }
 0xdf8   : > { %v10418_v30 = vpop.eup %10417  ;;  %8785 = vmatprep.mubr.msk.f32.mxu1 %vm531_vm0, %v3946_v45 }
 0xdf9   : > { %v10420_v0 = vpop.eup %10419  ;;  %8786 = vmatmul.mubr.msk.f32.vlgmr.msra.gmra.mrb[50].mxu1 %vm531_vm0, %v3947_v25  ;;  %v3949_v54 = vmul.f32 %v10418_v30, %v11956_v59 }
 0xdfa   : > { %v3948_v26 = vmul.f32 %v10420_v0, %v11960_v55 }
 0xdfc   : > { %v10422_v9 = vpop.eup %10421  ;;  %8788 = vmatprep.mubr.msk.f32.mxu1 %vm531_vm0, %v3948_v26 }
 0xdfd   : > { %v10424_v53 = vpop.eup %10423  ;;  %8789 = vmatmul.mubr.msk.f32.gmra.mrb[52].mxu1 %vm531_vm0, %v3949_v54  ;;  %v3951_v61 = vmul.f32 %v10422_v9, %v11968_v11 }
 0xdfe   : > { %v3950_v10 = vmul.f32 %v10424_v53, %v11972_v24 }
 0xe00   : > { %8791 = vmatprep.mubr.msk.f32.mxu1 %vm531_vm0, %v3950_v10 }
 0xe01   : > { %8792 = vmatmul.mubr.msk.f32.gmra.mrb[54].mxu1 %vm531_vm0, %v3951_v61 }
 0xe1c   : > { %v3909_v7 = vpop.xlane.xlu1 %3908 }
 0xe1d   : > { %v3923_v58 = vmul.f32 0.03125, %v3909_v7  ;;  %v3906_v19 = vpop.xlane.xlu0 %3905 }
 0xe1e   : > { %v3922_v55 = vmul.f32 0.03125, %v3906_v19 }
 0xe1f   : > { %v3933_v48 = vadd.f32 1e-05, %v3923_v58 }
 0xe20   : > { %v3932_v59 = vadd.f32 1e-05, %v3922_v55  ;;  %v3915_v8 = vpop.xlane.xlu1 %3914 }
 0xe21   : > { %10425 = vrsqrt.f32 %v3933_v48  ;;  %v3925_v46 = vmul.f32 0.03125, %v3915_v8  ;;  %v3912_v41 = vpop.xlane.xlu0 %3911 }
 0xe22   : > { %10427 = vrsqrt.f32 %v3932_v59  ;;  %v3924_v6 = vmul.f32 0.03125, %v3912_v41 }
 0xe23   : > { %v3935_v21 = vadd.f32 1e-05, %v3925_v46 }
 0xe24   : > { %v3934_v24 = vadd.f32 1e-05, %v3924_v6 }
 0xe25   : > { %10429 = vrsqrt.f32 %v3935_v21 }
 0xe26   : > { %10431 = vrsqrt.f32 %v3934_v24 }
 0xe2b   : > { %v10426_v11 = vpop.eup %10425 }
 0xe2c   : > { %v10428_v62 = vpop.eup %10427  ;;  %v3953_v14 = vmul.f32 %v10426_v11, %v11994_v52 }
 0xe2d   : > { %v3952_v43 = vmul.f32 %v10428_v62, %v11997_v63  ;;  %v7601_v63 = vld [vmem:[%s13162_s4 + $0x1] ss:$0 sm:$0xff] }
 0xe2f   : > { %v10430_v35 = vpop.eup %10429  ;;  %8794 = vmatprep.mubr.msk.f32.mxu1 %vm531_vm0, %v3952_v43 }
 0xe30   : > { %v10432_v18 = vpop.eup %10431  ;;  %8795 = vmatmul.mubr.msk.f32.gmra.mrb[56].mxu1 %vm531_vm0, %v3953_v14  ;;  %v3955_v17 = vmul.f32 %v10430_v35, %v12004_v20 }
 0xe31   : > { %v3954_v22 = vmul.f32 %v10432_v18, %v12008_v33 }
 0xe33   : > { %8797 = vmatprep.mubr.msk.f32.mxu1 %vm531_vm0, %v3954_v22 }
 0xe34   : > { %8798 = vmatmul.mubr.msk.f32.gmra.mrb[58].mxu1 %vm531_vm0, %v3955_v17 }
 0xecc   : > { %v8787_v56 = vpop.f32.mrb[50].mxu1 }
 0xecd   : > { %v12040_v52 = vadd.f32 %v8787_v56, %v7601_v63  ;;  %v4065_v1 = vpop.f32.mrb[51].mxu1 }
 0xece   : > { %v12042_v4 = vadd.f32 %v7601_v63, %v4065_v1 }
 0xed0   : > { %v8790_v51 = vpop.f32.mrb[52].mxu1  ;;  %8820 = vmatprep.mubr.msk.f32.mxu0 %vm870_vm1, %v12042_v4  ;;  %v12048_v20 = vpack.i.bf16 %v12040_v52, %v12042_v4 }
 0xed1   : > { %v12050_v33 = vadd.f32 %v8790_v51, %v7601_v63  ;;  %v4075_v3 = vpop.f32.mrb[53].mxu1 }
 0xed2   : > { %v12052_v23 = vadd.f32 %v7601_v63, %v4075_v3  ;;  %10014 = vrot.lane.b32.xlu0 %v12048_v20, %s10641_s28 }
 0xed4   : > { %v8793_v40 = vpop.f32.mrb[54].mxu1  ;;  %v12058_v34 = vpack.i.bf16 %v12050_v33, %v12052_v23 }
 0xed5   : > { %v12060_v29 = vadd.f32 %v8793_v40, %v7601_v63  ;;  %v4085_v37 = vpop.f32.mrb[55].mxu1 }
 0xed6   : > { %v12062_v5 = vadd.f32 %v7601_v63, %v4085_v37  ;;  %10019 = vrot.lane.b32.xlu1 %v12058_v34, %s10641_s28 }
 0xed8   : > { %v12068_v27 = vpack.i.bf16 %v12060_v29, %v12062_v5 }
 0xeda   : > { %10024 = vrot.lane.b32.xlu1 %v12068_v27, %s10641_s28 }
 0xf03   : > { %v8796_v13 = vpop.f32.mrb[56].mxu1 }
 0xf04   : > { %v12072_v16 = vadd.f32 %v8796_v13, %v7601_v63  ;;  %v4095_v32 = vpop.f32.mrb[57].mxu1 }
 0xf05   : > { %v12074_v31 = vadd.f32 %v7601_v63, %v4095_v32 }
 0xf07   : > { %v8799_v2 = vpop.f32.mrb[58].mxu1  ;;  %v12078_v36 = vpack.i.bf16 %v12072_v16, %v12074_v31 }
 0xf08   : > { %v12080_v44 = vadd.f32 %v8799_v2, %v7601_v63  ;;  %v4105_v45 = vpop.f32.mrb[59].mxu1 }
 0xf09   : > { %v12082_v25 = vadd.f32 %v7601_v63, %v4105_v45  ;;  %10029 = vrot.lane.b32.xlu1 %v12078_v36, %s10641_s28 }
 0xf0b   : > { %v12088_v30 = vpack.i.bf16 %v12080_v44, %v12082_v25 }
 0xf0d   : > { %10039 = vrot.lane.b32.xlu1 %v12048_v20, %s10642_s16  ;;  %10034 = vrot.lane.b32.xlu0 %v12088_v30, %s10641_s28  ;;  %s13211_s28 = smov 80  }
 0xf11   : > { %10049 = vrot.lane.b32.xlu1 %v12068_v27, %s10642_s16  ;;  %10044 = vrot.lane.b32.xlu0 %v12058_v34, %s10642_s16 }
 0xf15   : > { %4764 = vrot.lane.b32.xlu1 %v12040_v52, %s10643_s17  ;;  %10054 = vrot.lane.b32.xlu0 %v12078_v36, %s10642_s16 }
 0xf19   : > { %4768 = vrot.lane.b32.xlu1 %v12050_v33, %s10643_s17  ;;  %4762 = vrot.lane.b32.xlu0 %v12042_v4, %s10643_s17 }
 0xf1d   : > { %10059 = vrot.lane.b32.xlu1 %v12088_v30, %s10642_s16  ;;  %4766 = vrot.lane.b32.xlu0 %v12052_v23, %s10643_s17  ;;  %s13212_s16 = smov 112  }
 0xf21   : > { %4772 = vrot.lane.b32.xlu1 %v12060_v29, %s10643_s17  ;;  %4770 = vrot.lane.b32.xlu0 %v12062_v5, %s10643_s17 }
 0xf25   : > { %4776 = vrot.lane.b32.xlu1 %v12072_v16, %s10643_s17  ;;  %4774 = vrot.lane.b32.xlu0 %v12074_v31, %s10643_s17 }
 0xf29   : > { %4780 = vrot.lane.b32.xlu1 %v12080_v44, %s10643_s17  ;;  %4778 = vrot.lane.b32.xlu0 %v12082_v25, %s10643_s17  ;;  %s13213_s17 = smov 56  }
 0xf44   : > { %v10015_v0 = vpop.permute.xlu0 %10014 }
 0xf45   : > { %v10017_v26 = vunpack.i.h.bf16 %v10015_v0  ;;  %v10016_v54 = vunpack.i.l.bf16 %v10015_v0 }
 0xf47   : > { %v9474_v9 = vpack.c.bf16 %v10017_v26, %v10016_v54 }
 0xf48   : > { %v10020_v53 = vpop.permute.xlu1 %10019 }
 0xf49   : > { %v10022_v10 = vunpack.i.h.bf16 %v10020_v53  ;;  %v10021_v61 = vunpack.i.l.bf16 %v10020_v53  ;;  %9476 = vmatprep.subr.msk.bf16.mxu0 %vm10998_vm2, %v9474_v9 }
 0xf4a   : > { %9479 = vmatpush3.bf16.xpose.msk.msra.mxu0 %vm10998_vm2, %v9474_v9 }
 0xf4b   : > { %v9480_v7 = vpack.c.bf16 %v10022_v10, %v10021_v61 }
 0xf4c   : > { %v10025_v58 = vpop.permute.xlu1 %10024 }
 0xf4d   : > { %v10027_v19 = vunpack.i.h.bf16 %v10025_v58  ;;  %v10026_v55 = vunpack.i.l.bf16 %v10025_v58  ;;  %9482 = vmatprep.subr.msk.bf16.mxu0 %vm10998_vm2, %v9480_v7 }
 0xf4f   : > { %v9486_v48 = vpack.c.bf16 %v10027_v19, %v10026_v55 }
 0xf52   : > { %9485 = vmatpush3.bf16.xpose.msk.msra.mxu0 %vm10998_vm2, %v9480_v7 }
 0xf53   : > { %9488 = vmatprep.subr.msk.bf16.mxu0 %vm10998_vm2, %v9486_v48 }
 0xf5a   : > { %9491 = vmatpush3.bf16.xpose.msk.msra.mxu0 %vm10998_vm2, %v9486_v48 }
 0xf7b   : > { %v10030_v59 = vpop.permute.xlu1 %10029 }
 0xf7c   : > { %v10032_v8 = vunpack.i.h.bf16 %v10030_v59  ;;  %v10031_v46 = vunpack.i.l.bf16 %v10030_v59 }
 0xf7e   : > { %v9492_v41 = vpack.c.bf16 %v10032_v8, %v10031_v46 }
 0xf7f   : > { %v10035_v6 = vpop.permute.xlu0 %10034  ;;  %v10040_v11 = vpop.permute.xlu1 %10039 }
 0xf80   : > { %v10037_v21 = vunpack.i.h.bf16 %v10035_v6  ;;  %v10036_v24 = vunpack.i.l.bf16 %v10035_v6  ;;  %9494 = vmatprep.subr.msk.bf16.mxu0 %vm10998_vm2, %v9492_v41  ;;  %v10042_v43 = vunpack.i.h.bf16 %v10040_v11  ;;  %v10041_v14 = vunpack.i.l.bf16 %v10040_v11 }
 0xf81   : > { %9497 = vmatpush3.bf16.xpose.msk.msra.mxu0 %vm10998_vm2, %v9492_v41 }
 0xf82   : > { %v9498_v62 = vpack.c.bf16 %v10037_v21, %v10036_v24  ;;  %v9524_v35 = vpack.c.bf16 %v10042_v43, %v10041_v14 }
 0xf83   : > { %v10045_v18 = vpop.permute.xlu0 %10044  ;;  %v10050_v63 = vpop.permute.xlu1 %10049 }
 0xf84   : > { %9500 = vmatprep.subr.msk.bf16.mxu0 %vm10998_vm2, %v9498_v62  ;;  %v10047_v22 = vunpack.i.h.bf16 %v10045_v18  ;;  %v10046_v17 = vunpack.i.l.bf16 %v10045_v18  ;;  %v10052_v1 = vunpack.i.h.bf16 %v10050_v63  ;;  %v10051_v51 = vunpack.i.l.bf16 %v10050_v63 }
 0xf86   : > { %v9530_v56 = vpack.c.bf16 %v10047_v22, %v10046_v17  ;;  %v9536_v40 = vpack.c.bf16 %v10052_v1, %v10051_v51 }
 0xf87   : > { %v4765_v3 = vpop.permute.xlu1 %4764  ;;  %v10055_v37 = vpop.permute.xlu0 %10054 }
 0xf88   : > { %v10057_v32 = vunpack.i.h.bf16 %v10055_v37  ;;  %v10056_v2 = vunpack.i.l.bf16 %v10055_v37 }
 0xf89   : > { %9503 = vmatpush3.bf16.xpose.msk.msra.mxu0 %vm10998_vm2, %v9498_v62 }
 0xf8a   : > { %9526 = vmatprep.subr.msk.bf16.mxu0 %vm10998_vm2, %v9524_v35  ;;  %v9542_v45 = vpack.c.bf16 %v10057_v32, %v10056_v2 }
 0xf8b   : > { %v4769_v13 = vpop.permute.xlu1 %4768  ;;  %v4763_v0 = vpop.permute.xlu0 %4762 }
 0xf8f   : > { %v10060_v26 = vpop.permute.xlu1 %10059  ;;  %v4767_v10 = vpop.permute.xlu0 %4766 }
 0xf90   : > { %8821 = vmatmul.mubr.msk.f32.vlgmr.msra.gmra.mrb[70].mxu0 %vm870_vm1, %v12040_v52  ;;  %v10062_v54 = vunpack.i.h.bf16 %v10060_v26  ;;  %v10061_v9 = vunpack.i.l.bf16 %v10060_v26 }
 0xf91   : > { %8823 = vmatprep.mubr.msk.f32.mxu0 %vm870_vm1, %v12052_v23  ;;  %9529 = vmatpush3.bf16.xpose.msk.msra.mxu0 %vm10998_vm2, %v9524_v35 }
 0xf92   : > { %9532 = vmatprep.subr.msk.bf16.mxu0 %vm10998_vm2, %v9530_v56  ;;  %v9548_v53 = vpack.c.bf16 %v10062_v54, %v10061_v9 }
 0xf93   : > { %v4771_v61 = vpop.permute.xlu0 %4770  ;;  %v4773_v7 = vpop.permute.xlu1 %4772 }
 0xf94   : > { %8824 = vmatmul.mubr.msk.f32.gmra.mrb[72].mxu0 %vm870_vm1, %v12050_v33 }
 0xf95   : > { %8826 = vmatprep.mubr.msk.f32.mxu0 %vm870_vm1, %v12062_v5 }
 0xf97   : > { %v4775_v58 = vpop.permute.xlu0 %4774  ;;  %v4777_v19 = vpop.permute.xlu1 %4776 }
 0xf98   : > { %8827 = vmatmul.mubr.msk.f32.gmra.mrb[74].mxu0 %vm870_vm1, %v12060_v29 }
 0xf99   : > { %8829 = vmatprep.mubr.msk.f32.mxu0 %vm870_vm1, %v12074_v31  ;;  %9535 = vmatpush3.bf16.xpose.msk.msra.mxu0 %vm10998_vm2, %v9530_v56 }
 0xf9a   : > { %9538 = vmatprep.subr.msk.bf16.mxu0 %vm10998_vm2, %v9536_v40 }
 0xf9b   : > { %v4779_v55 = vpop.permute.xlu0 %4778  ;;  %v4781_v48 = vpop.permute.xlu1 %4780 }
 0xf9c   : > { %8830 = vmatmul.mubr.msk.f32.gmra.mrb[76].mxu0 %vm870_vm1, %v12072_v16 }
 0xf9d   : > { %8832 = vmatprep.mubr.msk.f32.mxu0 %vm870_vm1, %v12082_v25 }
 0xfa0   : > { %8833 = vmatmul.mubr.msk.f32.gmra.mrb[78].mxu0 %vm870_vm1, %v12080_v44 }
 0xfa1   : > { %9541 = vmatpush3.bf16.xpose.msk.msra.mxu0 %vm10998_vm2, %v9536_v40  ;;  %8907 = vmatprep.mubr.msk.f32.mxu0 %vm870_vm1, %v4763_v0 }
 0xfa2   : > { %9544 = vmatprep.subr.msk.bf16.mxu0 %vm10998_vm2, %v9542_v45 }
 0xfa9   : > { %9547 = vmatpush3.bf16.xpose.msk.msra.mxu0 %vm10998_vm2, %v9542_v45 }
 0xfaa   : > { %9550 = vmatprep.subr.msk.bf16.mxu0 %vm10998_vm2, %v9548_v53 }
 0xfb1   : > { %9553 = vmatpush3.bf16.xpose.msk.msra.mxu0 %vm10998_vm2, %v9548_v53 }
 0xfb8   : > { %8908 = vmatmul.mubr.msk.f32.vlgmr.msra.gmra.mrb[80].mxu0 %vm870_vm1, %v4765_v3 }
 0xfb9   : > { %8910 = vmatprep.mubr.msk.f32.mxu0 %vm870_vm1, %v4767_v10 }
 0xfbc   : > { %8911 = vmatmul.mubr.msk.f32.gmra.mrb[82].mxu0 %vm870_vm1, %v4769_v13 }
 0xfbd   : > { %8913 = vmatprep.mubr.msk.f32.mxu0 %vm870_vm1, %v4771_v61 }
 0xfc0   : > { %8914 = vmatmul.mubr.msk.f32.gmra.mrb[84].mxu0 %vm870_vm1, %v4773_v7 }
 0xfc1   : > { %8916 = vmatprep.mubr.msk.f32.mxu0 %vm870_vm1, %v4775_v58 }
 0xfc4   : > { %8917 = vmatmul.mubr.msk.f32.gmra.mrb[86].mxu0 %vm870_vm1, %v4777_v19 }
 0xfc5   : > { %8919 = vmatprep.mubr.msk.f32.mxu0 %vm870_vm1, %v4779_v55 }
 0xfc8   : > { %8920 = vmatmul.mubr.msk.f32.gmra.mrb[88].mxu0 %vm870_vm1, %v4781_v48 }
0x1063   : > { %v8822_v59 = vpop.f32.mrb[70].mxu0 }
0x1064   : > { %v4273_v8 = vpop.f32.mrb[71].mxu0  ;;  %v4325_v46 = vsel %vm1026_vm3, %v8822_v59, -inf }
0x1065   : > { %4326 = vmax.xlane.f32.xlu1 %v4325_v46  ;;  %v4322_v41 = vsel %vm1026_vm3, %v4273_v8, -inf }
0x1066   : > { %4323 = vmax.xlane.f32.xlu0 %v4322_v41 }
0x1067   : > { %v8825_v6 = vpop.f32.mrb[72].mxu0 }
0x1068   : > { %v4283_v21 = vpop.f32.mrb[73].mxu0  ;;  %v4331_v24 = vsel %vm1026_vm3, %v8825_v6, -inf }
0x1069   : > { %v4328_v14 = vsel %vm1026_vm3, %v4283_v21, -inf }
0x106a   : > { %4332 = vmax.xlane.f32.xlu0 %v4331_v24 }
0x106b   : > { %v8828_v11 = vpop.f32.mrb[74].mxu0 }
0x106c   : > { %v4293_v62 = vpop.f32.mrb[75].mxu0  ;;  %v4337_v43 = vsel %vm1026_vm3, %v8828_v11, -inf }
0x106d   : > { %4338 = vmax.xlane.f32.xlu1 %v4337_v43  ;;  %v4334_v17 = vsel %vm1026_vm3, %v4293_v62, -inf }
0x106e   : > { %4329 = vmax.xlane.f32.xlu0 %v4328_v14 }
0x106f   : > { %v8831_v35 = vpop.f32.mrb[76].mxu0 }
0x1070   : > { %v12195_v18 = vpop.f32.mrb[77].mxu0  ;;  %v4343_v22 = vsel %vm1026_vm3, %v8831_v35, -inf }
0x1071   : > { %4344 = vmax.xlane.f32.xlu1 %v4343_v22  ;;  %v4340_v51 = vsel %vm1026_vm3, %v12195_v18, -inf }
0x1072   : > { %4335 = vmax.xlane.f32.xlu0 %v4334_v17 }
0x1073   : > { %v8834_v63 = vpop.f32.mrb[78].mxu0 }
0x1074   : > { %v12199_v56 = vpop.f32.mrb[79].mxu0  ;;  %v4349_v1 = vsel %vm1026_vm3, %v8834_v63, -inf }
0x1075   : > { %4350 = vmax.xlane.f32.xlu1 %v4349_v1  ;;  %v4346_v3 = vsel %vm1026_vm3, %v12199_v56, -inf }
0x1076   : > { %4341 = vmax.xlane.f32.xlu0 %v4340_v51 }
0x107a   : > { %4347 = vmax.xlane.f32.xlu0 %v4346_v3 }
0x1086   : > { %10069 = vrot.lane.b32.xlu1 %v12058_v34, %s10644_s19 }
0x108b   : > { %v12208_v40 = vpop.f32.mrb[80].mxu0 }
0x108c   : > { %v12210_v37 = vpop.f32.mrb[81].mxu0 }
0x108f   : > { %v12212_v13 = vpop.f32.mrb[82].mxu0 }
0x1090   : > { %v12214_v32 = vpop.f32.mrb[83].mxu0  ;;  %10064 = vrot.lane.b32.xlu0 %v12048_v20, %s10644_s19 }
0x1093   : > { %v12218_v2 = vpop.f32.mrb[84].mxu0 }
0x1094   : > { %v12220_v45 = vpop.f32.mrb[85].mxu0  ;;  %10074 = vrot.lane.b32.xlu0 %v12068_v27, %s10644_s19 }
0x1097   : > { %v12224_v0 = vpop.f32.mrb[86].mxu0 }
0x1098   : > { %v12226_v26 = vpop.f32.mrb[87].mxu0 }
0x109b   : > { %v12228_v54 = vpop.f32.mrb[88].mxu0 }
0x109c   : > { %v12230_v9 = vpop.f32.mrb[89].mxu0 }
0x10f2   : > { %v4327_v53 = vpop.xlane.xlu1 %4326 }
0x10f3   : > { %v4353_v10 = vsub.f32 %v8822_v59, %v4327_v53  ;;  %v4324_v61 = vpop.xlane.xlu0 %4323 }
0x10f4   : > { %v4352_v7 = vsub.f32 %v4273_v8, %v4324_v61 }
0x10f5   : > { %v4364_v58 = vmul.f32 1.442695, %v4353_v10 }
0x10f6   : > { %v4362_v19 = vmul.f32 1.442695, %v4352_v7 }
0x10f7   : > { %10433 = vpow2.f32 %v4364_v58  ;;  %v4333_v55 = vpop.xlane.xlu0 %4332 }
0x10f8   : > { %10435 = vpow2.f32 %v4362_v19  ;;  %v4355_v48 = vsub.f32 %v8825_v6, %v4333_v55 }
0x10fa   : > { %v4368_v46 = vmul.f32 1.442695, %v4355_v48  ;;  %v4339_v41 = vpop.xlane.xlu1 %4338 }
0x10fb   : > { %v4357_v24 = vsub.f32 %v8828_v11, %v4339_v41  ;;  %v4330_v43 = vpop.xlane.xlu0 %4329 }
0x10fc   : > { %10437 = vpow2.f32 %v4368_v46  ;;  %v4354_v14 = vsub.f32 %v4283_v21, %v4330_v43 }
0x10fd   : > { %v4372_v22 = vmul.f32 1.442695, %v4357_v24 }
0x10fe   : > { %v4366_v17 = vmul.f32 1.442695, %v4354_v14  ;;  %v4345_v1 = vpop.xlane.xlu1 %4344 }
0x10ff   : > { %10439 = vpow2.f32 %v4372_v22  ;;  %v4359_v51 = vsub.f32 %v8831_v35, %v4345_v1  ;;  %v4336_v59 = vpop.xlane.xlu0 %4335 }
0x1100   : > { %10441 = vpow2.f32 %v4366_v17  ;;  %v4356_v8 = vsub.f32 %v4293_v62, %v4336_v59 }
0x1101   : > { %v12232_v3 = vpop.eup %10433  ;;  %v4376_v10 = vmul.f32 1.442695, %v4359_v51 }
0x1102   : > { %v12234_v53 = vpop.eup %10435  ;;  %v4370_v6 = vmul.f32 1.442695, %v4356_v8  ;;  %v4351_v61 = vpop.xlane.xlu1 %4350  ;;  %v4385_v11 = vsel %vm1026_vm3, %v12232_v3, 0.0 }
0x1103   : > { %v4361_v7 = vsub.f32 %v8834_v63, %v4351_v61  ;;  %v4342_v21 = vpop.xlane.xlu0 %4341  ;;  %4386 = vadd.xlane.f32.xlu1 %v4385_v11  ;;  %v4382_v58 = vsel %vm1026_vm3, %v12234_v53, 0.0 }
0x1104   : > { %10443 = vpow2.f32 %v4370_v6  ;;  %v4358_v35 = vsub.f32 %v12195_v18, %v4342_v21  ;;  %4383 = vadd.xlane.f32.xlu0 %v4382_v58 }
0x1105   : > { %10445 = vpow2.f32 %v4376_v10  ;;  %v4380_v19 = vmul.f32 1.442695, %v4361_v7 }
0x1106   : > { %v12241_v62 = vpop.eup %10437  ;;  %v4374_v55 = vmul.f32 1.442695, %v4358_v35  ;;  %v10070_v24 = vpop.permute.xlu1 %10069 }
0x1107   : > { %v4348_v48 = vpop.xlane.xlu0 %4347  ;;  %v4391_v46 = vsel %vm1026_vm3, %v12241_v62, 0.0  ;;  %v10072_v1 = vunpack.i.h.bf16 %v10070_v24  ;;  %v10071_v51 = vunpack.i.l.bf16 %v10070_v24 }
0x1108   : > { %10447 = vpow2.f32 %v4374_v55  ;;  %v4360_v63 = vsub.f32 %v12199_v56, %v4348_v48  ;;  %4392 = vadd.xlane.f32.xlu1 %v4391_v46 }
0x1109   : > { %v12246_v41 = vpop.eup %10439  ;;  %10449 = vpow2.f32 %v4380_v19  ;;  %v9508_v58 = vpack.c.bf16 %v10072_v1, %v10071_v51  ;;  %v4966_v1 = vsel %vm1026_vm3, %v12212_v13, -inf  ;;  %v4972_v51 = vsel %vm1026_vm3, %v12218_v2, -inf }
0x110a   : > { %v12248_v43 = vpop.eup %10441  ;;  %v4378_v18 = vmul.f32 1.442695, %v4360_v63  ;;  %v4397_v14 = vsel %vm1026_vm3, %v12246_v41, 0.0 }
0x110b   : > { %v10065_v22 = vpop.permute.xlu0 %10064  ;;  %v4388_v17 = vsel %vm1026_vm3, %v12248_v43, 0.0 }
0x110c   : > { %v10067_v59 = vunpack.i.h.bf16 %v10065_v22  ;;  %v10066_v8 = vunpack.i.l.bf16 %v10065_v22  ;;  %4398 = vadd.xlane.f32.xlu1 %v4397_v14  ;;  %4389 = vadd.xlane.f32.xlu0 %v4388_v17  ;;  %10451 = vpow2.f32 %v4378_v18  ;;  %v4957_v14 = vsel %vm1026_vm3, %v12210_v37, -inf }
0x110d   : > { %v4963_v22 = vsel %vm1026_vm3, %v12214_v32, -inf  ;;  %v4960_v17 = vsel %vm1026_vm3, %v12208_v40, -inf }
0x110e   : > { %v12254_v56 = vpop.eup %10443  ;;  %v9504_v10 = vpack.c.bf16 %v10067_v59, %v10066_v8  ;;  %v4969_v59 = vsel %vm1026_vm3, %v12220_v45, -inf  ;;  %v4978_v8 = vsel %vm1026_vm3, %v12224_v0, -inf }
0x110f   : > { %v10075_v6 = vpop.permute.xlu0 %10074  ;;  %v4394_v61 = vsel %vm1026_vm3, %v12254_v56, 0.0  ;;  %v12258_v11 = vpop.eup %10445 }
0x1110   : > { %v10077_v7 = vunpack.i.h.bf16 %v10075_v6  ;;  %v10076_v21 = vunpack.i.l.bf16 %v10075_v6  ;;  %4395 = vadd.xlane.f32.xlu1 %v4394_v61  ;;  %9505 = vmatprep.subr.bf16.mxu1 %v9504_v10  ;;  %v4403_v19 = vsel %vm1026_vm3, %v12258_v11, 0.0  ;;  %v4984_v6 = vsel %vm1026_vm3, %v12228_v54, -inf }
0x1111   : > { %9507 = vmatpush3.bf16.msra.mxu1 %v9504_v10  ;;  %v4975_v10 = vsel %vm1026_vm3, %v12226_v26, -inf  ;;  %v4981_v61 = vsel %vm1026_vm3, %v12230_v9, -inf }
0x1112   : > { %v12260_v35 = vpop.eup %10447  ;;  %9509 = vmatprep.subr.bf16.mxu1 %v9508_v58  ;;  %v9512_v46 = vpack.c.bf16 %v10077_v7, %v10076_v21 }
0x1113   : > { %v4400_v55 = vsel %vm1026_vm3, %v12260_v35, 0.0  ;;  %v12266_v48 = vpop.eup %10449 }
0x1114   : > { %4404 = vadd.xlane.f32.xlu1 %v4403_v19  ;;  %4401 = vadd.xlane.f32.xlu0 %v4400_v55  ;;  %v4409_v63 = vsel %vm1026_vm3, %v12266_v48, 0.0 }
0x1115   : > { %9511 = vmatpush3.bf16.msra.mxu1 %v9508_v58 }
0x1116   : > { %9513 = vmatprep.subr.bf16.mxu1 %v9512_v46  ;;  %v12270_v24 = vpop.eup %10451 }
0x1117   : > { %v4406_v18 = vsel %vm1026_vm3, %v12270_v24, 0.0 }
0x1118   : > { %4410 = vadd.xlane.f32.xlu1 %v4409_v63 }
0x1119   : > { %9515 = vmatpush3.bf16.msra.mxu1 %v9512_v46 }
0x111c   : > { %4407 = vadd.xlane.f32.xlu1 %v4406_v18 }
0x112a   : > { %10084 = vrot.lane.b32.xlu0 %v12088_v30, %s10644_s19 }
0x112d   : > { %10079 = vrot.lane.b32.xlu1 %v12078_v36, %s10644_s19 }
0x112e   : > { %10089 = vrot.lane.b32.xlu0 %v12048_v20, %s13211_s28 }
0x1131   : > { %10099 = vrot.lane.b32.xlu1 %v12068_v27, %s13211_s28 }
0x1132   : > { %10094 = vrot.lane.b32.xlu0 %v12058_v34, %s13211_s28 }
0x1135   : > { %10109 = vrot.lane.b32.xlu1 %v12088_v30, %s13211_s28 }
0x1136   : > { %10104 = vrot.lane.b32.xlu0 %v12078_v36, %s13211_s28 }
0x1139   : > { %5399 = vrot.lane.b32.xlu1 %v12040_v52, %s13212_s16 }
0x113a   : > { %5397 = vrot.lane.b32.xlu0 %v12042_v4, %s13212_s16 }
0x113d   : > { %5403 = vrot.lane.b32.xlu1 %v12050_v33, %s13212_s16 }
0x113e   : > { %5401 = vrot.lane.b32.xlu0 %v12052_v23, %s13212_s16 }
0x1141   : > { %5407 = vrot.lane.b32.xlu1 %v12060_v29, %s13212_s16 }
0x1142   : > { %5405 = vrot.lane.b32.xlu0 %v12062_v5, %s13212_s16 }
0x1145   : > { %5411 = vrot.lane.b32.xlu1 %v12072_v16, %s13212_s16 }
0x1146   : > { %5409 = vrot.lane.b32.xlu0 %v12074_v31, %s13212_s16 }
0x1149   : > { %5415 = vrot.lane.b32.xlu1 %v12080_v44, %s13212_s16 }
0x114a   : > { %5413 = vrot.lane.b32.xlu0 %v12082_v25, %s13212_s16 }
0x1169   : > { %4958 = vmax.xlane.f32.xlu0 %v4957_v14 }
0x116d   : > { %4964 = vmax.xlane.f32.xlu0 %v4963_v22  ;;  %4961 = vmax.xlane.f32.xlu1 %v4960_v17 }
0x1171   : > { %4967 = vmax.xlane.f32.xlu0 %v4966_v1  ;;  %4973 = vmax.xlane.f32.xlu1 %v4972_v51 }
0x1175   : > { %4970 = vmax.xlane.f32.xlu0 %v4969_v59  ;;  %4979 = vmax.xlane.f32.xlu1 %v4978_v8 }
0x1179   : > { %4976 = vmax.xlane.f32.xlu0 %v4975_v10  ;;  %4985 = vmax.xlane.f32.xlu1 %v4984_v6 }
0x117d   : > { %4982 = vmax.xlane.f32.xlu0 %v4981_v61 }
0x118a   : > { %10119 = vrot.lane.b32.xlu1 %v12058_v34, %s13213_s17 }
0x1190   : > { %v4387_v7 = vpop.xlane.xlu1 %4386 }
0x1191   : > { %v4384_v21 = vpop.xlane.xlu0 %4383 }
0x1192   : > { %10453 = vrcp.f32 %v4384_v21 }
0x1193   : > { %10114 = vrot.lane.b32.xlu0 %v12048_v20, %s13213_s17  ;;  %10455 = vrcp.f32 %v4387_v7 }
0x1195   : > { %v4393_v58 = vpop.xlane.xlu1 %4392 }
0x1197   : > { %10124 = vrot.lane.b32.xlu0 %v12068_v27, %s13213_s17 }
0x1199   : > { %v4399_v19 = vpop.xlane.xlu1 %4398  ;;  %v4390_v46 = vpop.xlane.xlu0 %4389 }
0x119a   : > { %10457 = vrcp.f32 %v4390_v46 }
0x119b   : > { %10459 = vrcp.f32 %v4393_v58 }
0x119c   : > { %v10454_v55 = vpop.eup %10453 }
0x119d   : > { %v4396_v63 = vpop.xlane.xlu1 %4395  ;;  %v4422_v18 = vmul.f32 %v10454_v55, %v12234_v53 }
0x119e   : > { %10461 = vrcp.f32 %v4396_v63  ;;  %v7612_v63 = vld [vmem:[%s13163_s5 + $0x20] sm:$0xff] }
0x119f   : > { %8855 = vmatprep.mubr.msk.f32.mxu1 %vm1026_vm3, %v4422_v18  ;;  %10463 = vrcp.f32 %v4399_v19 }
0x11a1   : > { %v4405_v14 = vpop.xlane.xlu1 %4404  ;;  %v4402_v22 = vpop.xlane.xlu0 %4401 }
0x11a2   : > { %10465 = vrcp.f32 %v4402_v22 }
0x11a3   : > { %10467 = vrcp.f32 %v4405_v14 }
0x11a5   : > { %v4411_v17 = vpop.xlane.xlu1 %4410  ;;  %v10085_v1 = vpop.permute.xlu0 %10084 }
0x11a6   : > { %v10087_v61 = vunpack.i.h.bf16 %v10085_v1  ;;  %v10086_v21 = vunpack.i.l.bf16 %v10085_v1 }
0x11a9   : > { %v4408_v51 = vpop.xlane.xlu1 %4407  ;;  %v10090_v59 = vpop.permute.xlu0 %10089 }
0x11aa   : > { %v10092_v8 = vunpack.i.h.bf16 %v10090_v59  ;;  %v10091_v10 = vunpack.i.l.bf16 %v10090_v59  ;;  %10469 = vrcp.f32 %v4408_v51 }
0x11ab   : > { %10471 = vrcp.f32 %v4411_v17 }
0x11ac   : > { %v9574_v6 = vpack.c.bf16 %v10092_v8, %v10091_v10 }
0x11ad   : > { %v10080_v38 = vpop.permute.xlu1 %10079  ;;  %v10095_v49 = vpop.permute.xlu0 %10094 }
0x11ae   : > { %v10082_v28 = vunpack.i.h.bf16 %v10080_v38  ;;  %v10081_v39 = vunpack.i.l.bf16 %v10080_v38  ;;  %v10097_v53 = vunpack.i.h.bf16 %v10095_v49  ;;  %v10096_v55 = vunpack.i.l.bf16 %v10095_v49  ;;  %9576 = vmatprep.subr.msk.bf16.mxu0 %vm10998_vm2, %v9574_v6  ;;  %v10456_v49 = vpop.eup %10455 }
0x11af   : > { %9579 = vmatpush3.bf16.xpose.msk.msra.mxu0 %vm10998_vm2, %v9574_v6  ;;  %v9520_v38 = vpack.c.bf16 %v10087_v61, %v10086_v21  ;;  %v4423_v19 = vmul.f32 %v10456_v49, %v12232_v3 }
0x11b0   : > { %v9580_v18 = vpack.c.bf16 %v10097_v53, %v10096_v55  ;;  %v9516_v7 = vpack.c.bf16 %v10082_v28, %v10081_v39  ;;  %v10458_v39 = vpop.eup %10457 }
0x11b1   : > { %v10100_v46 = vpop.permute.xlu1 %10099  ;;  %v10105_v59 = vpop.permute.xlu0 %10104  ;;  %v4424_v10 = vmul.f32 %v10458_v39, %v12248_v43 }
0x11b2   : > { %v10102_v8 = vunpack.i.h.bf16 %v10100_v46  ;;  %v10101_v1 = vunpack.i.l.bf16 %v10100_v46  ;;  %9517 = vmatprep.subr.bf16.mxu1 %v9516_v7  ;;  %9582 = vmatprep.subr.msk.bf16.mxu0 %vm10998_vm2, %v9580_v18  ;;  %v10460_v22 = vpop.eup %10459  ;;  %v10107_v61 = vunpack.i.h.bf16 %v10105_v59  ;;  %v10106_v21 = vunpack.i.l.bf16 %v10105_v59 }
0x11b3   : > { %9519 = vmatpush3.bf16.msra.mxu1 %v9516_v7  ;;  %v10462_v6 = vpop.eup %10461  ;;  %v4425_v14 = vmul.f32 %v10460_v22, %v12241_v62 }
0x11b4   : > { %9521 = vmatprep.subr.bf16.mxu1 %v9520_v38  ;;  %v9586_v28 = vpack.c.bf16 %v10102_v8, %v10101_v1  ;;  %v10464_v3 = vpop.eup %10463  ;;  %v4426_v51 = vmul.f32 %v10462_v6, %v12254_v56  ;;  %v9592_v55 = vpack.c.bf16 %v10107_v61, %v10106_v21 }
0x11b5   : > { %v5398_v58 = vpop.permute.xlu0 %5397  ;;  %v10466_v53 = vpop.eup %10465  ;;  %v4427_v43 = vmul.f32 %v10464_v3, %v12246_v41 }
0x11b6   : > { %8994 = vmatprep.mubr.msk.f32.mxu0 %vm870_vm1, %v5398_v58  ;;  %v10468_v17 = vpop.eup %10467  ;;  %v4428_v62 = vmul.f32 %v10466_v53, %v12260_v35 }
0x11b7   : > { %9523 = vmatpush3.bf16.msra.mxu1 %v9520_v38  ;;  %9585 = vmatpush3.bf16.xpose.msk.msra.mxu0 %vm10998_vm2, %v9580_v18  ;;  %v10110_v18 = vpop.permute.xlu1 %10109  ;;  %v10470_v7 = vpop.eup %10469  ;;  %v4429_v59 = vmul.f32 %v10468_v17, %v12258_v11 }
0x11b8   : > { %9588 = vmatprep.subr.msk.bf16.mxu0 %vm10998_vm2, %v9586_v28  ;;  %8870 = vmatprep.subr.mxu1 %v7612_v63  ;;  %v10112_v56 = vunpack.i.h.bf16 %v10110_v18  ;;  %v10111_v46 = vunpack.i.l.bf16 %v10110_v18  ;;  %v10472_v8 = vpop.eup %10471  ;;  %v4430_v1 = vmul.f32 %v10470_v7, %v12270_v24 }
0x11b9   : > { %v4431_v41 = vmul.f32 %v10472_v8, %v12266_v48  ;;  %v5402_v11 = vpop.permute.xlu0 %5401 }
0x11ba   : > { %8856 = vmatmul.mubr.msk.f32.vlgmr.msra.gmra.mrb[60].mxu1 %vm1026_vm3, %v4423_v19  ;;  %v9598_v38 = vpack.c.bf16 %v10112_v56, %v10111_v46 }
0x11bb   : > { %8858 = vmatprep.mubr.msk.f32.mxu1 %vm1026_vm3, %v4424_v10  ;;  %8871 = vmatpush3.msra.mxu1 %v7612_v63  ;;  %v5400_v35 = vpop.permute.xlu1 %5399 }
0x11bd   : > { %v5406_v49 = vpop.permute.xlu0 %5405 }
0x11be   : > { %8859 = vmatmul.mubr.msk.f32.gmra.mrb[62].mxu1 %vm1026_vm3, %v4425_v14 }
0x11bf   : > { %8861 = vmatprep.mubr.msk.f32.mxu1 %vm1026_vm3, %v4426_v51  ;;  %9591 = vmatpush3.bf16.xpose.msk.msra.mxu0 %vm10998_vm2, %v9586_v28  ;;  %v5404_v24 = vpop.permute.xlu1 %5403 }
0x11c0   : > { %9594 = vmatprep.subr.msk.bf16.mxu0 %vm10998_vm2, %v9592_v55 }
0x11c1   : > { %v5410_v63 = vpop.permute.xlu0 %5409 }
0x11c2   : > { %8862 = vmatmul.mubr.msk.f32.gmra.mrb[64].mxu1 %vm1026_vm3, %v4427_v43 }
0x11c3   : > { %8864 = vmatprep.mubr.msk.f32.mxu1 %vm1026_vm3, %v4428_v62  ;;  %v5408_v58 = vpop.permute.xlu1 %5407 }
0x11c5   : > { %v5414_v39 = vpop.permute.xlu0 %5413 }
0x11c6   : > { %8865 = vmatmul.mubr.msk.f32.gmra.mrb[66].mxu1 %vm1026_vm3, %v4429_v59 }
0x11c7   : > { %8867 = vmatprep.mubr.msk.f32.mxu1 %vm1026_vm3, %v4430_v1  ;;  %9597 = vmatpush3.bf16.xpose.msk.msra.mxu0 %vm10998_vm2, %v9592_v55  ;;  %v5412_v48 = vpop.permute.xlu1 %5411 }
0x11c8   : > { %9600 = vmatprep.subr.msk.bf16.mxu0 %vm10998_vm2, %v9598_v38 }
0x11ca   : > { %8868 = vmatmul.mubr.msk.f32.gmra.mrb[68].mxu1 %vm1026_vm3, %v4431_v41 }
0x11cb   : > { %v5416_v28 = vpop.permute.xlu1 %5415 }
0x11cf   : > { %9603 = vmatpush3.bf16.xpose.msk.msra.mxu0 %vm10998_vm2, %v9598_v38 }
0x11d6   : > { %8995 = vmatmul.mubr.msk.f32.vlgmr.msra.gmra.mrb[90].mxu0 %vm870_vm1, %v5400_v35 }
0x11d7   : > { %8997 = vmatprep.mubr.msk.f32.mxu0 %vm870_vm1, %v5402_v11 }
0x11da   : > { %8998 = vmatmul.mubr.msk.f32.gmra.mrb[92].mxu0 %vm870_vm1, %v5404_v24 }
0x11db   : > { %9000 = vmatprep.mubr.msk.f32.mxu0 %vm870_vm1, %v5406_v49 }
0x11de   : > { %9001 = vmatmul.mubr.msk.f32.gmra.mrb[94].mxu0 %vm870_vm1, %v5408_v58 }
0x11df   : > { %9003 = vmatprep.mubr.msk.f32.mxu0 %vm870_vm1, %v5410_v63 }
0x11e2   : > { %9004 = vmatmul.mubr.msk.f32.gmra.mrb[96].mxu0 %vm870_vm1, %v5412_v48 }
0x11e3   : > { %9006 = vmatprep.mubr.msk.f32.mxu0 %vm870_vm1, %v5414_v39 }
0x11e6   : > { %9007 = vmatmul.mubr.msk.f32.gmra.mrb[98].mxu0 %vm870_vm1, %v5416_v28 }
0x11f6   : > { %v4959_v19 = vpop.xlane.xlu0 %4958 }
0x11f7   : > { %v4987_v22 = vsub.f32 %v12210_v37, %v4959_v19 }
0x11f9   : > { %v4997_v10 = vmul.f32 1.442695, %v4987_v22 }
0x11fa   : > { %v4962_v6 = vpop.xlane.xlu1 %4961  ;;  %v4965_v61 = vpop.xlane.xlu0 %4964 }
0x11fb   : > { %10473 = vpow2.f32 %v4997_v10  ;;  %v4988_v21 = vsub.f32 %v12208_v40, %v4962_v6  ;;  %v4989_v14 = vsub.f32 %v12214_v32, %v4965_v61 }
0x11fd   : > { %v4999_v3 = vmul.f32 1.442695, %v4988_v21  ;;  %v5001_v51 = vmul.f32 1.442695, %v4989_v14 }
0x11fe   : > { %v4974_v53 = vpop.xlane.xlu1 %4973  ;;  %v4968_v55 = vpop.xlane.xlu0 %4967 }
0x11ff   : > { %10475 = vpow2.f32 %v4999_v3  ;;  %v4992_v18 = vsub.f32 %v12218_v2, %v4974_v53  ;;  %v4990_v43 = vsub.f32 %v12212_v13, %v4968_v55 }
0x1200   : > { %10477 = vpow2.f32 %v5001_v51 }
0x1201   : > { %v5003_v17 = vmul.f32 1.442695, %v4990_v43  ;;  %v5007_v37 = vmul.f32 1.442695, %v4992_v18 }
0x1202   : > { %v4980_v62 = vpop.xlane.xlu1 %4979  ;;  %v4971_v7 = vpop.xlane.xlu0 %4970 }
0x1203   : > { %v4991_v56 = vsub.f32 %v12220_v45, %v4971_v7  ;;  %10479 = vpow2.f32 %v5003_v17  ;;  %v4994_v32 = vsub.f32 %v12224_v0, %v4980_v62 }
0x1204   : > { %10481 = vpow2.f32 %v5007_v37 }
0x1205   : > { %v12393_v40 = vpop.eup %10473  ;;  %v5005_v46 = vmul.f32 1.442695, %v4991_v56  ;;  %v5011_v45 = vmul.f32 1.442695, %v4994_v32 }
0x1206   : > { %v4977_v59 = vpop.xlane.xlu0 %4976  ;;  %v5017_v2 = vsel %vm1026_vm3, %v12393_v40, 0.0  ;;  %v4986_v8 = vpop.xlane.xlu1 %4985 }
0x1207   : > { %v4993_v13 = vsub.f32 %v12226_v26, %v4977_v59  ;;  %5018 = vadd.xlane.f32.xlu0 %v5017_v2  ;;  %10483 = vpow2.f32 %v5005_v46  ;;  %v4996_v35 = vsub.f32 %v12228_v54, %v4986_v8 }
0x1209   : > { %v12399_v1 = vpop.eup %10475  ;;  %v5009_v38 = vmul.f32 1.442695, %v4993_v13  ;;  %v5015_v49 = vmul.f32 1.442695, %v4996_v35 }
0x120a   : > { %v12401_v41 = vpop.eup %10477  ;;  %v4983_v11 = vpop.xlane.xlu0 %4982  ;;  %v5020_v0 = vsel %vm1026_vm3, %v12399_v1, 0.0 }
0x120b   : > { %5021 = vadd.xlane.f32.xlu1 %v5020_v0  ;;  %10485 = vpow2.f32 %v5009_v38  ;;  %v5023_v24 = vsel %vm1026_vm3, %v12401_v41, 0.0  ;;  %v4995_v58 = vsub.f32 %v12230_v9, %v4983_v11 }
0x120c   : > { %5024 = vadd.xlane.f32.xlu0 %v5023_v24  ;;  %10487 = vpow2.f32 %v5011_v45 }
0x120d   : > { %v12408_v26 = vpop.eup %10479  ;;  %10489 = vpow2.f32 %v5015_v49  ;;  %v5013_v22 = vmul.f32 1.442695, %v4995_v58 }
0x120e   : > { %v10115_v63 = vpop.permute.xlu0 %10114  ;;  %v5026_v54 = vsel %vm1026_vm3, %v12408_v26, 0.0  ;;  %v12413_v28 = vpop.eup %10481 }
0x120f   : > { %v10117_v48 = vunpack.i.h.bf16 %v10115_v63  ;;  %v10116_v39 = vunpack.i.l.bf16 %v10115_v63  ;;  %5027 = vadd.xlane.f32.xlu1 %v5026_v54  ;;  %v5032_v10 = vsel %vm1026_vm3, %v12413_v28, 0.0  ;;  %10491 = vpow2.f32 %v5013_v22 }
0x1211   : > { %v9554_v19 = vpack.c.bf16 %v10117_v48, %v10116_v39  ;;  %v12417_v6 = vpop.eup %10483 }
0x1212   : > { %v5029_v61 = vsel %vm1026_vm3, %v12417_v6, 0.0 }
0x1213   : > { %9555 = vmatprep.subr.bf16.mxu1 %v9554_v19  ;;  %5033 = vadd.xlane.f32.xlu1 %v5032_v10 }
0x1215   : > { %v12419_v9 = vpop.eup %10485 }
0x1216   : > { %v5035_v21 = vsel %vm1026_vm3, %v12419_v9, 0.0  ;;  %v12425_v14 = vpop.eup %10487 }
0x1217   : > { %5030 = vadd.xlane.f32.xlu1 %v5029_v61  ;;  %5036 = vadd.xlane.f32.xlu0 %v5035_v21  ;;  %v5038_v3 = vsel %vm1026_vm3, %v12425_v14, 0.0  ;;  %v12429_v51 = vpop.eup %10489 }
0x1218   : > { %v5044_v53 = vsel %vm1026_vm3, %v12429_v51, 0.0 }
0x1219   : > { %v12433_v55 = vpop.eup %10491 }
0x121a   : > { %v5041_v18 = vsel %vm1026_vm3, %v12433_v55, 0.0 }
0x121b   : > { %5039 = vadd.xlane.f32.xlu1 %v5038_v3 }
0x121f   : > { %5045 = vadd.xlane.f32.xlu1 %v5044_v53 }
0x1223   : > { %5042 = vadd.xlane.f32.xlu1 %v5041_v18 }
0x122d   : > { %10134 = vrot.lane.b32.xlu0 %v12088_v30, %s13213_s17 }
0x1231   : > { %10139 = vrot.lane.b32.xlu0 %v12048_v20, %s13214_s21 }
0x1234   : > { %10129 = vrot.lane.b32.xlu1 %v12078_v36, %s13213_s17  ;;  %s500_s17 = scalar_lea.vmem %s13172_s14, %s13223_s23 }
0x1235   : > { %10144 = vrot.lane.b32.xlu0 %v12058_v34, %s13214_s21 }
0x1238   : > { %10149 = vrot.lane.b32.xlu1 %v12068_v27, %s13214_s21 }
0x1239   : > { %10154 = vrot.lane.b32.xlu0 %v12078_v36, %s13214_s21 }
0x123c   : > { %10159 = vrot.lane.b32.xlu1 %v12088_v30, %s13214_s21 }
0x123d   : > { %6032 = vrot.lane.b32.xlu0 %v12042_v4, %s13215_s18 }
0x1240   : > { %6034 = vrot.lane.b32.xlu1 %v12040_v52, %s13215_s18  ;;  %v10120_v52 = vpop.permute.xlu1 %10119 }
0x1241   : > { %6036 = vrot.lane.b32.xlu0 %v12052_v23, %s13215_s18  ;;  %v10122_v4 = vunpack.i.h.bf16 %v10120_v52  ;;  %v10125_v23 = vpop.permute.xlu0 %10124 }
0x1242   : > { %v10126_v17 = vunpack.i.l.bf16 %v10125_v23 }
0x1244   : > { %6038 = vrot.lane.b32.xlu1 %v12050_v33, %s13215_s18  ;;  %v10121_v33 = vunpack.i.l.bf16 %v10120_v52 }
0x1245   : > { %6040 = vrot.lane.b32.xlu0 %v12062_v5, %s13215_s18 }
0x1248   : > { %6042 = vrot.lane.b32.xlu1 %v12060_v29, %s13215_s18  ;;  %v10127_v29 = vunpack.i.h.bf16 %v10125_v23 }
0x1249   : > { %6044 = vrot.lane.b32.xlu0 %v12074_v31, %s13215_s18  ;;  %v9558_v31 = vpack.c.bf16 %v10122_v4, %v10121_v33 }
0x124a   : > { %v9562_v37 = vpack.c.bf16 %v10127_v29, %v10126_v17 }
0x124c   : > { %6046 = vrot.lane.b32.xlu1 %v12072_v16, %s13215_s18 }
0x124d   : > { %6048 = vrot.lane.b32.xlu0 %v12082_v25, %s13215_s18 }
0x1250   : > { %6050 = vrot.lane.b32.xlu1 %v12080_v44, %s13215_s18 }
0x128d   : > { %v8857_v5 = vpop.f32.mrb[60].mxu1 }
0x128e   : > { %v4558_v43 = vpop.f32.mrb[61].mxu1 }
0x128f   : > { %8872 = vmatprep.mubr.msk.f32.mxu1 %vm870_vm1, %v4558_v43 }
0x1290   : > { %8873 = vmatmul.mubr.msk.f32.vlgmr.msra.gmra.mrb[70].mxu1 %vm870_vm1, %v8857_v5 }
0x1291   : > { %9557 = vmatpush3.bf16.msra.mxu1 %v9554_v19  ;;  %v8860_v16 = vpop.f32.mrb[62].mxu1 }
0x1292   : > { %9559 = vmatprep.subr.bf16.mxu1 %v9558_v31  ;;  %v4568_v25 = vpop.f32.mrb[63].mxu1 }
0x1293   : > { %8875 = vmatprep.mubr.msk.f32.mxu1 %vm870_vm1, %v4568_v25 }
0x1294   : > { %v5019_v44 = vpop.xlane.xlu0 %5018  ;;  %8876 = vmatmul.mubr.msk.f32.gmra.mrb[72].mxu1 %vm870_vm1, %v8860_v16 }
0x1295   : > { %10493 = vrcp.f32 %v5019_v44  ;;  %9561 = vmatpush3.bf16.msra.mxu1 %v9558_v31  ;;  %v8863_v62 = vpop.f32.mrb[64].mxu1 }
0x1296   : > { %9563 = vmatprep.subr.bf16.mxu1 %v9562_v37  ;;  %v4578_v7 = vpop.f32.mrb[65].mxu1 }
0x1297   : > { %8878 = vmatprep.mubr.msk.f32.mxu1 %vm870_vm1, %v4578_v7 }
0x1298   : > { %v5022_v56 = vpop.xlane.xlu1 %5021  ;;  %8879 = vmatmul.mubr.msk.f32.gmra.mrb[74].mxu1 %vm870_vm1, %v8863_v62 }
0x1299   : > { %9565 = vmatpush3.bf16.msra.mxu1 %v9562_v37  ;;  %v8866_v32 = vpop.f32.mrb[66].mxu1  ;;  %v5025_v45 = vpop.xlane.xlu0 %5024  ;;  %10495 = vrcp.f32 %v5022_v56 }
0x129a   : > { %v4588_v46 = vpop.f32.mrb[67].mxu1  ;;  %10497 = vrcp.f32 %v5025_v45 }
0x129b   : > { %8881 = vmatprep.mubr.msk.f32.mxu1 %vm870_vm1, %v4588_v46 }
0x129c   : > { %8882 = vmatmul.mubr.msk.f32.gmra.mrb[76].mxu1 %vm870_vm1, %v8866_v32  ;;  %v5028_v59 = vpop.xlane.xlu1 %5027 }
0x129d   : > { %v8869_v2 = vpop.f32.mrb[68].mxu1  ;;  %10499 = vrcp.f32 %v5028_v59 }
0x129e   : > { %v4598_v8 = vpop.f32.mrb[69].mxu1 }
0x129f   : > { %v10494_v13 = vpop.eup %10493  ;;  %8884 = vmatprep.mubr.msk.f32.mxu1 %vm870_vm1, %v4598_v8 }
0x12a0   : > { %8885 = vmatmul.mubr.msk.f32.gmra.mrb[78].mxu1 %vm870_vm1, %v8869_v2  ;;  %v5057_v38 = vmul.f32 %v10494_v13, %v12393_v40  ;;  %v5034_v35 = vpop.xlane.xlu1 %5033 }
0x12a2   : > { %8942 = vmatprep.mubr.msk.f32.mxu1 %vm1026_vm3, %v5057_v38 }
0x12a4   : > { %v5031_v11 = vpop.xlane.xlu1 %5030  ;;  %v5037_v0 = vpop.xlane.xlu0 %5036 }
0x12a5   : > { %10501 = vrcp.f32 %v5031_v11 }
0x12a6   : > { %10503 = vrcp.f32 %v5034_v35 }
0x12a7   : > { %10505 = vrcp.f32 %v5037_v0 }
0x12a8   : > { %v12483_v24 = vpop.xlane.xlu1 %5039  ;;  %v10135_v49 = vpop.permute.xlu0 %10134 }
0x12a9   : > { %v12485_v58 = vpop.f32.mrb[90].mxu0  ;;  %v10137_v16 = vunpack.i.h.bf16 %v10135_v49  ;;  %v10136_v25 = vunpack.i.l.bf16 %v10135_v49  ;;  %10507 = vrcp.f32 %v12483_v24 }
0x12aa   : > { %v12487_v63 = vpop.f32.mrb[91].mxu0  ;;  %v5595_v48 = vsel %vm1026_vm3, %v12485_v58, -inf }
0x12ab   : > { %5596 = vmax.xlane.f32.xlu1 %v5595_v48  ;;  %v5592_v40 = vsel %vm1026_vm3, %v12487_v63, -inf  ;;  %v9570_v59 = vpack.c.bf16 %v10137_v16, %v10136_v25 }
0x12ac   : > { %v12493_v39 = vpop.xlane.xlu1 %5045  ;;  %v10140_v54 = vpop.permute.xlu0 %10139  ;;  %5593 = vmax.xlane.f32.xlu0 %v5592_v40 }
0x12ad   : > { %v10142_v19 = vunpack.i.h.bf16 %v10140_v54  ;;  %v10141_v22 = vunpack.i.l.bf16 %v10140_v54  ;;  %v12495_v10 = vpop.f32.mrb[92].mxu0  ;;  %v10496_v54 = vpop.eup %10495 }
0x12ae   : > { %v12497_v61 = vpop.f32.mrb[93].mxu0  ;;  %v5601_v29 = vsel %vm1026_vm3, %v12495_v10, -inf }
0x12af   : > { %v9624_v21 = vpack.c.bf16 %v10142_v19, %v10141_v22  ;;  %v5598_v3 = vsel %vm1026_vm3, %v12497_v61, -inf  ;;  %v10498_v19 = vpop.eup %10497 }
0x12b0   : > { %v5043_v53 = vpop.xlane.xlu1 %5042  ;;  %v10145_v18 = vpop.permute.xlu0 %10144  ;;  %5599 = vmax.xlane.f32.xlu0 %v5598_v3 }
0x12b1   : > { %v10147_v52 = vunpack.i.h.bf16 %v10145_v18  ;;  %v10146_v4 = vunpack.i.l.bf16 %v10145_v18  ;;  %v12501_v33 = vpop.f32.mrb[94].mxu0  ;;  %9626 = vmatprep.subr.msk.bf16.mxu0 %vm10998_vm2, %v9624_v21  ;;  %10509 = vrcp.f32 %v5043_v53  ;;  %v10500_v3 = vpop.eup %10499  ;;  %v5059_v18 = vmul.f32 %v10498_v19, %v12401_v41 }
0x12b2   : > { %v12505_v23 = vpop.f32.mrb[95].mxu0  ;;  %9629 = vmatpush3.bf16.xpose.msk.msra.mxu0 %vm10998_vm2, %v9624_v21  ;;  %v5607_v5 = vsel %vm1026_vm3, %v12501_v33, -inf  ;;  %v5058_v21 = vmul.f32 %v10496_v54, %v12399_v1  ;;  %10511 = vrcp.f32 %v12493_v39  ;;  %v5060_v1 = vmul.f32 %v10500_v3, %v12408_v26 }
0x12b3   : > { %v9630_v43 = vpack.c.bf16 %v10147_v52, %v10146_v4  ;;  %5608 = vmax.xlane.f32.xlu1 %v5607_v5  ;;  %v5604_v32 = vsel %vm1026_vm3, %v12505_v23, -inf  ;;  %v10502_v52 = vpop.eup %10501 }
0x12b4   : > { %v10130_v17 = vpop.permute.xlu1 %10129  ;;  %v10155_v31 = vpop.permute.xlu0 %10154  ;;  %5602 = vmax.xlane.f32.xlu0 %v5601_v29  ;;  %v5061_v41 = vmul.f32 %v10502_v52, %v12417_v6 }
0x12b5   : > { %v10132_v44 = vunpack.i.h.bf16 %v10130_v17  ;;  %v10131_v37 = vunpack.i.l.bf16 %v10130_v17  ;;  %v12513_v62 = vpop.f32.mrb[96].mxu0  ;;  %9632 = vmatprep.subr.msk.bf16.mxu0 %vm10998_vm2, %v9630_v43  ;;  %v10157_v35 = vunpack.i.h.bf16 %v10155_v31  ;;  %v10156_v22 = vunpack.i.l.bf16 %v10155_v31  ;;  %v10504_v24 = vpop.eup %10503 }
0x12b6   : > { %v12517_v7 = vpop.f32.mrb[97].mxu0  ;;  %v5613_v56 = vsel %vm1026_vm3, %v12513_v62, -inf  ;;  %v10506_v53 = vpop.eup %10505  ;;  %v5062_v39 = vmul.f32 %v10504_v24, %v12413_v28 }
0x12b7   : > { %5614 = vmax.xlane.f32.xlu1 %v5613_v56  ;;  %v9566_v46 = vpack.c.bf16 %v10132_v44, %v10131_v37  ;;  %v5610_v40 = vsel %vm1026_vm3, %v12517_v7, -inf  ;;  %v9642_v4 = vpack.c.bf16 %v10157_v35, %v10156_v22  ;;  %v10508_v17 = vpop.eup %10507  ;;  %v5063_v31 = vmul.f32 %v10506_v53, %v12419_v9 }
0x12b8   : > { %v10150_v2 = vpop.permute.xlu1 %10149  ;;  %v6033_v8 = vpop.permute.xlu0 %6032  ;;  %5605 = vmax.xlane.f32.xlu0 %v5604_v32  ;;  %v5064_v26 = vmul.f32 %v10508_v17, %v12425_v14  ;;  %v7613_v14 = vld [vmem:[%s13163_s5 + $0x28] sm:$0xff] }
0x12b9   : > { %v10152_v13 = vunpack.i.h.bf16 %v10150_v2  ;;  %v10151_v38 = vunpack.i.l.bf16 %v10150_v2  ;;  %9567 = vmatprep.subr.bf16.mxu1 %v9566_v46  ;;  %v12523_v45 = vpop.f32.mrb[98].mxu0  ;;  %9081 = vmatprep.mubr.msk.f32.mxu0 %vm870_vm1, %v6033_v8 }
0x12ba   : > { %9569 = vmatpush3.bf16.msra.mxu1 %v9566_v46  ;;  %v12526_v49 = vpop.f32.mrb[99].mxu0  ;;  %9635 = vmatpush3.bf16.xpose.msk.msra.mxu0 %vm10998_vm2, %v9630_v43  ;;  %v5619_v11 = vsel %vm1026_vm3, %v12523_v45, -inf }
0x12bb   : > { %v9636_v48 = vpack.c.bf16 %v10152_v13, %v10151_v38  ;;  %5620 = vmax.xlane.f32.xlu1 %v5619_v11  ;;  %9571 = vmatprep.subr.bf16.mxu1 %v9570_v59  ;;  %v5616_v0 = vsel %vm1026_vm3, %v12526_v49, -inf  ;;  %v10510_v16 = vpop.eup %10509 }
0x12bc   : > { %5611 = vmax.xlane.f32.xlu0 %v5610_v40  ;;  %v10160_v5 = vpop.permute.xlu1 %10159  ;;  %v10512_v6 = vpop.eup %10511  ;;  %v5065_v28 = vmul.f32 %v10510_v16, %v12433_v55 }
0x12bd   : > { %9638 = vmatprep.subr.msk.bf16.mxu0 %vm10998_vm2, %v9636_v48  ;;  %v10162_v43 = vunpack.i.h.bf16 %v10160_v5  ;;  %v10161_v29 = vunpack.i.l.bf16 %v10160_v5  ;;  %v5066_v9 = vmul.f32 %v10512_v6, %v12429_v51  ;;  %v6037_v37 = vpop.permute.xlu0 %6036 }
0x12be   : > { %9573 = vmatpush3.bf16.msra.mxu1 %v9570_v59 }
0x12bf   : > { %v9648_v25 = vpack.c.bf16 %v10162_v43, %v10161_v29  ;;  %8957 = vmatprep.subr.mxu1 %v7613_v14 }
0x12c0   : > { %5617 = vmax.xlane.f32.xlu0 %v5616_v0  ;;  %v6035_v44 = vpop.permute.xlu1 %6034 }
0x12c1   : > { %8943 = vmatmul.mubr.msk.f32.vlgmr.msra.gmra.mrb[80].mxu1 %vm1026_vm3, %v5058_v21  ;;  %v6041_v55 = vpop.permute.xlu0 %6040 }
0x12c2   : > { %8945 = vmatprep.mubr.msk.f32.mxu1 %vm1026_vm3, %v5059_v18  ;;  %9641 = vmatpush3.bf16.xpose.msk.msra.mxu0 %vm10998_vm2, %v9636_v48 }
0x12c3   : > { %9644 = vmatprep.subr.msk.bf16.mxu0 %vm10998_vm2, %v9642_v4  ;;  %8958 = vmatpush3.msra.mxu1 %v7613_v14 }
0x12c4   : > { %v6039_v56 = vpop.permute.xlu1 %6038 }
0x12c5   : > { %8946 = vmatmul.mubr.msk.f32.gmra.mrb[82].mxu1 %vm1026_vm3, %v5060_v1  ;;  %v6045_v51 = vpop.permute.xlu0 %6044 }
0x12c6   : > { %8948 = vmatprep.mubr.msk.f32.mxu1 %vm1026_vm3, %v5061_v41 }
0x12c8   : > { %v6043_v15 = vpop.permute.xlu1 %6042 }
0x12c9   : > { %8949 = vmatmul.mubr.msk.f32.gmra.mrb[84].mxu1 %vm1026_vm3, %v5062_v39  ;;  %v6049_v46 = vpop.permute.xlu0 %6048 }
0x12ca   : > { %8951 = vmatprep.mubr.msk.f32.mxu1 %vm1026_vm3, %v5063_v31  ;;  %9647 = vmatpush3.bf16.xpose.msk.msra.mxu0 %vm10998_vm2, %v9642_v4 }
0x12cb   : > { %9650 = vmatprep.subr.msk.bf16.mxu0 %vm10998_vm2, %v9648_v25 }
0x12cc   : > { %10169 = vrot.lane.b32.xlu1 %v12058_v34, %s13216_s25  ;;  %v6047_v32 = vpop.permute.xlu1 %6046 }
0x12cd   : > { %8952 = vmatmul.mubr.msk.f32.gmra.mrb[86].mxu1 %vm1026_vm3, %v5064_v26 }
0x12ce   : > { %8954 = vmatprep.mubr.msk.f32.mxu1 %vm1026_vm3, %v5065_v28 }
0x12d0   : > { %v6051_v2 = vpop.permute.xlu1 %6050 }
0x12d1   : > { %8955 = vmatmul.mubr.msk.f32.gmra.mrb[88].mxu1 %vm1026_vm3, %v5066_v9 }
0x12d2   : > { %9653 = vmatpush3.bf16.xpose.msk.msra.mxu0 %vm10998_vm2, %v9648_v25 }
0x12d6   : > { %10164 = vrot.lane.b32.xlu0 %v12048_v20, %s13216_s25 }
0x12d9   : > { %9082 = vmatmul.mubr.msk.f32.vlgmr.msra.gmra.mrb[100].mxu0 %vm870_vm1, %v6035_v44 }
0x12da   : > { %9084 = vmatprep.mubr.msk.f32.mxu0 %vm870_vm1, %v6037_v37  ;;  %10174 = vrot.lane.b32.xlu0 %v12068_v27, %s13216_s25 }
0x12dd   : > { %9085 = vmatmul.mubr.msk.f32.gmra.mrb[102].mxu0 %vm870_vm1, %v6039_v56 }
0x12de   : > { %9087 = vmatprep.mubr.msk.f32.mxu0 %vm870_vm1, %v6041_v55 }
0x12e1   : > { %9088 = vmatmul.mubr.msk.f32.gmra.mrb[104].mxu0 %vm870_vm1, %v6043_v15 }
0x12e2   : > { %9090 = vmatprep.mubr.msk.f32.mxu0 %vm870_vm1, %v6045_v51 }
0x12e5   : > { %9091 = vmatmul.mubr.msk.f32.gmra.mrb[106].mxu0 %vm870_vm1, %v6047_v32 }
0x12e6   : > { %9093 = vmatprep.mubr.msk.f32.mxu0 %vm870_vm1, %v6049_v46 }
0x12e9   : > { %9094 = vmatmul.mubr.msk.f32.gmra.mrb[108].mxu0 %vm870_vm1, %v6051_v2 }
0x1338   : > { %v5597_v8 = vpop.xlane.xlu1 %5596 }
0x1339   : > { %v5623_v13 = vsub.f32 %v12485_v58, %v5597_v8  ;;  %v5594_v38 = vpop.xlane.xlu0 %5593 }
0x133a   : > { %v5622_v59 = vsub.f32 %v12487_v63, %v5594_v38 }
0x133b   : > { %v5634_v11 = vmul.f32 1.442695, %v5623_v13 }
0x133c   : > { %v5632_v48 = vmul.f32 1.442695, %v5622_v59 }
0x133d   : > { %10513 = vpow2.f32 %v5634_v11  ;;  %v5600_v40 = vpop.xlane.xlu0 %5599 }
0x133e   : > { %10515 = vpow2.f32 %v5632_v48  ;;  %v5624_v54 = vsub.f32 %v12497_v61, %v5600_v40 }
0x1340   : > { %v5636_v19 = vmul.f32 1.442695, %v5624_v54  ;;  %v5609_v35 = vpop.xlane.xlu1 %5608 }
0x1341   : > { %v5627_v22 = vsub.f32 %v12501_v33, %v5609_v35  ;;  %v5603_v21 = vpop.xlane.xlu0 %5602 }
0x1342   : > { %10517 = vpow2.f32 %v5636_v19  ;;  %v5625_v0 = vsub.f32 %v12495_v10, %v5603_v21 }
0x1343   : > { %v5642_v3 = vmul.f32 1.442695, %v5627_v22 }
0x1344   : > { %v5638_v58 = vmul.f32 1.442695, %v5625_v0  ;;  %v5615_v18 = vpop.xlane.xlu1 %5614 }
0x1345   : > { %v5606_v52 = vpop.xlane.xlu0 %5605  ;;  %v5629_v61 = vsub.f32 %v12513_v62, %v5615_v18 }
0x1346   : > { %10519 = vpow2.f32 %v5638_v58  ;;  %v5626_v63 = vsub.f32 %v12505_v23, %v5606_v52 }
0x1347   : > { %v12592_v4 = vpop.eup %10513  ;;  %10521 = vpow2.f32 %v5642_v3  ;;  %v5646_v43 = vmul.f32 1.442695, %v5629_v61 }
0x1348   : > { %v12594_v5 = vpop.eup %10515  ;;  %v5640_v1 = vmul.f32 1.442695, %v5626_v63  ;;  %v5655_v33 = vsel %vm1026_vm3, %v12592_v4, 0.0  ;;  %v5621_v24 = vpop.xlane.xlu1 %5620 }
0x1349   : > { %v5612_v10 = vpop.xlane.xlu0 %5611  ;;  %5656 = vadd.xlane.f32.xlu1 %v5655_v33  ;;  %v5652_v41 = vsel %vm1026_vm3, %v12594_v5, 0.0  ;;  %v5631_v29 = vsub.f32 %v12523_v45, %v5621_v24 }
0x134a   : > { %v5628_v53 = vsub.f32 %v12517_v7, %v5612_v10  ;;  %5653 = vadd.xlane.f32.xlu0 %v5652_v41  ;;  %10523 = vpow2.f32 %v5640_v1 }
0x134b   : > { %v5650_v16 = vmul.f32 1.442695, %v5631_v29 }
0x134c   : > { %v12602_v23 = vpop.eup %10517  ;;  %v5644_v62 = vmul.f32 1.442695, %v5628_v53  ;;  %v10170_v13 = vpop.permute.xlu1 %10169 }
0x134d   : > { %v5618_v39 = vpop.xlane.xlu0 %5617  ;;  %v5658_v17 = vsel %vm1026_vm3, %v12602_v23, 0.0  ;;  %v10172_v38 = vunpack.i.h.bf16 %v10170_v13  ;;  %v10171_v59 = vunpack.i.l.bf16 %v10170_v13 }
0x134e   : > { %10525 = vpow2.f32 %v5644_v62  ;;  %5659 = vadd.xlane.f32.xlu0 %v5658_v17  ;;  %v5630_v7 = vsub.f32 %v12526_v49, %v5618_v39 }
0x134f   : > { %10527 = vpow2.f32 %v5646_v43  ;;  %v9608_v54 = vpack.c.bf16 %v10172_v38, %v10171_v59 }
0x1350   : > { %v12607_v31 = vpop.eup %10519  ;;  %10529 = vpow2.f32 %v5650_v16  ;;  %v5648_v9 = vmul.f32 1.442695, %v5630_v7 }
0x1351   : > { %v10165_v25 = vpop.permute.xlu0 %10164  ;;  %v5661_v26 = vsel %vm1026_vm3, %v12607_v31, 0.0  ;;  %v12612_v6 = vpop.eup %10521 }
0x1352   : > { %v10167_v45 = vunpack.i.h.bf16 %v10165_v25  ;;  %v10166_v28 = vunpack.i.l.bf16 %v10165_v25  ;;  %5662 = vadd.xlane.f32.xlu1 %v5661_v26  ;;  %v5667_v37 = vsel %vm1026_vm3, %v12612_v6, 0.0  ;;  %10531 = vpow2.f32 %v5648_v9 }
0x1354   : > { %v9604_v44 = vpack.c.bf16 %v10167_v45, %v10166_v28  ;;  %v12616_v14 = vpop.eup %10523 }
0x1355   : > { %v5664_v56 = vsel %vm1026_vm3, %v12616_v14, 0.0  ;;  %v10175_v11 = vpop.permute.xlu0 %10174 }
0x1356   : > { %5668 = vadd.xlane.f32.xlu1 %v5667_v37  ;;  %9605 = vmatprep.subr.bf16.mxu1 %v9604_v44  ;;  %v10177_v19 = vunpack.i.h.bf16 %v10175_v11  ;;  %v10176_v35 = vunpack.i.l.bf16 %v10175_v11 }
0x1358   : > { %v12618_v49 = vpop.eup %10525  ;;  %v9612_v0 = vpack.c.bf16 %v10177_v19, %v10176_v35 }
0x1359   : > { %v5670_v55 = vsel %vm1026_vm3, %v12618_v49, 0.0  ;;  %v12624_v15 = vpop.eup %10527 }
0x135a   : > { %5665 = vadd.xlane.f32.xlu1 %v5664_v56  ;;  %5671 = vadd.xlane.f32.xlu0 %v5670_v55  ;;  %v5673_v51 = vsel %vm1026_vm3, %v12624_v15, 0.0  ;;  %v12628_v32 = vpop.eup %10529 }
0x135b   : > { %v5679_v46 = vsel %vm1026_vm3, %v12628_v32, 0.0 }
0x135c   : > { %v12632_v2 = vpop.eup %10531 }
0x135d   : > { %v5676_v8 = vsel %vm1026_vm3, %v12632_v2, 0.0 }
0x135e   : > { %5674 = vadd.xlane.f32.xlu1 %v5673_v51 }
0x1362   : > { %5680 = vadd.xlane.f32.xlu1 %v5679_v46 }
0x1366   : > { %5677 = vadd.xlane.f32.xlu1 %v5676_v8 }
0x1370   : > { %10184 = vrot.lane.b32.xlu0 %v12088_v30, %s13216_s25 }
0x1377   : > { %10179 = vrot.lane.b32.xlu1 %v12078_v36, %s13216_s25 }
0x1394   : > { %v8944_v48 = vpop.f32.mrb[80].mxu1 }
0x1395   : > { %v5193_v40 = vpop.f32.mrb[81].mxu1 }
0x1396   : > { %8959 = vmatprep.mubr.msk.f32.mxu1 %vm870_vm1, %v5193_v40 }
0x1397   : > { %8960 = vmatmul.mubr.msk.f32.vlgmr.msra.gmra.mrb[70].mxu1 %vm870_vm1, %v8944_v48 }
0x1398   : > { %9607 = vmatpush3.bf16.msra.mxu1 %v9604_v44  ;;  %v8947_v22 = vpop.f32.mrb[82].mxu1 }
0x1399   : > { %9609 = vmatprep.subr.bf16.mxu1 %v9608_v54  ;;  %v5203_v21 = vpop.f32.mrb[83].mxu1 }
0x139a   : > { %8962 = vmatprep.mubr.msk.f32.mxu1 %vm870_vm1, %v5203_v21 }
0x139b   : > { %8963 = vmatmul.mubr.msk.f32.gmra.mrb[72].mxu1 %vm870_vm1, %v8947_v22 }
0x139c   : > { %9611 = vmatpush3.bf16.msra.mxu1 %v9608_v54  ;;  %v8950_v3 = vpop.f32.mrb[84].mxu1 }
0x139d   : > { %9613 = vmatprep.subr.bf16.mxu1 %v9612_v0  ;;  %v5213_v58 = vpop.f32.mrb[85].mxu1 }
0x139e   : > { %8965 = vmatprep.mubr.msk.f32.mxu1 %vm870_vm1, %v5213_v58 }
0x139f   : > { %8966 = vmatmul.mubr.msk.f32.gmra.mrb[74].mxu1 %vm870_vm1, %v8950_v3  ;;  %v7614_v3 = vld [vmem:[%s13163_s5 + $0x30] sm:$0xff] }
0x13a0   : > { %9615 = vmatpush3.bf16.msra.mxu1 %v9612_v0  ;;  %v8953_v18 = vpop.f32.mrb[86].mxu1 }
0x13a1   : > { %v5223_v52 = vpop.f32.mrb[87].mxu1 }
0x13a2   : > { %8968 = vmatprep.mubr.msk.f32.mxu1 %vm870_vm1, %v5223_v52 }
0x13a3   : > { %8969 = vmatmul.mubr.msk.f32.gmra.mrb[76].mxu1 %vm870_vm1, %v8953_v18 }
0x13a4   : > { %v8956_v63 = vpop.f32.mrb[88].mxu1 }
0x13a5   : > { %v5233_v61 = vpop.f32.mrb[89].mxu1 }
0x13a6   : > { %8971 = vmatprep.mubr.msk.f32.mxu1 %vm870_vm1, %v5233_v61 }
0x13a7   : > { %8972 = vmatmul.mubr.msk.f32.gmra.mrb[78].mxu1 %vm870_vm1, %v8956_v63 }
0x13ac   : > { %v12650_v1 = vpop.f32.mrb[100].mxu0 }
0x13ad   : > { %v12652_v33 = vpop.f32.mrb[101].mxu0  ;;  %v6230_v24 = vsel %vm1026_vm3, %v12650_v1, -inf }
0x13ae   : > { %6231 = vmax.xlane.f32.xlu1 %v6230_v24  ;;  %v6227_v10 = vsel %vm1026_vm3, %v12652_v33, -inf }
0x13af   : > { %6228 = vmax.xlane.f32.xlu0 %v6227_v10 }
0x13b0   : > { %v12658_v41 = vpop.f32.mrb[102].mxu0 }
0x13b1   : > { %v12660_v53 = vpop.f32.mrb[103].mxu0  ;;  %v6236_v39 = vsel %vm1026_vm3, %v12658_v41, -inf }
0x13b2   : > { %v6233_v43 = vsel %vm1026_vm3, %v12660_v53, -inf }
0x13b3   : > { %6234 = vmax.xlane.f32.xlu0 %v6233_v43 }
0x13b4   : > { %v12664_v29 = vpop.f32.mrb[104].mxu0 }
0x13b5   : > { %v12666_v62 = vpop.f32.mrb[105].mxu0  ;;  %v6242_v28 = vsel %vm1026_vm3, %v12664_v29, -inf }
0x13b6   : > { %v6239_v7 = vsel %vm1026_vm3, %v12666_v62, -inf }
0x13b7   : > { %6237 = vmax.xlane.f32.xlu0 %v6236_v39 }
0x13b8   : > { %v12670_v17 = vpop.f32.mrb[106].mxu0 }
0x13b9   : > { %v12672_v16 = vpop.f32.mrb[107].mxu0  ;;  %v6248_v44 = vsel %vm1026_vm3, %v12670_v17, -inf }
0x13ba   : > { %v6245_v25 = vsel %vm1026_vm3, %v12672_v16, -inf }
0x13bb   : > { %6240 = vmax.xlane.f32.xlu0 %v6239_v7  ;;  %6246 = vmax.xlane.f32.xlu1 %v6245_v25 }
0x13bc   : > { %v12678_v26 = vpop.f32.mrb[108].mxu0 }
0x13bd   : > { %v12680_v45 = vpop.f32.mrb[109].mxu0  ;;  %v6254_v37 = vsel %vm1026_vm3, %v12678_v26, -inf }
0x13be   : > { %v6251_v9 = vsel %vm1026_vm3, %v12680_v45, -inf }
0x13bf   : > { %6243 = vmax.xlane.f32.xlu0 %v6242_v28  ;;  %6252 = vmax.xlane.f32.xlu1 %v6251_v9 }
0x13c3   : > { %6249 = vmax.xlane.f32.xlu0 %v6248_v44 }
0x13c7   : > { %6255 = vmax.xlane.f32.xlu0 %v6254_v37 }
0x13d0   : > { %10189 = vrot.lane.b32.xlu1 %v12048_v20, %s13217_s26 }
0x13d4   : > { %10199 = vrot.lane.b32.xlu1 %v12068_v27, %s13217_s26 }
0x13d6   : > { %v5657_v55 = vpop.xlane.xlu1 %5656 }
0x13d7   : > { %v5654_v56 = vpop.xlane.xlu0 %5653 }
0x13d8   : > { %10533 = vrcp.f32 %v5654_v56 }
0x13d9   : > { %10535 = vrcp.f32 %v5657_v55 }
0x13db   : > { %v5660_v59 = vpop.xlane.xlu0 %5659 }
0x13dc   : > { %10537 = vrcp.f32 %v5660_v59 }
0x13dd   : > { %10194 = vrot.lane.b32.xlu0 %v12058_v34, %s13217_s26 }
0x13df   : > { %v5663_v51 = vpop.xlane.xlu1 %5662 }
0x13e0   : > { %10539 = vrcp.f32 %v5663_v51 }
0x13e2   : > { %v10534_v46 = vpop.eup %10533 }
0x13e3   : > { %v5669_v8 = vpop.xlane.xlu1 %5668  ;;  %v5692_v13 = vmul.f32 %v10534_v46, %v12594_v5  ;;  %v10536_v0 = vpop.eup %10535 }
0x13e4   : > { %v5693_v18 = vmul.f32 %v10536_v0, %v12592_v4 }
0x13e5   : > { %9029 = vmatprep.mubr.msk.f32.mxu1 %vm1026_vm3, %v5692_v13 }
0x13e6   : > { %v10538_v58 = vpop.eup %10537 }
0x13e7   : > { %v5666_v38 = vpop.xlane.xlu1 %5665  ;;  %v5672_v20 = vpop.xlane.xlu0 %5671  ;;  %v5694_v63 = vmul.f32 %v10538_v58, %v12602_v23 }
0x13e8   : > { %10541 = vrcp.f32 %v5666_v38 }
0x13e9   : > { %10543 = vrcp.f32 %v5669_v8 }
0x13ea   : > { %10545 = vrcp.f32 %v5672_v20  ;;  %v10540_v52 = vpop.eup %10539 }
0x13eb   : > { %v5675_v11 = vpop.xlane.xlu1 %5674  ;;  %v10185_v27 = vpop.permute.xlu0 %10184  ;;  %v5695_v24 = vmul.f32 %v10540_v52, %v12607_v31 }
0x13ec   : > { %v10187_v19 = vunpack.i.h.bf16 %v10185_v27  ;;  %v10186_v35 = vunpack.i.l.bf16 %v10185_v27  ;;  %10547 = vrcp.f32 %v5675_v11 }
0x13ee   : > { %v9620_v5 = vpack.c.bf16 %v10187_v19, %v10186_v35 }
0x13ef   : > { %v5681_v48 = vpop.xlane.xlu1 %5680 }
0x13f2   : > { %v10542_v61 = vpop.eup %10541 }
0x13f3   : > { %v5678_v40 = vpop.xlane.xlu1 %5677  ;;  %v10544_v10 = vpop.eup %10543  ;;  %v5696_v43 = vmul.f32 %v10542_v61, %v12616_v14 }
0x13f4   : > { %10549 = vrcp.f32 %v5678_v40  ;;  %v10546_v39 = vpop.eup %10545  ;;  %v5697_v4 = vmul.f32 %v10544_v10, %v12612_v6 }
0x13f5   : > { %10551 = vrcp.f32 %v5681_v48  ;;  %v5698_v7 = vmul.f32 %v10546_v39, %v12618_v49 }
0x13f6   : > { %v10548_v23 = vpop.eup %10547 }
0x13f7   : > { %v10180_v54 = vpop.permute.xlu1 %10179  ;;  %v5699_v31 = vmul.f32 %v10548_v23, %v12624_v15 }
0x13f8   : > { %v10182_v34 = vunpack.i.h.bf16 %v10180_v54  ;;  %v10181_v22 = vunpack.i.l.bf16 %v10180_v54 }
0x13fa   : > { %v9616_v21 = vpack.c.bf16 %v10182_v34, %v10181_v22 }
0x13fc   : > { %9617 = vmatprep.subr.bf16.mxu1 %v9616_v21 }
0x13fd   : > { %9619 = vmatpush3.bf16.msra.mxu1 %v9616_v21 }
0x13fe   : > { %9621 = vmatprep.subr.bf16.mxu1 %v9620_v5  ;;  %v10550_v25 = vpop.eup %10549 }
0x13ff   : > { %v10552_v28 = vpop.eup %10551  ;;  %v5700_v14 = vmul.f32 %v10550_v25, %v12632_v2 }
0x1400   : > { %v5701_v9 = vmul.f32 %v10552_v28, %v12628_v32 }
0x1401   : > { %9623 = vmatpush3.bf16.msra.mxu1 %v9620_v5 }
0x1402   : > { %9044 = vmatprep.subr.mxu1 %v7614_v3 }
0x1404   : > { %9030 = vmatmul.mubr.msk.f32.vlgmr.msra.gmra.mrb[90].mxu1 %vm1026_vm3, %v5693_v18 }
0x1405   : > { %9032 = vmatprep.mubr.msk.f32.mxu1 %vm1026_vm3, %v5694_v63  ;;  %9045 = vmatpush3.msra.mxu1 %v7614_v3 }
0x1408   : > { %9033 = vmatmul.mubr.msk.f32.gmra.mrb[92].mxu1 %vm1026_vm3, %v5695_v24 }
0x1409   : > { %9035 = vmatprep.mubr.msk.f32.mxu1 %vm1026_vm3, %v5696_v43 }
0x140c   : > { %9036 = vmatmul.mubr.msk.f32.gmra.mrb[94].mxu1 %vm1026_vm3, %v5697_v4 }
0x140d   : > { %9038 = vmatprep.mubr.msk.f32.mxu1 %vm1026_vm3, %v5698_v7 }
0x1410   : > { %9039 = vmatmul.mubr.msk.f32.gmra.mrb[96].mxu1 %vm1026_vm3, %v5699_v31 }
0x1411   : > { %9041 = vmatprep.mubr.msk.f32.mxu1 %vm1026_vm3, %v5700_v14 }
0x1414   : > { %9042 = vmatmul.mubr.msk.f32.gmra.mrb[98].mxu1 %vm1026_vm3, %v5701_v9 }
0x143b   : > { %v6232_v6 = vpop.xlane.xlu1 %6231 }
0x143c   : > { %v6258_v49 = vsub.f32 %v12650_v1, %v6232_v6  ;;  %v6229_v44 = vpop.xlane.xlu0 %6228 }
0x143d   : > { %v6257_v37 = vsub.f32 %v12652_v33, %v6229_v44 }
0x143e   : > { %v6269_v56 = vmul.f32 1.442695, %v6258_v49 }
0x143f   : > { %v6267_v55 = vmul.f32 1.442695, %v6257_v37 }
0x1440   : > { %10553 = vpow2.f32 %v6269_v56  ;;  %v6235_v15 = vpop.xlane.xlu0 %6234 }
0x1441   : > { %10555 = vpow2.f32 %v6267_v55  ;;  %v6259_v2 = vsub.f32 %v12660_v53, %v6235_v15 }
0x1443   : > { %v6271_v51 = vmul.f32 1.442695, %v6259_v2 }
0x1444   : > { %v6238_v46 = vpop.xlane.xlu0 %6237 }
0x1445   : > { %10557 = vpow2.f32 %v6271_v51  ;;  %v6260_v32 = vsub.f32 %v12658_v41, %v6238_v46 }
0x1447   : > { %v6273_v8 = vmul.f32 1.442695, %v6260_v32 }
0x1448   : > { %v6247_v13 = vpop.xlane.xlu1 %6246  ;;  %v6241_v38 = vpop.xlane.xlu0 %6240 }
0x1449   : > { %10559 = vpow2.f32 %v6273_v8  ;;  %v6263_v1 = vsub.f32 %v12672_v16, %v6247_v13  ;;  %v6261_v53 = vsub.f32 %v12666_v62, %v6241_v38 }
0x144a   : > { %v12724_v59 = vpop.eup %10553 }
0x144b   : > { %v12726_v33 = vpop.eup %10555  ;;  %v6279_v11 = vmul.f32 1.442695, %v6263_v1  ;;  %v6290_v20 = vsel %vm1026_vm3, %v12724_v59, 0.0  ;;  %v6275_v19 = vmul.f32 1.442695, %v6261_v53 }
0x144c   : > { %6291 = vadd.xlane.f32.xlu0 %v6290_v20  ;;  %v6253_v48 = vpop.xlane.xlu1 %6252  ;;  %v6244_v40 = vpop.xlane.xlu0 %6243  ;;  %v6287_v41 = vsel %vm1026_vm3, %v12726_v33, 0.0 }
0x144d   : > { %10561 = vpow2.f32 %v6279_v11  ;;  %v6262_v27 = vsub.f32 %v12664_v29, %v6244_v40  ;;  %6288 = vadd.xlane.f32.xlu1 %v6287_v41  ;;  %v6265_v61 = vsub.f32 %v12680_v45, %v6253_v48 }
0x144f   : > { %v12734_v16 = vpop.eup %10557  ;;  %v6277_v54 = vmul.f32 1.442695, %v6262_v27  ;;  %v6283_v43 = vmul.f32 1.442695, %v6265_v61 }
0x1450   : > { %v10190_v35 = vpop.permute.xlu1 %10189  ;;  %v6250_v34 = vpop.xlane.xlu0 %6249  ;;  %v6293_v22 = vsel %vm1026_vm3, %v12734_v16, 0.0 }
0x1451   : > { %v10192_v62 = vunpack.i.h.bf16 %v10190_v35  ;;  %v10191_v21 = vunpack.i.l.bf16 %v10190_v35  ;;  %v6264_v5 = vsub.f32 %v12670_v17, %v6250_v34  ;;  %6294 = vadd.xlane.f32.xlu1 %v6293_v22  ;;  %10563 = vpow2.f32 %v6277_v54 }
0x1452   : > { %10565 = vpow2.f32 %v6275_v19 }
0x1453   : > { %v12739_v0 = vpop.eup %10559  ;;  %v9654_v3 = vpack.c.bf16 %v10192_v62, %v10191_v21  ;;  %v6281_v29 = vmul.f32 1.442695, %v6264_v5 }
0x1454   : > { %v6256_v58 = vpop.xlane.xlu0 %6255  ;;  %v6296_v18 = vsel %vm1026_vm3, %v12739_v0, 0.0  ;;  %v10200_v9 = vpop.permute.xlu1 %10199 }
0x1455   : > { %v6266_v52 = vsub.f32 %v12678_v26, %v6256_v58  ;;  %6297 = vadd.xlane.f32.xlu0 %v6296_v18  ;;  %9655 = vmatprep.subr.bf16.mxu1 %v9654_v3  ;;  %10567 = vpow2.f32 %v6281_v29  ;;  %v10202_v56 = vunpack.i.h.bf16 %v10200_v9  ;;  %v10201_v55 = vunpack.i.l.bf16 %v10200_v9 }
0x1457   : > { %v12744_v63 = vpop.eup %10561  ;;  %v6285_v17 = vmul.f32 1.442695, %v6266_v52  ;;  %v7615_v52 = vld [vmem:[%s13163_s5 + $0x38] sm:$0xff] }
0x1458   : > { %v6305_v24 = vsel %vm1026_vm3, %v12744_v63, 0.0  ;;  %v10195_v14 = vpop.permute.xlu0 %10194 }
0x1459   : > { %6306 = vadd.xlane.f32.xlu1 %v6305_v24  ;;  %10569 = vpow2.f32 %v6285_v17  ;;  %v10197_v6 = vunpack.i.h.bf16 %v10195_v14  ;;  %v10196_v49 = vunpack.i.l.bf16 %v10195_v14 }
0x145a   : > { %10571 = vpow2.f32 %v6283_v43 }
0x145b   : > { %v12749_v10 = vpop.eup %10563  ;;  %v9658_v15 = vpack.c.bf16 %v10197_v6, %v10196_v49 }
0x145c   : > { %v6302_v39 = vsel %vm1026_vm3, %v12749_v10, 0.0  ;;  %v12753_v26 = vpop.eup %10565 }
0x145d   : > { %6303 = vadd.xlane.f32.xlu0 %v6302_v39  ;;  %v6299_v45 = vsel %vm1026_vm3, %v12753_v26, 0.0 }
0x145f   : > { %v12757_v4 = vpop.eup %10567 }
0x1460   : > { %v6308_v23 = vsel %vm1026_vm3, %v12757_v4, 0.0 }
0x1461   : > { %6300 = vadd.xlane.f32.xlu0 %v6299_v45 }
0x1463   : > { %v12761_v7 = vpop.eup %10569 }
0x1464   : > { %v6314_v25 = vsel %vm1026_vm3, %v12761_v7, 0.0  ;;  %v12765_v31 = vpop.eup %10571 }
0x1465   : > { %6309 = vadd.xlane.f32.xlu0 %v6308_v23  ;;  %v6311_v28 = vsel %vm1026_vm3, %v12765_v31, 0.0 }
0x1469   : > { %6315 = vadd.xlane.f32.xlu0 %v6314_v25 }
0x146a   : > { %10204 = vrot.lane.b32.xlu1 %v12078_v36, %s13217_s26 }
0x146d   : > { %6312 = vadd.xlane.f32.xlu0 %v6311_v28 }
0x1483   : > { %10209 = vrot.lane.b32.xlu0 %v12088_v30, %s13217_s26  ;;  %v9662_v30 = vpack.c.bf16 %v10202_v56, %v10201_v55 }
0x14d7   : > { %v9031_v44 = vpop.f32.mrb[90].mxu1 }
0x14d8   : > { %v5828_v37 = vpop.f32.mrb[91].mxu1 }
0x14d9   : > { %9046 = vmatprep.mubr.msk.f32.mxu1 %vm870_vm1, %v5828_v37  ;;  %v6292_v13 = vpop.xlane.xlu0 %6291 }
0x14da   : > { %v6289_v2 = vpop.xlane.xlu1 %6288  ;;  %9047 = vmatmul.mubr.msk.f32.vlgmr.msra.gmra.mrb[70].mxu1 %vm870_vm1, %v9031_v44 }
0x14db   : > { %9657 = vmatpush3.bf16.msra.mxu1 %v9654_v3  ;;  %v9034_v36 = vpop.f32.mrb[92].mxu1  ;;  %10573 = vrcp.f32 %v6289_v2  ;;  %v7617_v2 = vld [vmem:[%s13164_s6 + $0x1] ss:$0 sm:$0xff] }
0x14dc   : > { %9659 = vmatprep.subr.bf16.mxu1 %v9658_v15  ;;  %v5838_v51 = vpop.f32.mrb[93].mxu1  ;;  %10575 = vrcp.f32 %v6292_v13 }
0x14dd   : > { %9049 = vmatprep.mubr.msk.f32.mxu1 %vm870_vm1, %v5838_v51 }
0x14de   : > { %9050 = vmatmul.mubr.msk.f32.gmra.mrb[72].mxu1 %vm870_vm1, %v9034_v36  ;;  %v6295_v8 = vpop.xlane.xlu1 %6294  ;;  %v4128_v36 = vadd.f32 %v7617_v2, %v11897_v60 }
0x14df   : > { %9661 = vmatpush3.bf16.msra.mxu1 %v9658_v15  ;;  %v9037_v46 = vpop.f32.mrb[94].mxu1  ;;  %10577 = vrcp.f32 %v6295_v8 }
0x14e0   : > { %9663 = vmatprep.subr.bf16.mxu1 %v9662_v30  ;;  %v5848_v32 = vpop.f32.mrb[95].mxu1 }
0x14e1   : > { %9052 = vmatprep.mubr.msk.f32.mxu1 %vm870_vm1, %v5848_v32 }
0x14e2   : > { %9053 = vmatmul.mubr.msk.f32.gmra.mrb[74].mxu1 %vm870_vm1, %v9037_v46  ;;  %v6298_v53 = vpop.xlane.xlu0 %6297 }
0x14e3   : > { %9665 = vmatpush3.bf16.msra.mxu1 %v9662_v30  ;;  %v9040_v38 = vpop.f32.mrb[96].mxu1  ;;  %10579 = vrcp.f32 %v6298_v53  ;;  %v4127_v30 = vadd.f32 %v7617_v2, %v11899_v57  ;;  %v4129_v57 = vadd.f32 %v7617_v2, %v11909_v47 }
0x14e4   : > { %v5858_v1 = vpop.f32.mrb[97].mxu1 }
0x14e5   : > { %9055 = vmatprep.mubr.msk.f32.mxu1 %vm870_vm1, %v5858_v1  ;;  %v10574_v11 = vpop.eup %10573 }
0x14e6   : > { %v6307_v20 = vpop.xlane.xlu1 %6306  ;;  %9056 = vmatmul.mubr.msk.f32.gmra.mrb[76].mxu1 %vm870_vm1, %v9040_v38  ;;  %v6327_v41 = vmul.f32 %v10574_v11, %v12726_v33  ;;  %v10576_v18 = vpop.eup %10575  ;;  %v4130_v38 = vadd.f32 %v7617_v2, %v11907_v50  ;;  %v4131_v50 = vadd.f32 %v7617_v2, %v11919_v12 }
0x14e7   : > { %v9043_v48 = vpop.f32.mrb[98].mxu1  ;;  %v6328_v17 = vmul.f32 %v10576_v18, %v12724_v59 }
0x14e8   : > { %v5868_v40 = vpop.f32.mrb[99].mxu1 }
0x14e9   : > { %9058 = vmatprep.mubr.msk.f32.mxu1 %vm870_vm1, %v5868_v40  ;;  %v10578_v61 = vpop.eup %10577 }
0x14ea   : > { %v10205_v27 = vpop.permute.xlu1 %10204  ;;  %9059 = vmatmul.mubr.msk.f32.gmra.mrb[78].mxu1 %vm870_vm1, %v9043_v48  ;;  %v6304_v35 = vpop.xlane.xlu0 %6303  ;;  %v6329_v43 = vmul.f32 %v10578_v61, %v12734_v16 }
0x14eb   : > { %v10207_v54 = vunpack.i.h.bf16 %v10205_v27  ;;  %v10206_v19 = vunpack.i.l.bf16 %v10205_v27  ;;  %9116 = vmatprep.mubr.msk.f32.mxu1 %vm1026_vm3, %v6327_v41 }
0x14ed   : > { %v9666_v34 = vpack.c.bf16 %v10207_v54, %v10206_v19  ;;  %v10580_v24 = vpop.eup %10579 }
0x14ee   : > { %v6301_v22 = vpop.xlane.xlu0 %6300  ;;  %v6330_v45 = vmul.f32 %v10580_v24, %v12739_v0 }
0x14ef   : > { %9667 = vmatprep.subr.bf16.mxu1 %v9666_v34  ;;  %10581 = vrcp.f32 %v6301_v22 }
0x14f0   : > { %9669 = vmatpush3.bf16.msra.mxu1 %v9666_v34  ;;  %10583 = vrcp.f32 %v6304_v35  ;;  %v4133_v35 = vadd.f32 %v7617_v2, %v11929_v42  ;;  %v13218_v34 = vld [vmem:[#allocation3_spill] sm:$0xff] }
0x14f1   : > { %10585 = vrcp.f32 %v6307_v20  ;;  %v4132_v22 = vadd.f32 %v7617_v2, %v13218_v34 }
0x14f2   : > { %v6310_v62 = vpop.xlane.xlu0 %6309 }
0x14f3   : > { %10587 = vrcp.f32 %v6310_v62 }
0x14f6   : > { %v6316_v21 = vpop.xlane.xlu0 %6315 }
0x14f9   : > { %v10582_v39 = vpop.eup %10581 }
0x14fa   : > { %v6313_v5 = vpop.xlane.xlu0 %6312  ;;  %v10584_v23 = vpop.eup %10583  ;;  %v6331_v25 = vmul.f32 %v10582_v39, %v12753_v26 }
0x14fb   : > { %10589 = vrcp.f32 %v6313_v5  ;;  %v10586_v28 = vpop.eup %10585  ;;  %v6332_v59 = vmul.f32 %v10584_v23, %v12749_v10 }
0x14fc   : > { %10591 = vrcp.f32 %v6316_v21  ;;  %v6333_v14 = vmul.f32 %v10586_v28, %v12744_v63 }
0x14fd   : > { %v10588_v16 = vpop.eup %10587 }
0x14fe   : > { %v10210_v33 = vpop.permute.xlu0 %10209  ;;  %v6334_v0 = vmul.f32 %v10588_v16, %v12757_v4 }
0x14ff   : > { %v10212_v3 = vunpack.i.h.bf16 %v10210_v33  ;;  %v10211_v29 = vunpack.i.l.bf16 %v10210_v33 }
0x1501   : > { %v9670_v58 = vpack.c.bf16 %v10212_v3, %v10211_v29  ;;  %v13219_v3 = vld [vmem:[#allocation4_spill] sm:$0xff] }
0x1502   : > { %v4135_v29 = vadd.f32 %v7617_v2, %v13219_v3 }
0x1503   : > { %9671 = vmatprep.subr.bf16.mxu1 %v9670_v58 }
0x1504   : > { %9673 = vmatpush3.bf16.msra.mxu1 %v9670_v58  ;;  %v13220_v58 = vld [vmem:[#allocation2_spill] sm:$0xff] }
0x1505   : > { %9131 = vmatprep.subr.mxu1 %v7615_v52  ;;  %v10590_v9 = vpop.eup %10589  ;;  %v4134_v18 = vadd.f32 %v7617_v2, %v13220_v58 }
0x1506   : > { %v10592_v6 = vpop.eup %10591  ;;  %v6335_v26 = vmul.f32 %v10590_v9, %v12765_v31 }
0x1507   : > { %9117 = vmatmul.mubr.msk.f32.vlgmr.msra.gmra.mrb[100].mxu1 %vm1026_vm3, %v6328_v17  ;;  %v6336_v49 = vmul.f32 %v10592_v6, %v12761_v7 }
0x1508   : > { %9119 = vmatprep.mubr.msk.f32.mxu1 %vm1026_vm3, %v6329_v43  ;;  %9132 = vmatpush3.msra.mxu1 %v7615_v52  ;;  %v13221_v43 = vld [vmem:[#allocation5_spill] sm:$0xff] }
0x1509   : > { %v4136_v39 = vadd.f32 %v7617_v2, %v13221_v43  ;;  %v7779_v43 = vld [vmem:[%s13165_s7 + $0x28] sm:$0xff] }
0x150b   : > { %9120 = vmatmul.mubr.msk.f32.gmra.mrb[102].mxu1 %vm1026_vm3, %v6330_v45 }
0x150c   : > { %9122 = vmatprep.mubr.msk.f32.mxu1 %vm1026_vm3, %v6331_v25 }
0x150f   : > { %9123 = vmatmul.mubr.msk.f32.gmra.mrb[104].mxu1 %vm1026_vm3, %v6332_v59 }
0x1510   : > { %9125 = vmatprep.mubr.msk.f32.mxu1 %vm1026_vm3, %v6333_v14 }
0x1513   : > { %9126 = vmatmul.mubr.msk.f32.gmra.mrb[106].mxu1 %vm1026_vm3, %v6334_v0 }
0x1514   : > { %9128 = vmatprep.mubr.msk.f32.mxu1 %vm1026_vm3, %v6335_v26 }
0x1517   : > { %9129 = vmatmul.mubr.msk.f32.gmra.mrb[108].mxu1 %vm1026_vm3, %v6336_v49 }
0x15da   : > { %v9118_v10 = vpop.f32.mrb[100].mxu1 }
0x15db   : > { %v6463_v63 = vpop.f32.mrb[101].mxu1 }
0x15dc   : > { %9133 = vmatprep.mubr.msk.f32.mxu1 %vm870_vm1, %v6463_v63 }
0x15dd   : > { %9134 = vmatmul.mubr.msk.f32.vlgmr.msra.gmra.mrb[70].mxu1 %vm870_vm1, %v9118_v10 }
0x15de   : > { %v9121_v44 = vpop.f32.mrb[102].mxu1 }
0x15df   : > { %v6473_v37 = vpop.f32.mrb[103].mxu1 }
0x15e0   : > { %9136 = vmatprep.mubr.msk.f32.mxu1 %vm870_vm1, %v6473_v37 }
0x15e1   : > { %9137 = vmatmul.mubr.msk.f32.gmra.mrb[72].mxu1 %vm870_vm1, %v9121_v44 }
0x15e2   : > { %v9124_v4 = vpop.f32.mrb[104].mxu1 }
0x15e3   : > { %v6483_v31 = vpop.f32.mrb[105].mxu1 }
0x15e4   : > { %9139 = vmatprep.mubr.msk.f32.mxu1 %vm870_vm1, %v6483_v31 }
0x15e5   : > { %9140 = vmatmul.mubr.msk.f32.gmra.mrb[74].mxu1 %vm870_vm1, %v9124_v4 }
0x15e6   : > { %v9127_v7 = vpop.f32.mrb[106].mxu1 }
0x15e7   : > { %v6493_v56 = vpop.f32.mrb[107].mxu1 }
0x15e8   : > { %9142 = vmatprep.mubr.msk.f32.mxu1 %vm870_vm1, %v6493_v56 }
0x15e9   : > { %9143 = vmatmul.mubr.msk.f32.gmra.mrb[76].mxu1 %vm870_vm1, %v9127_v7 }
0x15ea   : > { %v9130_v55 = vpop.f32.mrb[108].mxu1 }
0x15eb   : > { %v6503_v15 = vpop.f32.mrb[109].mxu1 }
0x15ec   : > { %9145 = vmatprep.mubr.msk.f32.mxu1 %vm870_vm1, %v6503_v15 }
0x15ed   : > { %9146 = vmatmul.mubr.msk.f32.gmra.mrb[78].mxu1 %vm870_vm1, %v9130_v55 }
0x16b0   : > { %v9135_v51 = vpop.f32.mrb[70].mxu1 }
0x16b1   : > { %v12821_v46 = vadd.f32 %v9135_v51, %v4128_v36  ;;  %v6608_v32 = vpop.f32.mrb[71].mxu1 }
0x16b2   : > { %v12823_v8 = vadd.f32 %v6608_v32, %v4127_v30 }
0x16b3   : > { %v6670_v13 = vsel %vm531_vm0, %v12821_v46, 0.0 }
0x16b4   : > { %6671 = vadd.xlane.f32.xlu0 %v6670_v13  ;;  %v9138_v1 = vpop.f32.mrb[72].mxu1  ;;  %v6667_v11 = vsel %vm531_vm0, %v12823_v8, 0.0 }
0x16b5   : > { %v12830_v20 = vadd.f32 %v9138_v1, %v4130_v38  ;;  %6668 = vadd.xlane.f32.xlu1 %v6667_v11  ;;  %v6618_v60 = vpop.f32.mrb[73].mxu1 }
0x16b6   : > { %v12835_v48 = vadd.f32 %v6618_v60, %v4129_v57 }
0x16b7   : > { %v6676_v53 = vsel %vm531_vm0, %v12830_v20, 0.0 }
0x16b8   : > { %v9141_v40 = vpop.f32.mrb[74].mxu1  ;;  %v6673_v19 = vsel %vm531_vm0, %v12835_v48, 0.0 }
0x16b9   : > { %6677 = vadd.xlane.f32.xlu1 %v6676_v53  ;;  %v6628_v41 = vpop.f32.mrb[75].mxu1  ;;  %v12846_v21 = vadd.f32 %v9141_v40, %v4132_v22 }
0x16ba   : > { %v12838_v27 = vadd.f32 %v6628_v41, %v4131_v50 }
0x16bb   : > { %v6682_v17 = vsel %vm531_vm0, %v12846_v21, 0.0 }
0x16bc   : > { %v9144_v54 = vpop.f32.mrb[76].mxu1  ;;  %v6679_v12 = vsel %vm531_vm0, %v12838_v27, 0.0 }
0x16bd   : > { %6674 = vadd.xlane.f32.xlu1 %v6673_v19  ;;  %v6638_v47 = vpop.f32.mrb[77].mxu1  ;;  %v12856_v61 = vadd.f32 %v9144_v54, %v4134_v18 }
0x16be   : > { %v12844_v62 = vadd.f32 %v6638_v47, %v4133_v35 }
0x16bf   : > { %v6688_v23 = vsel %vm531_vm0, %v12856_v61, 0.0 }
0x16c0   : > { %v9147_v5 = vpop.f32.mrb[78].mxu1  ;;  %v6685_v33 = vsel %vm531_vm0, %v12844_v62, 0.0 }
0x16c1   : > { %6680 = vadd.xlane.f32.xlu1 %v6679_v12  ;;  %6686 = vadd.xlane.f32.xlu0 %v6685_v33  ;;  %v6648_v42 = vpop.f32.mrb[79].mxu1  ;;  %v12863_v45 = vadd.f32 %v9147_v5, %v4136_v39 }
0x16c2   : > { %v12854_v52 = vadd.f32 %v6648_v42, %v4135_v29 }
0x16c3   : > { %v6694_v25 = vsel %vm531_vm0, %v12863_v45, 0.0 }
0x16c4   : > { %v6691_v24 = vsel %vm531_vm0, %v12854_v52, 0.0 }
0x16c5   : > { %6683 = vadd.xlane.f32.xlu1 %v6682_v17  ;;  %6692 = vadd.xlane.f32.xlu0 %v6691_v24  ;;  %v7778_v24 = vld [vmem:[%s13165_s7 + $0x20] sm:$0xff] }
0x16c6   : > { %v9674_v39 = vpack.c.bf16 %v7779_v43, %v7778_v24 }
0x16c8   : > { %9675 = vmatprep.subr.bf16.mxu0 %v9674_v39 }
0x16c9   : > { %6689 = vadd.xlane.f32.xlu1 %v6688_v23  ;;  %9677 = vmatpush3.bf16.msra.mxu0 %v9674_v39 }
0x16cd   : > { %6695 = vadd.xlane.f32.xlu1 %v6694_v25  ;;  %v7780_v25 = vld [vmem:[%s13165_s7 + $0x30] sm:$0xff] }
0x1741   : > { %v6672_v28 = vpop.xlane.xlu0 %6671 }
0x1742   : > { %v6698_v59 = vmul.f32 0.03125, %v6672_v28  ;;  %v6669_v16 = vpop.xlane.xlu1 %6668  ;;  %v7781_v28 = vld [vmem:[%s13165_s7 + $0x38] sm:$0xff] }
0x1743   : > { %v6697_v14 = vmul.f32 0.03125, %v6669_v16  ;;  %v7794_v16 = vld [vmem:[%s13167_s9 + $0x80] sm:$0xff] }
0x1744   : > { %v12870_v9 = vsub.f32 %v12821_v46, %v6698_v59  ;;  %v9678_v59 = vpack.c.bf16 %v7781_v28, %v7780_v25 }
0x1745   : > { %v12873_v0 = vsub.f32 %v12823_v8, %v6697_v14  ;;  %v7795_v14 = vld [vmem:[%s13167_s9 + $0x88] sm:$0xff] }
0x1746   : > { %v6678_v6 = vpop.xlane.xlu1 %6677  ;;  %v6718_v26 = vmul.f32 %v12870_v9, %v12870_v9  ;;  %9679 = vmatprep.subr.bf16.mxu0 %v9678_v59 }
0x1747   : > { %v6700_v49 = vmul.f32 0.03125, %v6678_v6  ;;  %v6717_v10 = vmul.f32 %v12873_v0, %v12873_v0  ;;  %9681 = vmatpush3.bf16.msra.mxu0 %v9678_v59  ;;  %v7796_v6 = vld [vmem:[%s13167_s9 + $0x90] sm:$0xff] }
0x1748   : > { %v6730_v63 = vsel %vm531_vm0, %v6718_v26, 0.0  ;;  %v9682_v26 = vpack.c.bf16 %v7795_v14, %v7794_v16 }
0x1749   : > { %v12881_v44 = vsub.f32 %v12830_v20, %v6700_v49  ;;  %6731 = vadd.xlane.f32.xlu1 %v6730_v63  ;;  %v6727_v37 = vsel %vm531_vm0, %v6717_v10, 0.0  ;;  %v7797_v49 = vld [vmem:[%s13167_s9 + $0x98] sm:$0xff]  ;;  %v7798_v63 = vld [vmem:[%s13167_s9 + $0xa0] sm:$0xff] }
0x174a   : > { %v6675_v4 = vpop.xlane.xlu1 %6674  ;;  %6728 = vadd.xlane.f32.xlu0 %v6727_v37  ;;  %v9686_v10 = vpack.c.bf16 %v7797_v49, %v7796_v6  ;;  %v7799_v37 = vld [vmem:[%s13167_s9 + $0xa8] sm:$0xff]  ;;  %9683 = vmatprep.subr.bf16.mxu1 %v9682_v26 }
0x174b   : > { %v6699_v31 = vmul.f32 0.03125, %v6675_v4  ;;  %v6720_v7 = vmul.f32 %v12881_v44, %v12881_v44  ;;  %9685 = vmatpush3.bf16.msra.mxu1 %v9682_v26  ;;  %v9690_v4 = vpack.c.bf16 %v7799_v37, %v7798_v63 }
0x174c   : > { %9687 = vmatprep.subr.bf16.mxu1 %v9686_v10 }
0x174d   : > { %v12887_v56 = vsub.f32 %v12835_v48, %v6699_v31  ;;  %v6736_v55 = vsel %vm531_vm0, %v6720_v7, 0.0  ;;  %v7800_v31 = vld [vmem:[%s13167_s9 + $0xb0] sm:$0xff]  ;;  %v7801_v7 = vld [vmem:[%s13167_s9 + $0xb8] sm:$0xff] }
0x174e   : > { %v6681_v15 = vpop.xlane.xlu1 %6680  ;;  %v6687_v2 = vpop.xlane.xlu0 %6686  ;;  %6737 = vadd.xlane.f32.xlu1 %v6736_v55  ;;  %v9694_v55 = vpack.c.bf16 %v7801_v7, %v7800_v31 }
0x174f   : > { %v6701_v36 = vmul.f32 0.03125, %v6681_v15  ;;  %v6703_v51 = vmul.f32 0.03125, %v6687_v2  ;;  %v6719_v30 = vmul.f32 %v12887_v56, %v12887_v56  ;;  %9689 = vmatpush3.bf16.msra.mxu1 %v9686_v10  ;;  %v7802_v15 = vld [vmem:[%s13167_s9 + $0xc0] sm:$0xff]  ;;  %v7803_v2 = vld [vmem:[%s13167_s9 + $0xc8] sm:$0xff] }
0x1750   : > { %9691 = vmatprep.subr.bf16.mxu1 %v9690_v4 }
0x1751   : > { %v12893_v32 = vsub.f32 %v12838_v27, %v6701_v36  ;;  %v12896_v13 = vsub.f32 %v12844_v62, %v6703_v51  ;;  %v6733_v38 = vsel %vm531_vm0, %v6719_v30, 0.0  ;;  %v9698_v36 = vpack.c.bf16 %v7803_v2, %v7802_v15  ;;  %v7804_v51 = vld [vmem:[%s13167_s9 + $0xd0] sm:$0xff]  ;;  %v7805_v30 = vld [vmem:[%s13167_s9 + $0xd8] sm:$0xff] }
0x1752   : > { %v6684_v1 = vpop.xlane.xlu1 %6683  ;;  %6734 = vadd.xlane.f32.xlu0 %v6733_v38  ;;  %v6693_v11 = vpop.xlane.xlu0 %6692  ;;  %v9702_v38 = vpack.c.bf16 %v7805_v30, %v7804_v51 }
0x1753   : > { %v6702_v60 = vmul.f32 0.03125, %v6684_v1  ;;  %v6705_v57 = vmul.f32 0.03125, %v6693_v11  ;;  %v6721_v53 = vmul.f32 %v12893_v32, %v12893_v32  ;;  %v6723_v54 = vmul.f32 %v12896_v13, %v12896_v13  ;;  %9693 = vmatpush3.bf16.msra.mxu1 %v9690_v4  ;;  %v7806_v1 = vld [vmem:[%s13167_s9 + $0xe0] sm:$0xff]  ;;  %v7807_v11 = vld [vmem:[%s13167_s9 + $0xe8] sm:$0xff] }
0x1754   : > { %9695 = vmatprep.subr.bf16.mxu1 %v9694_v55 }
0x1755   : > { %v12902_v40 = vsub.f32 %v12846_v21, %v6702_v60  ;;  %v12905_v41 = vsub.f32 %v12854_v52, %v6705_v57  ;;  %v6739_v50 = vsel %vm531_vm0, %v6721_v53, 0.0  ;;  %v6745_v5 = vsel %vm531_vm0, %v6723_v54, 0.0 }
0x1756   : > { %v6690_v19 = vpop.xlane.xlu1 %6689  ;;  %6740 = vadd.xlane.f32.xlu0 %v6739_v50  ;;  %v9706_v60 = vpack.c.bf16 %v7807_v11, %v7806_v1 }
0x1757   : > { %v6704_v35 = vmul.f32 0.03125, %v6690_v19  ;;  %v6722_v47 = vmul.f32 %v12902_v40, %v12902_v40  ;;  %v6725_v12 = vmul.f32 %v12905_v41, %v12905_v41  ;;  %9697 = vmatpush3.bf16.msra.mxu1 %v9694_v55 }
0x1758   : > { %9699 = vmatprep.subr.bf16.mxu1 %v9698_v36 }
0x1759   : > { %v12913_v34 = vsub.f32 %v12856_v61, %v6704_v35  ;;  %v6742_v22 = vsel %vm531_vm0, %v6722_v47, 0.0  ;;  %v6751_v18 = vsel %vm531_vm0, %v6725_v12, 0.0 }
0x175a   : > { %6743 = vadd.xlane.f32.xlu1 %v6742_v22  ;;  %v6696_v33 = vpop.xlane.xlu1 %6695  ;;  %6746 = vadd.xlane.f32.xlu0 %v6745_v5 }
0x175b   : > { %v6706_v3 = vmul.f32 0.03125, %v6696_v33  ;;  %v6724_v29 = vmul.f32 %v12913_v34, %v12913_v34  ;;  %9701 = vmatpush3.bf16.msra.mxu1 %v9698_v36 }
0x175c   : > { %9703 = vmatprep.subr.bf16.mxu1 %v9702_v38 }
0x175d   : > { %v12922_v42 = vsub.f32 %v12863_v45, %v6706_v3  ;;  %v6748_v58 = vsel %vm531_vm0, %v6724_v29, 0.0 }
0x175e   : > { %6749 = vadd.xlane.f32.xlu1 %v6748_v58  ;;  %6752 = vadd.xlane.f32.xlu0 %v6751_v18 }
0x175f   : > { %v6726_v17 = vmul.f32 %v12922_v42, %v12922_v42  ;;  %9705 = vmatpush3.bf16.msra.mxu1 %v9702_v38 }
0x1760   : > { %9707 = vmatprep.subr.bf16.mxu1 %v9706_v60 }
0x1761   : > { %v6754_v23 = vsel %vm531_vm0, %v6726_v17, 0.0 }
0x1762   : > { %6755 = vadd.xlane.f32.xlu1 %v6754_v23 }
0x1763   : > { %9709 = vmatpush3.bf16.msra.mxu1 %v9706_v60 }
0x17d6   : > { %v6732_v57 = vpop.xlane.xlu1 %6731 }
0x17d7   : > { %v6758_v53 = vmul.f32 0.03125, %v6732_v57  ;;  %v6729_v50 = vpop.xlane.xlu0 %6728 }
0x17d8   : > { %v6757_v54 = vmul.f32 0.03125, %v6729_v50 }
0x17d9   : > { %v6768_v19 = vadd.f32 1e-05, %v6758_v53 }
0x17da   : > { %v6767_v35 = vadd.f32 1e-05, %v6757_v54 }
0x17db   : > { %10593 = vrsqrt.f32 %v6768_v19  ;;  %v6738_v47 = vpop.xlane.xlu1 %6737 }
0x17dc   : > { %10595 = vrsqrt.f32 %v6767_v35  ;;  %v6760_v22 = vmul.f32 0.03125, %v6738_v47 }
0x17de   : > { %v6770_v5 = vadd.f32 1e-05, %v6760_v22 }
0x17df   : > { %v6735_v12 = vpop.xlane.xlu0 %6734 }
0x17e0   : > { %v6759_v33 = vmul.f32 0.03125, %v6735_v12  ;;  %10597 = vrsqrt.f32 %v6770_v5 }
0x17e2   : > { %v6769_v3 = vadd.f32 1e-05, %v6759_v33 }
0x17e3   : > { %v6741_v29 = vpop.xlane.xlu0 %6740 }
0x17e4   : > { %10599 = vrsqrt.f32 %v6769_v3  ;;  %v6761_v58 = vmul.f32 0.03125, %v6741_v29 }
0x17e5   : > { %v10594_v18 = vpop.eup %10593 }
0x17e6   : > { %v10596_v17 = vpop.eup %10595  ;;  %v6771_v24 = vadd.f32 1e-05, %v6761_v58  ;;  %v6788_v25 = vmul.f32 %v10594_v18, %v12870_v9 }
0x17e7   : > { %v6744_v43 = vpop.xlane.xlu1 %6743  ;;  %v6747_v39 = vpop.xlane.xlu0 %6746  ;;  %v6787_v23 = vmul.f32 %v10596_v17, %v12873_v0 }
0x17e8   : > { %10601 = vrsqrt.f32 %v6771_v24  ;;  %v6762_v28 = vmul.f32 0.03125, %v6744_v43  ;;  %v6763_v59 = vmul.f32 0.03125, %v6747_v39 }
0x17e9   : > { %9156 = vmatprep.mubr.msk.f32.mxu0 %vm531_vm0, %v6787_v23 }
0x17ea   : > { %v6772_v16 = vadd.f32 1e-05, %v6762_v28  ;;  %v6773_v14 = vadd.f32 1e-05, %v6763_v59  ;;  %9157 = vmatmul.mubr.msk.f32.vlgmr.msra.gmra.mrb[110].mxu0 %vm531_vm0, %v6788_v25  ;;  %v10598_v63 = vpop.eup %10597 }
0x17eb   : > { %v6750_v6 = vpop.xlane.xlu1 %6749  ;;  %v6753_v26 = vpop.xlane.xlu0 %6752  ;;  %v6790_v55 = vmul.f32 %v10598_v63, %v12881_v44 }
0x17ec   : > { %10603 = vrsqrt.f32 %v6772_v16  ;;  %v6764_v49 = vmul.f32 0.03125, %v6750_v6  ;;  %v6765_v10 = vmul.f32 0.03125, %v6753_v26 }
0x17ed   : > { %10605 = vrsqrt.f32 %v6773_v14 }
0x17ee   : > { %v10600_v37 = vpop.eup %10599  ;;  %v6774_v0 = vadd.f32 1e-05, %v6764_v49  ;;  %v6775_v4 = vadd.f32 1e-05, %v6765_v10 }
0x17ef   : > { %v6756_v9 = vpop.xlane.xlu1 %6755  ;;  %v6789_v31 = vmul.f32 %v10600_v37, %v12887_v56 }
0x17f0   : > { %10607 = vrsqrt.f32 %v6774_v0  ;;  %v6766_v7 = vmul.f32 0.03125, %v6756_v9  ;;  %v7811_v0 = vld [vmem:[%s13168_s10 + $0x1] ss:$0 sm:$0xff] }
0x17f1   : > { %10609 = vrsqrt.f32 %v6775_v4  ;;  %9159 = vmatprep.mubr.msk.f32.mxu0 %vm531_vm0, %v6789_v31 }
0x17f2   : > { %v10602_v15 = vpop.eup %10601  ;;  %v6776_v2 = vadd.f32 1e-05, %v6766_v7  ;;  %9160 = vmatmul.mubr.msk.f32.gmra.mrb[112].mxu0 %vm531_vm0, %v6790_v55 }
0x17f3   : > { %v6791_v36 = vmul.f32 %v10602_v15, %v12893_v32 }
0x17f4   : > { %10611 = vrsqrt.f32 %v6776_v2 }
0x17f5   : > { %9162 = vmatprep.mubr.msk.f32.mxu0 %vm531_vm0, %v6791_v36 }
0x17f6   : > { %v10604_v51 = vpop.eup %10603 }
0x17f7   : > { %v10606_v30 = vpop.eup %10605  ;;  %v6792_v56 = vmul.f32 %v10604_v51, %v12902_v40  ;;  %v7809_v40 = vld [vmem:[%s13167_s9 + $0xf8] sm:$0xff] }
0x17f8   : > { %v6793_v38 = vmul.f32 %v10606_v30, %v12896_v13  ;;  %v7808_v13 = vld [vmem:[%s13167_s9 + $0xf0] sm:$0xff] }
0x17f9   : > { %9163 = vmatmul.mubr.msk.f32.gmra.mrb[114].mxu0 %vm531_vm0, %v6792_v56 }
0x17fa   : > { %v10608_v44 = vpop.eup %10607  ;;  %9165 = vmatprep.mubr.msk.f32.mxu0 %vm531_vm0, %v6793_v38 }
0x17fb   : > { %v10610_v1 = vpop.eup %10609  ;;  %v6794_v11 = vmul.f32 %v10608_v44, %v12913_v34  ;;  %v9710_v34 = vpack.c.bf16 %v7809_v40, %v7808_v13 }
0x17fc   : > { %v6795_v60 = vmul.f32 %v10610_v1, %v12905_v41  ;;  %v7783_v41 = vld [vmem:[%s13166_s8 + $0x1] ss:$0 sm:$0xff] }
0x17fd   : > { %9166 = vmatmul.mubr.msk.f32.gmra.mrb[116].mxu0 %vm531_vm0, %v6794_v11  ;;  %9711 = vmatprep.subr.bf16.mxu1 %v9710_v34 }
0x17fe   : > { %v10612_v32 = vpop.eup %10611  ;;  %9168 = vmatprep.mubr.msk.f32.mxu0 %vm531_vm0, %v6795_v60  ;;  %9713 = vmatpush3.bf16.msra.mxu1 %v9710_v34 }
0x17ff   : > { %v6796_v57 = vmul.f32 %v10612_v32, %v12922_v42 }
0x1801   : > { %9169 = vmatmul.mubr.msk.f32.gmra.mrb[118].mxu0 %vm531_vm0, %v6796_v57 }
0x18bd   : > { %v9158_v53 = vpop.f32.mrb[110].mxu0 }
0x18be   : > { %v6912_v50 = vadd.f32 %v9158_v53, %v7783_v41  ;;  %v6906_v42 = vpop.f32.mrb[111].mxu0 }
0x18bf   : > { %v6907_v54 = vadd.f32 %v7783_v41, %v6906_v42 }
0x18c0   : > { %v6956_v35 = vmax.f32 %v6912_v50, 0.0 }
0x18c1   : > { %v6955_v19 = vmax.f32 %v6907_v54, 0.0 }
0x18c3   : > { %9203 = vmatprep.mubr.f32.mxu1 %v6955_v19 }
0x18c4   : > { %9204 = vmatmul.mubr.f32.vlgmr.msra.gmra.mrb[110].mxu1 %v6956_v35 }
0x18c5   : > { %v9161_v47 = vpop.f32.mrb[112].mxu0 }
0x18c6   : > { %v6922_v22 = vadd.f32 %v9161_v47, %v7783_v41  ;;  %v6916_v5 = vpop.f32.mrb[113].mxu0 }
0x18c7   : > { %v6917_v12 = vadd.f32 %v7783_v41, %v6916_v5 }
0x18c8   : > { %v6958_v3 = vmax.f32 %v6922_v22, 0.0 }
0x18c9   : > { %v6957_v33 = vmax.f32 %v6917_v12, 0.0 }
0x18cb   : > { %9206 = vmatprep.mubr.f32.mxu1 %v6957_v33 }
0x18cc   : > { %v9164_v29 = vpop.f32.mrb[114].mxu0  ;;  %9207 = vmatmul.mubr.f32.gmra.mrb[112].mxu1 %v6958_v3 }
0x18cd   : > { %v6932_v58 = vadd.f32 %v9164_v29, %v7783_v41  ;;  %v6926_v18 = vpop.f32.mrb[115].mxu0 }
0x18ce   : > { %v6927_v17 = vadd.f32 %v7783_v41, %v6926_v18 }
0x18cf   : > { %v6960_v39 = vmax.f32 %v6932_v58, 0.0 }
0x18d0   : > { %v6959_v24 = vmax.f32 %v6927_v17, 0.0  ;;  %v9167_v43 = vpop.f32.mrb[116].mxu0 }
0x18d1   : > { %v6942_v23 = vadd.f32 %v9167_v43, %v7783_v41  ;;  %v6936_v25 = vpop.f32.mrb[117].mxu0 }
0x18d2   : > { %v6937_v28 = vadd.f32 %v7783_v41, %v6936_v25  ;;  %9209 = vmatprep.mubr.f32.mxu1 %v6959_v24 }
0x18d3   : > { %9210 = vmatmul.mubr.f32.gmra.mrb[114].mxu1 %v6960_v39  ;;  %v6962_v14 = vmax.f32 %v6942_v23, 0.0 }
0x18d4   : > { %v6961_v59 = vmax.f32 %v6937_v28, 0.0  ;;  %v9170_v16 = vpop.f32.mrb[118].mxu0 }
0x18d5   : > { %v6952_v6 = vadd.f32 %v9170_v16, %v7783_v41  ;;  %v6946_v26 = vpop.f32.mrb[119].mxu0 }
0x18d6   : > { %v6947_v49 = vadd.f32 %v7783_v41, %v6946_v26  ;;  %9212 = vmatprep.mubr.f32.mxu1 %v6961_v59 }
0x18d7   : > { %9213 = vmatmul.mubr.f32.gmra.mrb[116].mxu1 %v6962_v14  ;;  %v6964_v63 = vmax.f32 %v6952_v6, 0.0 }
0x18d8   : > { %v6963_v10 = vmax.f32 %v6947_v49, 0.0 }
0x18da   : > { %9215 = vmatprep.mubr.f32.mxu1 %v6963_v10 }
0x18db   : > { %9216 = vmatmul.mubr.f32.gmra.mrb[118].mxu1 %v6964_v63 }
0x1997   : > { %v9205_v37 = vpop.f32.mrb[110].mxu1 }
0x1998   : > { %v7098_v4 = vadd.f32 %v12821_v46, %v9205_v37  ;;  %v7048_v9 = vpop.f32.mrb[111].mxu1 }
0x1999   : > { %v7097_v31 = vadd.f32 %v12823_v8, %v7048_v9 }
0x199a   : > { %v7116_v7 = vadd.f32 %v7811_v0, %v7098_v4 }
0x199b   : > { %v7115_v55 = vadd.f32 %v7811_v0, %v7097_v31 }
0x199c   : > { %v7128_v15 = vsel %vm531_vm0, %v7116_v7, 0.0 }
0x199d   : > { %7129 = vadd.xlane.f32.xlu1 %v7128_v15  ;;  %v7125_v2 = vsel %vm531_vm0, %v7115_v55, 0.0 }
0x199e   : > { %7126 = vadd.xlane.f32.xlu0 %v7125_v2 }
0x199f   : > { %v9208_v36 = vpop.f32.mrb[112].mxu1 }
0x19a0   : > { %v7100_v51 = vadd.f32 %v12830_v20, %v9208_v36  ;;  %v7058_v30 = vpop.f32.mrb[113].mxu1 }
0x19a1   : > { %v7099_v56 = vadd.f32 %v12835_v48, %v7058_v30 }
0x19a2   : > { %v7118_v38 = vadd.f32 %v7811_v0, %v7100_v51 }
0x19a3   : > { %v7117_v44 = vadd.f32 %v7811_v0, %v7099_v56 }
0x19a4   : > { %v7134_v46 = vsel %vm531_vm0, %v7118_v38, 0.0 }
0x19a5   : > { %7135 = vadd.xlane.f32.xlu1 %v7134_v46  ;;  %v7131_v8 = vsel %vm531_vm0, %v7117_v44, 0.0 }
0x19a6   : > { %7132 = vadd.xlane.f32.xlu0 %v7131_v8  ;;  %v9211_v1 = vpop.f32.mrb[114].mxu1 }
0x19a7   : > { %v7102_v11 = vadd.f32 %v12846_v21, %v9211_v1  ;;  %v7068_v60 = vpop.f32.mrb[115].mxu1 }
0x19a8   : > { %v7101_v32 = vadd.f32 %v12838_v27, %v7068_v60 }
0x19a9   : > { %v7120_v57 = vadd.f32 %v7811_v0, %v7102_v11 }
0x19aa   : > { %v7119_v13 = vadd.f32 %v7811_v0, %v7101_v32  ;;  %v9214_v20 = vpop.f32.mrb[116].mxu1 }
0x19ab   : > { %v7104_v40 = vadd.f32 %v12856_v61, %v9214_v20  ;;  %v7078_v48 = vpop.f32.mrb[117].mxu1  ;;  %v7140_v34 = vsel %vm531_vm0, %v7120_v57, 0.0 }
0x19ac   : > { %v7103_v41 = vadd.f32 %v12844_v62, %v7078_v48  ;;  %7141 = vadd.xlane.f32.xlu1 %v7140_v34  ;;  %v7137_v53 = vsel %vm531_vm0, %v7119_v13, 0.0 }
0x19ad   : > { %v7122_v50 = vadd.f32 %v7811_v0, %v7104_v40  ;;  %7138 = vadd.xlane.f32.xlu0 %v7137_v53 }
0x19ae   : > { %v7121_v42 = vadd.f32 %v7811_v0, %v7103_v41  ;;  %v9217_v21 = vpop.f32.mrb[118].mxu1 }
0x19af   : > { %v7106_v54 = vadd.f32 %v12863_v45, %v9217_v21  ;;  %v7088_v27 = vpop.f32.mrb[119].mxu1  ;;  %v7146_v19 = vsel %vm531_vm0, %v7122_v50, 0.0 }
0x19b0   : > { %v7105_v35 = vadd.f32 %v12854_v52, %v7088_v27  ;;  %7147 = vadd.xlane.f32.xlu1 %v7146_v19  ;;  %v7143_v61 = vsel %vm531_vm0, %v7121_v42, 0.0 }
0x19b1   : > { %v7124_v47 = vadd.f32 %v7811_v0, %v7106_v54  ;;  %7144 = vadd.xlane.f32.xlu0 %v7143_v61 }
0x19b2   : > { %v7123_v62 = vadd.f32 %v7811_v0, %v7105_v35 }
0x19b3   : > { %v7152_v22 = vsel %vm531_vm0, %v7124_v47, 0.0 }
0x19b4   : > { %7153 = vadd.xlane.f32.xlu1 %v7152_v22  ;;  %v7149_v5 = vsel %vm531_vm0, %v7123_v62, 0.0 }
0x19b5   : > { %7150 = vadd.xlane.f32.xlu0 %v7149_v5  ;;  %v13088_v5 = vld [vmem:[%s13169_s11] ss:$0 sm:$0xff] }
0x1a2a   : > { %v7130_v12 = vpop.xlane.xlu1 %7129 }
0x1a2b   : > { %v7156_v33 = vmul.f32 0.03125, %v7130_v12  ;;  %v7127_v45 = vpop.xlane.xlu0 %7126 }
0x1a2c   : > { %v7155_v3 = vmul.f32 0.03125, %v7127_v45 }
0x1a2d   : > { %v13035_v29 = vsub.f32 %v7116_v7, %v7156_v33 }
0x1a2e   : > { %v13037_v58 = vsub.f32 %v7115_v55, %v7155_v3 }
0x1a2f   : > { %v7176_v52 = vmul.f32 %v13035_v29, %v13035_v29 }
0x1a30   : > { %v7175_v18 = vmul.f32 %v13037_v58, %v13037_v58 }
0x1a31   : > { %v7188_v17 = vsel %vm531_vm0, %v7176_v52, 0.0 }
0x1a32   : > { %v7136_v24 = vpop.xlane.xlu1 %7135  ;;  %7189 = vadd.xlane.f32.xlu1 %v7188_v17  ;;  %v7185_v43 = vsel %vm531_vm0, %v7175_v18, 0.0  ;;  %v13094_v18 = vld [vmem:[%s13170_s12] ss:$0 sm:$0xff] }
0x1a33   : > { %v7158_v39 = vmul.f32 0.03125, %v7136_v24  ;;  %7186 = vadd.xlane.f32.xlu0 %v7185_v43  ;;  %v7133_v23 = vpop.xlane.xlu0 %7132 }
0x1a34   : > { %v7157_v25 = vmul.f32 0.03125, %v7133_v23 }
0x1a35   : > { %v13045_v28 = vsub.f32 %v7118_v38, %v7158_v39 }
0x1a36   : > { %v13047_v59 = vsub.f32 %v7117_v44, %v7157_v25 }
0x1a37   : > { %v7178_v16 = vmul.f32 %v13045_v28, %v13045_v28 }
0x1a38   : > { %v7177_v14 = vmul.f32 %v13047_v59, %v13047_v59 }
0x1a39   : > { %v7142_v6 = vpop.xlane.xlu1 %7141  ;;  %v7194_v26 = vsel %vm531_vm0, %v7178_v16, 0.0 }
0x1a3a   : > { %v7160_v49 = vmul.f32 0.03125, %v7142_v6  ;;  %7195 = vadd.xlane.f32.xlu1 %v7194_v26  ;;  %v7139_v10 = vpop.xlane.xlu0 %7138  ;;  %v7191_v63 = vsel %vm531_vm0, %v7177_v14, 0.0 }
0x1a3b   : > { %v7159_v37 = vmul.f32 0.03125, %v7139_v10  ;;  %7192 = vadd.xlane.f32.xlu0 %v7191_v63 }
0x1a3c   : > { %v13055_v0 = vsub.f32 %v7120_v57, %v7160_v49 }
0x1a3d   : > { %v13057_v4 = vsub.f32 %v7119_v13, %v7159_v37  ;;  %v7148_v9 = vpop.xlane.xlu1 %7147 }
0x1a3e   : > { %v7162_v31 = vmul.f32 0.03125, %v7148_v9  ;;  %v7145_v7 = vpop.xlane.xlu0 %7144  ;;  %v7180_v55 = vmul.f32 %v13055_v0, %v13055_v0 }
0x1a3f   : > { %v7161_v15 = vmul.f32 0.03125, %v7145_v7  ;;  %v7179_v2 = vmul.f32 %v13057_v4, %v13057_v4 }
0x1a40   : > { %v13063_v36 = vsub.f32 %v7122_v50, %v7162_v31  ;;  %v7200_v51 = vsel %vm531_vm0, %v7180_v55, 0.0 }
0x1a41   : > { %v13066_v30 = vsub.f32 %v7121_v42, %v7161_v15  ;;  %7201 = vadd.xlane.f32.xlu1 %v7200_v51  ;;  %v7154_v56 = vpop.xlane.xlu1 %7153  ;;  %v7197_v38 = vsel %vm531_vm0, %v7179_v2, 0.0 }
0x1a42   : > { %v7164_v44 = vmul.f32 0.03125, %v7154_v56  ;;  %7198 = vadd.xlane.f32.xlu0 %v7197_v38  ;;  %v7151_v46 = vpop.xlane.xlu0 %7150  ;;  %v7182_v8 = vmul.f32 %v13063_v36, %v13063_v36 }
0x1a43   : > { %v7163_v1 = vmul.f32 0.03125, %v7151_v46  ;;  %v7181_v11 = vmul.f32 %v13066_v30, %v13066_v30 }
0x1a44   : > { %v13073_v60 = vsub.f32 %v7124_v47, %v7164_v44  ;;  %v7206_v32 = vsel %vm531_vm0, %v7182_v8, 0.0 }
0x1a45   : > { %v13076_v57 = vsub.f32 %v7123_v62, %v7163_v1  ;;  %7207 = vadd.xlane.f32.xlu1 %v7206_v32  ;;  %v7203_v13 = vsel %vm531_vm0, %v7181_v11, 0.0 }
0x1a46   : > { %7204 = vadd.xlane.f32.xlu0 %v7203_v13  ;;  %v7184_v20 = vmul.f32 %v13073_v60, %v13073_v60 }
0x1a47   : > { %v7183_v40 = vmul.f32 %v13076_v57, %v13076_v57 }
0x1a48   : > { %v7212_v48 = vsel %vm531_vm0, %v7184_v20, 0.0 }
0x1a49   : > { %7213 = vadd.xlane.f32.xlu1 %v7212_v48  ;;  %v7209_v34 = vsel %vm531_vm0, %v7183_v40, 0.0 }
0x1a4a   : > { %7210 = vadd.xlane.f32.xlu0 %v7209_v34 }
0x1abf   : > { %v7190_v41 = vpop.xlane.xlu1 %7189 }
0x1ac0   : > { %v7216_v53 = vmul.f32 0.03125, %v7190_v41  ;;  %v7187_v50 = vpop.xlane.xlu0 %7186 }
0x1ac1   : > { %v7215_v42 = vmul.f32 0.03125, %v7187_v50 }
0x1ac2   : > { %v7226_v21 = vadd.f32 1e-05, %v7216_v53 }
0x1ac3   : > { %v7225_v54 = vadd.f32 1e-05, %v7215_v42 }
0x1ac4   : > { %10613 = vrsqrt.f32 %v7226_v21 }
0x1ac5   : > { %10615 = vrsqrt.f32 %v7225_v54 }
0x1ac7   : > { %v7196_v27 = vpop.xlane.xlu1 %7195 }
0x1ac8   : > { %v7218_v19 = vmul.f32 0.03125, %v7196_v27  ;;  %v7193_v35 = vpop.xlane.xlu0 %7192 }
0x1ac9   : > { %v7217_v61 = vmul.f32 0.03125, %v7193_v35 }
0x1aca   : > { %v7228_v47 = vadd.f32 1e-05, %v7218_v19 }
0x1acb   : > { %v7227_v62 = vadd.f32 1e-05, %v7217_v61 }
0x1acc   : > { %10617 = vrsqrt.f32 %v7228_v47 }
0x1acd   : > { %10619 = vrsqrt.f32 %v7227_v62 }
0x1ace   : > { %v10614_v22 = vpop.eup %10613  ;;  %v7202_v12 = vpop.xlane.xlu1 %7201 }
0x1acf   : > { %v10616_v33 = vpop.eup %10615  ;;  %v7246_v45 = vmul.f32 %v10614_v22, %v13035_v29  ;;  %v7220_v3 = vmul.f32 0.03125, %v7202_v12  ;;  %v7199_v52 = vpop.xlane.xlu0 %7198 }
0x1ad0   : > { %v7245_v17 = vmul.f32 %v10616_v33, %v13037_v58  ;;  %v7219_v24 = vmul.f32 0.03125, %v7199_v52 }
0x1ad1   : > { %v7263_v43 = vmul.f32 %v13088_v5, %v7246_v45  ;;  %v7230_v39 = vadd.f32 1e-05, %v7220_v3 }
0x1ad2   : > { %v7262_v29 = vmul.f32 %v13088_v5, %v7245_v17  ;;  %v7229_v23 = vadd.f32 1e-05, %v7219_v24  ;;  %v7208_v25 = vpop.xlane.xlu1 %7207 }
0x1ad3   : > { %v7280_v16 = vadd.f32 %v13094_v18, %v7263_v43  ;;  %10621 = vrsqrt.f32 %v7230_v39  ;;  %v7222_v58 = vmul.f32 0.03125, %v7208_v25  ;;  %v7205_v14 = vpop.xlane.xlu0 %7204 }
0x1ad4   : > { %v7279_v6 = vadd.f32 %v13094_v18, %v7262_v29  ;;  %10623 = vrsqrt.f32 %v7229_v23  ;;  %v7221_v26 = vmul.f32 0.03125, %v7205_v14 }
0x1ad5   : > { %7290 = vst.msk [vmem:[%s13103_s27 + $0x8] sm:$0xff] %vm531_vm0, %v7280_v16  ;;  %v7232_v49 = vadd.f32 1e-05, %v7222_v58 }
0x1ad6   : > { %v10618_v10 = vpop.eup %10617  ;;  %7289 = vst.msk [vmem:[%s13103_s27] sm:$0xff] %vm531_vm0, %v7279_v6  ;;  %v7231_v63 = vadd.f32 1e-05, %v7221_v26  ;;  %v7214_v37 = vpop.xlane.xlu1 %7213 }
0x1ad7   : > { %v10620_v9 = vpop.eup %10619  ;;  %v7248_v31 = vmul.f32 %v10618_v10, %v13045_v28  ;;  %10625 = vrsqrt.f32 %v7232_v49  ;;  %v7224_v7 = vmul.f32 0.03125, %v7214_v37  ;;  %v7211_v55 = vpop.xlane.xlu0 %7210 }
0x1ad8   : > { %v7247_v15 = vmul.f32 %v10620_v9, %v13047_v59  ;;  %10627 = vrsqrt.f32 %v7231_v63  ;;  %v7223_v2 = vmul.f32 0.03125, %v7211_v55 }
0x1ad9   : > { %v7265_v51 = vmul.f32 %v13088_v5, %v7248_v31  ;;  %v7234_v56 = vadd.f32 1e-05, %v7224_v7 }
0x1ada   : > { %v7264_v38 = vmul.f32 %v13088_v5, %v7247_v15  ;;  %v7233_v44 = vadd.f32 1e-05, %v7223_v2 }
0x1adb   : > { %v7282_v46 = vadd.f32 %v13094_v18, %v7265_v51  ;;  %10629 = vrsqrt.f32 %v7234_v56 }
0x1adc   : > { %v7281_v28 = vadd.f32 %v13094_v18, %v7264_v38  ;;  %10631 = vrsqrt.f32 %v7233_v44 }
0x1add   : > { %v10622_v8 = vpop.eup %10621  ;;  %7292 = vst.msk [vmem:[%s13103_s27 + $0x18] sm:$0xff] %vm531_vm0, %v7282_v46 }
0x1ade   : > { %v10624_v59 = vpop.eup %10623  ;;  %7291 = vst.msk [vmem:[%s13103_s27 + $0x10] sm:$0xff] %vm531_vm0, %v7281_v28  ;;  %v7250_v1 = vmul.f32 %v10622_v8, %v13055_v0 }
0x1adf   : > { %v7249_v11 = vmul.f32 %v10624_v59, %v13057_v4 }
0x1ae0   : > { %v7267_v32 = vmul.f32 %v13088_v5, %v7250_v1 }
0x1ae1   : > { %v10626_v13 = vpop.eup %10625  ;;  %v7266_v20 = vmul.f32 %v13088_v5, %v7249_v11 }
0x1ae2   : > { %v10628_v40 = vpop.eup %10627  ;;  %v7284_v48 = vadd.f32 %v13094_v18, %v7267_v32  ;;  %v7252_v34 = vmul.f32 %v10626_v13, %v13063_v36 }
0x1ae3   : > { %v7283_v41 = vadd.f32 %v13094_v18, %v7266_v20  ;;  %v7251_v53 = vmul.f32 %v10628_v40, %v13066_v30 }
0x1ae4   : > { %7294 = vst.msk [vmem:[%s13103_s27 + $0x28] sm:$0xff] %vm531_vm0, %v7284_v48  ;;  %v7269_v0 = vmul.f32 %v13088_v5, %v7252_v34 }
0x1ae5   : > { %v10630_v4 = vpop.eup %10629  ;;  %7293 = vst.msk [vmem:[%s13103_s27 + $0x20] sm:$0xff] %vm531_vm0, %v7283_v41  ;;  %v7268_v50 = vmul.f32 %v13088_v5, %v7251_v53 }
0x1ae6   : > { %v10632_v42 = vpop.eup %10631  ;;  %v7286_v21 = vadd.f32 %v13094_v18, %v7269_v0  ;;  %v7254_v54 = vmul.f32 %v10630_v4, %v13073_v60 }
0x1ae7   : > { %v7285_v36 = vadd.f32 %v13094_v18, %v7268_v50  ;;  %v7253_v27 = vmul.f32 %v10632_v42, %v13076_v57 }
0x1ae8   : > { %7296 = vst.msk [vmem:[%s13103_s27 + $0x38] sm:$0xff] %vm531_vm0, %v7286_v21  ;;  %v7271_v30 = vmul.f32 %v13088_v5, %v7254_v54 }
0x1ae9   : > { %7295 = vst.msk [vmem:[%s13103_s27 + $0x30] sm:$0xff] %vm531_vm0, %v7285_v36  ;;  %v7270_v19 = vmul.f32 %v13088_v5, %v7253_v27 }
0x1aea   : > { %v7288_v35 = vadd.f32 %v13094_v18, %v7271_v30 }
0x1aeb   : > { %v7287_v60 = vadd.f32 %v13094_v18, %v7270_v19 }
0x1aec   : > { %7298 = vst.msk [vmem:[%s500_s17 + $0x8] sm:$0xff] %vm531_vm0, %v7288_v35 }
0x1aed   : > { %7297 = vst.msk [vmem:[%s500_s17] sm:$0xff] %vm531_vm0, %v7287_v60 }
0x1aee PF: > { %s25_s29 = sadd.s32 1, %s10639_s29  }
0x1aef   : > { %p22_p4 = scmp.ge.s32.totalorder %s25_s29, 4  }
0x1af1   :  { %24 = sbr.rel (!%p22_p4) target bundleno = 1 (0x1), region = 125 }

</bundles_post_ra>
